<compile_context>
chip_gen: v5e
topology: v5e:2x2
jax: 0.10.0
libtpu: 0.0.40
codegen_flags: <defaults>
</compile_context>

<pallas_src>
import jax
import jax.numpy as jnp
import numpy as np
from jax.experimental import pallas as pl
from jax.experimental.pallas import tpu as pltpu

EPS = 1e-5
LANE = 128


def _rup(x, m):
    return (x + m - 1) // m * m


# ---------------------------------------------------------------------------
# Kernel A: conv1 (3x3, stride s) + optional 1x1 shortcut conv, plus per-image
#           BN partial sums (sum, sum of squares) for bn1 / shortcut-bn.
# ---------------------------------------------------------------------------
def _make_kernel_a(s, Ho, Wo, C1p, has_sc):
    W2 = Wo + 2
    Lv = Ho * W2              # flattened output-grid rows (2 junk cols per row)
    L2s = (Ho + 3) * W2       # padded slab rows (conv2-input geometry + safety band)

    def kernel(*refs):
        if has_sc:
            (ph_ref, w1_ref, wsc_ref, maskv_ref,
             y1_ref, sc_ref, st1_ref, stsc_ref, acc_ref) = refs
        else:
            (ph_ref, w1_ref, maskv_ref, y1_ref, st1_ref, acc_ref) = refs

        # ---- conv1: 9 shifted bf16 matmuls, f32 accumulation in VMEM scratch ----
        acc_ref[...] = jnp.zeros_like(acc_ref)
        for dy in range(3):
            for dx in range(3):
                pq = (dy % s) * s + (dx % s)           # stride phase slab
                k = (dy // s) * W2 + (dx // s)         # flattened shift (contiguous rows)
                xs = ph_ref[0, pq, k:k + Lv, :]
                acc_ref[...] += jnp.dot(xs, w1_ref[dy * 3 + dx],
                                        preferred_element_type=jnp.float32)
        acc = acc_ref[...]

        # ---- bn1 partial sums over valid positions (MXU ones-matmul) ----
        valid = maskv_ref[...] > 0.5                    # (Lv, 1)
        yv = jnp.where(valid, acc, 0.0)
        ones = jnp.ones((1, Lv), jnp.float32)
        st1_ref[0, 0:1, :] = jnp.dot(ones, yv, preferred_element_type=jnp.float32)
        st1_ref[0, 1:2, :] = jnp.dot(ones, yv * yv, preferred_element_type=jnp.float32)

        # ---- store raw conv1 output directly in conv2-input geometry ----
        # interior lands at rows [W2+1, W2+1+Lv); only the small halo bands are
        # zeroed (they are re-masked in kernel B anyway) -> no redundant full memset.
        y1_ref[0, 0:W2 + 1, :] = jnp.zeros((W2 + 1, C1p), y1_ref.dtype)
        y1_ref[0, W2 + 1:W2 + 1 + Lv, :] = acc.astype(y1_ref.dtype)
        y1_ref[0, W2 + 1 + Lv:L2s, :] = jnp.zeros((L2s - W2 - 1 - Lv, C1p),
                                                  y1_ref.dtype)

        if has_sc:
            # 1x1 conv, stride s  ==  tap (dy, dx) = (1, 1) of the 3x3 grid
            pq = (1 % s) * s + (1 % s)
            k = (1 // s) * W2 + (1 // s)
            xsc = ph_ref[0, pq, k:k + Lv, :]
            scv = jnp.dot(xsc, wsc_ref[...], preferred_element_type=jnp.float32)
            scm = jnp.where(valid, scv, 0.0)
            stsc_ref[0, 0:1, :] = jnp.dot(ones, scm,
                                          preferred_element_type=jnp.float32)
            stsc_ref[0, 1:2, :] = jnp.dot(ones, scm * scm,
                                          preferred_element_type=jnp.float32)
            sc_ref[0] = scv.astype(sc_ref.dtype)

    return kernel


# ---------------------------------------------------------------------------
# Kernel B: apply bn1 affine + ReLU, conv2 (3x3, stride 1, pad 1) from a padded
#           VMEM scratch, emit per-image bn2 partial sums.
# ---------------------------------------------------------------------------
def _make_kernel_b(Ho, Wo, C1p):
    W2 = Wo + 2
    Lv = Ho * W2
    L2s = (Ho + 3) * W2

    def kernel(y1_ref, w2_ref, sc1_ref, sh1_ref, mask2_ref, maskv_ref,
               y2_ref, st2_ref, pad_ref, acc_ref):
        # bn1 affine + relu; halo/junk positions masked to the conv2 zero padding
        y1 = y1_ref[0].astype(jnp.float32)
        y1n = jnp.maximum(y1 * sc1_ref[...] + sh1_ref[...], 0.0)
        y1n = jnp.where(mask2_ref[...] > 0.5, y1n, 0.0)
        pad_ref[...] = y1n.astype(pad_ref.dtype)

        # conv2: 9 shifted bf16 matmuls from the padded VMEM scratch.
        # TODO(synk): fuse the 9 taps into a single (Lv, 9*C1p) x (9*C1p, C1p)
        # matmul (larger K for the 256-wide MXU) when the extra VMEM fits.
        acc_ref[...] = jnp.zeros_like(acc_ref)
        for dy in range(3):
            for dx in range(3):
                k = dy * W2 + dx
                acc_ref[...] += jnp.dot(pad_ref[k:k + Lv, :], w2_ref[dy * 3 + dx],
                                        preferred_element_type=jnp.float32)
        acc = acc_ref[...]

        # bn2 partial sums
        valid = maskv_ref[...] > 0.5
        yv = jnp.where(valid, acc, 0.0)
        ones = jnp.ones((1, Lv), jnp.float32)
        st2_ref[0, 0:1, :] = jnp.dot(ones, yv, preferred_element_type=jnp.float32)
        st2_ref[0, 1:2, :] = jnp.dot(ones, yv * yv, preferred_element_type=jnp.float32)

        y2_ref[0] = acc.astype(y2_ref.dtype)

    return kernel


# ---------------------------------------------------------------------------
# Kernel C: bn2 affine, shortcut-bn affine (or identity), residual add, ReLU.
# ---------------------------------------------------------------------------
def _make_kernel_c(has_sc):
    def kernel(*refs):
        if has_sc:
            (y2_ref, sc_ref, sc2_ref, sh2_ref, scs_ref, shs_ref, out_ref) = refs
        else:
            (y2_ref, sc_ref, sc2_ref, sh2_ref, out_ref) = refs
        y2 = y2_ref[0].astype(jnp.float32) * sc2_ref[...] + sh2_ref[...]
        sc = sc_ref[0].astype(jnp.float32)
        if has_sc:
            sc = sc * scs_ref[...] + shs_ref[...]
        out_ref[0] = jnp.maximum(y2 + sc, 0.0)

    return kernel


# ---------------------------------------------------------------------------
# Wrapper
# ---------------------------------------------------------------------------
def _basic_block_forward(x_nchw, params, stride):
    s = int(stride)
    x = jnp.transpose(x_nchw, (0, 2, 3, 1)).astype(jnp.float32)      # NHWC
    N, H, W, Cin = x.shape
    C1 = params["conv1_w"].shape[0]
    Ho = (H + 2 - 3) // s + 1
    Wo = (W + 2 - 3) // s + 1
    W2 = Wo + 2
    Lv = Ho * W2
    L2s = (Ho + 3) * W2
    Cin_p = _rup(Cin, LANE)
    C1_p = _rup(C1, LANE)
    has_sc = (s != 1) or (Cin != C1)
    cnt = float(N * Ho * Wo)

    # ---------- wrapper-side layout prep (cheap glue, no 9x duplication) ----------
    xc = jnp.pad(x, ((0, 0), (0, 0), (0, 0), (0, Cin_p - Cin)))
    hp = s * (Ho + 3)
    wp = s * (Wo + 2)
    xpad = jnp.pad(xc, ((0, 0), (1, hp - H - 1), (1, wp - W - 1), (0, 0)))
    phases = []
    for p in range(s):
        for q in range(s):
            ph = xpad[:, p::s, q::s, :][:, :Ho + 3, :Wo + 2, :]
            phases.append(ph.reshape(N, L2s, Cin_p))
    phases = jnp.stack(phases, axis=1).astype(jnp.bfloat16)   # (N, s*s, L2s, Cin_p)

    def conv_taps(w, cin, cin_p, cout, cout_p):
        # torch (Cout, Cin, 3, 3) -> (9, Cin_p, Cout_p) bf16
        t = jnp.transpose(w, (2, 3, 1, 0)).reshape(9, cin, cout)
        t = jnp.pad(t, ((0, 0), (0, cin_p - cin), (0, cout_p - cout)))
        return t.astype(jnp.bfloat16)

    w1t = conv_taps(params["conv1_w"], Cin, Cin_p, C1, C1_p)
    w2t = conv_taps(params["conv2_w"], C1, C1_p, C1, C1_p)

    def bn_vec(v):
        return jnp.pad(v.astype(jnp.float32), (0, C1_p - C1))

    g1, b1 = bn_vec(params["bn1_g"]), bn_vec(params["bn1_b"])
    g2, b2 = bn_vec(params["bn2_g"]), bn_vec(params["bn2_b"])

    # static validity masks (trace-time constants)
    col = np.arange(Lv) % W2
    maskv = jnp.asarray((col < Wo).astype(np.float32).reshape(Lv, 1))
    gidx = np.arange(L2s)
    inter = ((gidx // W2 >= 1) & (gidx // W2 <= Ho)
             & (gidx % W2 >= 1) & (gidx % W2 <= Wo))
    mask2 = jnp.asarray(inter.astype(np.float32).reshape(L2s, 1))

    def per_img(shape):
        nd = len(shape)
        return pl.BlockSpec((1,) + tuple(shape[1:]),
                            lambda n: (n,) + (0,) * (nd - 1))

    def whole(shape):
        nd = len(shape)
        return pl.BlockSpec(tuple(shape), lambda n: (0,) * nd)

    cparams = pltpu.CompilerParams(
        dimension_semantics=("parallel",),           # 2-TC split on v7x
        vmem_limit_bytes=48 * 1024 * 1024,           # explicit budget, fits v7x
    )
    # TODO(synk): for very large Ho*Wo add intra-image row tiling (with a halo
    # exchange between row tiles) instead of one whole image per grid step.

    # ------------------------------- pass A --------------------------------
    kernel_a = _make_kernel_a(s, Ho, Wo, C1_p, has_sc)
    a_in = [phases, w1t]
    a_specs = [per_img(phases.shape), whole(w1t.shape)]
    if has_sc:
        wsc = jnp.transpose(params["sc_w"][:, :, 0, 0], (1, 0))        # (Cin, C1)
        wsc = jnp.pad(wsc, ((0, Cin_p - Cin), (0, C1_p - C1))).astype(jnp.bfloat16)
        a_in.append(wsc)
        a_specs.append(whole(wsc.shape))
    a_in.append(maskv)
    a_specs.append(whole(maskv.shape))

    a_out = [jax.ShapeDtypeStruct((N, L2s, C1_p), jnp.bfloat16)]
    a_ospec = [per_img((N, L2s, C1_p))]
    if has_sc:
        a_out.append(jax.ShapeDtypeStruct((N, Lv, C1_p), jnp.bfloat16))
        a_ospec.append(per_img((N, Lv, C1_p)))
    a_out.append(jax.ShapeDtypeStruct((N, 2, C1_p), jnp.float32))
    a_ospec.append(per_img((N, 2, C1_p)))
    if has_sc:
        a_out.append(jax.ShapeDtypeStruct((N, 2, C1_p), jnp.float32))
        a_ospec.append(per_img((N, 2, C1_p)))

    a_res = pl.pallas_call(
        kernel_a,
        grid=(N,),
        out_shape=tuple(a_out),
        in_specs=a_specs,
        out_specs=tuple(a_ospec),
        scratch_shapes=[pltpu.VMEM((Lv, C1_p), jnp.float32)],
        compiler_params=cparams,
    )(*a_in)

    if has_sc:
        y1_raw, sc_raw, st1, stsc = a_res
    else:
        y1_raw, st1 = a_res

    def bn_affine(stats, gamma, beta):
        s1 = jnp.sum(stats[:, 0, :], axis=0)
        s2 = jnp.sum(stats[:, 1, :], axis=0)
        mean = s1 / cnt
        var = s2 / cnt - mean * mean
        scale = gamma * jax.lax.rsqrt(var + EPS)
        shift = beta - mean * scale
        return scale.reshape(1, C1_p), shift.reshape(1, C1_p)

    scale1, shift1 = bn_affine(st1, g1, b1)

    # ------------------------------- pass B --------------------------------
    kernel_b = _make_kernel_b(Ho, Wo, C1_p)
    y2_raw, st2 = pl.pallas_call(
        kernel_b,
        grid=(N,),
        out_shape=(jax.ShapeDtypeStruct((N, Lv, C1_p), jnp.bfloat16),
                   jax.ShapeDtypeStruct((N, 2, C1_p), jnp.float32)),
        in_specs=[per_img((N, L2s, C1_p)), whole(w2t.shape),
                  whole((1, C1_p)), whole((1, C1_p)),
                  whole((L2s, 1)), whole((Lv, 1))],
        out_specs=(per_img((N, Lv, C1_p)), per_img((N, 2, C1_p))),
        scratch_shapes=[pltpu.VMEM((L2s, C1_p), jnp.bfloat16),
                        pltpu.VMEM((Lv, C1_p), jnp.float32)],
        compiler_params=cparams,
    )(y1_raw, w2t, scale1, shift1, mask2, maskv)

    scale2, shift2 = bn_affine(st2, g2, b2)

    # ------------------------------- pass C --------------------------------
    if has_sc:
        gsc, bsc = bn_vec(params["sc_bn_g"]), bn_vec(params["sc_bn_b"])
        scale_sc, shift_sc = bn_affine(stsc, gsc, bsc)
        c_in = (y2_raw, sc_raw, scale2, shift2, scale_sc, shift_sc)
        c_specs = [per_img((N, Lv, C1_p)), per_img((N, Lv, C1_p)),
                   whole((1, C1_p)), whole((1, C1_p)),
                   whole((1, C1_p)), whole((1, C1_p))]
    else:
        # identity shortcut already in the flattened output geometry (f32, exact)
        sc_in = jnp.pad(xc, ((0, 0), (0, 0), (0, W2 - W), (0, 0))).reshape(N, Lv, C1_p)
        c_in = (y2_raw, sc_in, scale2, shift2)
        c_specs = [per_img((N, Lv, C1_p)), per_img((N, Lv, C1_p)),
                   whole((1, C1_p)), whole((1, C1_p))]

    out_u = pl.pallas_call(
        _make_kernel_c(has_sc),
        grid=(N,),
        out_shape=jax.ShapeDtypeStruct((N, Lv, C1_p), jnp.float32),
        in_specs=c_specs,
        out_specs=per_img((N, Lv, C1_p)),
        compiler_params=cparams,
    )(*c_in)

    out = out_u.reshape(N, Ho, W2, C1_p)[:, :, :Wo, :C1]
    return jnp.transpose(out, (0, 3, 1, 2))                        # back to NCHW


basic_block_forward = jax.jit(_basic_block_forward, static_argnums=(2,))


# ---------------------------------------------------------------------------
# Parameter init + pure-JAX reference (training-mode BN, mirrors PyTorch forward)
# ---------------------------------------------------------------------------
def init_params(key, in_planes, planes, stride):
    ks = jax.random.split(key, 8)

    def conv_init(k, shape):
        fan_in = shape[1] * shape[2] * shape[3]
        bound = 1.0 / np.sqrt(fan_in)
        return jax.random.uniform(k, shape, jnp.float32, -bound, bound)

    p = {
        "conv1_w": conv_init(ks[0], (planes, in_planes, 3, 3)),
        "conv2_w": conv_init(ks[1], (planes, planes, 3, 3)),
        "bn1_g": 1.0 + 0.1 * jax.random.normal(ks[2], (planes,), jnp.float32),
        "bn1_b": 0.1 * jax.random.normal(ks[3], (planes,), jnp.float32),
        "bn2_g": 1.0 + 0.1 * jax.random.normal(ks[4], (planes,), jnp.float32),
        "bn2_b": 0.1 * jax.random.normal(ks[5], (planes,), jnp.float32),
    }
    if stride != 1 or in_planes != planes:
        p["sc_w"] = conv_init(ks[6], (planes, in_planes, 1, 1))
        p["sc_bn_g"] = 1.0 + 0.1 * jax.random.normal(ks[7], (planes,), jnp.float32)
        p["sc_bn_b"] = jnp.zeros((planes,), jnp.float32)
    return p


def reference_forward(x_nchw, params, stride):
    x = jnp.transpose(x_nchw, (0, 2, 3, 1)).astype(jnp.float32)

    def conv(x, w, s, pad):
        w_hwio = jnp.transpose(w, (2, 3, 1, 0))
        return jax.lax.conv_general_dilated(
            x, w_hwio, (s, s), [(pad, pad), (pad, pad)],
            dimension_numbers=("NHWC", "HWIO", "NHWC"))

    def bn(y, g, b):
        mu = jnp.mean(y, axis=(0, 1, 2), keepdims=True)
        var = jnp.mean((y - mu) ** 2, axis=(0, 1, 2), keepdims=True)
        return (y - mu) * jax.lax.rsqrt(var + EPS) * g + b

    C1 = params["conv1_w"].shape[0]
    Cin = x.shape[-1]
    out = jax.nn.relu(bn(conv(x, params["conv1_w"], stride, 1),
                         params["bn1_g"], params["bn1_b"]))
    out = bn(conv(out, params["conv2_w"], 1, 1), params["bn2_g"], params["bn2_b"])
    if stride != 1 or Cin != C1:
        sc = bn(conv(x, params["sc_w"], stride, 0),
                params["sc_bn_g"], params["sc_bn_b"])
    else:
        sc = x
    out = jax.nn.relu(out + sc)
    return jnp.transpose(out, (0, 3, 1, 2))


if __name__ == "__main__":
    key = jax.random.PRNGKey(0)
    k_x1, k_p1, k_x2, k_p2 = jax.random.split(key, 4)

    # Config A: downsampling block (stride=2, in_planes != planes) -> conv shortcut
    x1 = jax.random.normal(k_x1, (2, 4, 16, 16), jnp.float32)   # NCHW
    p1 = init_params(k_p1, 4, 8, 2)
    out1 = jax.block_until_ready(basic_block_forward(x1, p1, 2))
    ref1 = reference_forward(x1, p1, 2)
    np.testing.assert_allclose(np.asarray(out1), np.asarray(ref1),
                               rtol=2e-2, atol=2e-2)

    # Config B: identity shortcut (stride=1, in_planes == planes)
    x2 = jax.random.normal(k_x2, (2, 8, 8, 8), jnp.float32)     # NCHW
    p2 = init_params(k_p2, 8, 8, 1)
    out2 = jax.block_until_ready(basic_block_forward(x2, p2, 1))
    ref2 = reference_forward(x2, p2, 1)
    np.testing.assert_allclose(np.asarray(out2), np.asarray(ref2),
                               rtol=2e-2, atol=2e-2)

    print("KERNEL_OK")
</pallas_src>

<mosaic_0001>
module attributes {stable_mosaic.version = 11 : i64} {
  func.func @kernel(%arg0: i32, %arg1: memref<1x4x110x128xbf16, #tpu.memory_space<vmem>>, %arg2: memref<9x128x128xbf16, #tpu.memory_space<vmem>>, %arg3: memref<128x128xbf16, #tpu.memory_space<vmem>>, %arg4: memref<80x1xf32, #tpu.memory_space<vmem>>, %arg5: memref<1x110x128xbf16, #tpu.memory_space<vmem>>, %arg6: memref<1x80x128xbf16, #tpu.memory_space<vmem>>, %arg7: memref<1x2x128xf32, #tpu.memory_space<vmem>>, %arg8: memref<1x2x128xf32, #tpu.memory_space<vmem>>, %arg9: memref<80x128xf32, #tpu.memory_space<vmem>>) attributes {dimension_semantics = [#tpu.dimension_semantics<parallel>], iteration_bounds = array<i64: 2>, scalar_prefetch = 0 : i64, scratch_operands = 1 : i64, tpu.core_type = #tpu.core_type<tc>, window_params = [{transform_indices = @transform_0, window_bounds = array<i64: 1, 4, 110, 128>}, {pipeline_mode = #tpu.pipeline_mode<synchronous>, transform_indices = @transform_1, window_bounds = array<i64: 9, 128, 128>}, {pipeline_mode = #tpu.pipeline_mode<synchronous>, transform_indices = @transform_2, window_bounds = array<i64: 128, 128>}, {pipeline_mode = #tpu.pipeline_mode<synchronous>, transform_indices = @transform_3, window_bounds = array<i64: 80, 1>}, {transform_indices = @transform_4, window_bounds = array<i64: 1, 110, 128>}, {transform_indices = @transform_5, window_bounds = array<i64: 1, 80, 128>}, {transform_indices = @transform_6, window_bounds = array<i64: 1, 2, 128>}, {transform_indices = @transform_7, window_bounds = array<i64: 1, 2, 128>}]} {
    %cst = arith.constant 0.000000e+00 : f32
    %0 = vector.broadcast %cst : f32 to vector<80x128xf32>
    %c0 = arith.constant 0 : index
    %c0_0 = arith.constant 0 : index
    %1 = vector.load %arg9[%c0, %c0_0] : memref<80x128xf32, #tpu.memory_space<vmem>>, vector<80x128xf32>
    tpu.vector_store %arg9[%c0, %c0_0], %0 {strides = array<i32>} : memref<80x128xf32, #tpu.memory_space<vmem>>, vector<80x128xf32>,
    %c0_1 = arith.constant 0 : index
    %c0_2 = arith.constant 0 : index
    %c0_3 = arith.constant 0 : index
    %c0_4 = arith.constant 0 : index
    %2 = vector.load %arg1[%c0_1, %c0_2, %c0_3, %c0_4] : memref<1x4x110x128xbf16, #tpu.memory_space<vmem>>, vector<1x1x80x128xbf16>
    %3 = vector.shape_cast %2 : vector<1x1x80x128xbf16> to vector<80x128xbf16>
    %c0_5 = arith.constant 0 : index
    %c0_6 = arith.constant 0 : index
    %4 = vector.load %arg9[%c0_5, %c0_6] : memref<80x128xf32, #tpu.memory_space<vmem>>, vector<80x128xf32>
    %c0_7 = arith.constant 0 : index
    %c0_8 = arith.constant 0 : index
    %c0_9 = arith.constant 0 : index
    %5 = vector.load %arg2[%c0_7, %c0_8, %c0_9] : memref<9x128x128xbf16, #tpu.memory_space<vmem>>, vector<1x128x128xbf16>
    %6 = vector.shape_cast %5 : vector<1x128x128xbf16> to vector<128x128xbf16>
    %cst_10 = arith.constant dense<0.000000e+00> : vector<80x128xf32>
    %7 = tpu.matmul %3, %6, %cst_10 {dimension_numbers = #tpu.dot_dimension_numbers<[1], [0], [0], [1], [0, 0, 1, 1], [], []>} : vector<80x128xbf16>, vector<128x128xbf16>, vector<80x128xf32> -> vector<80x128xf32>
    %8 = arith.addf %4, %7 : vector<80x128xf32>
    %c0_11 = arith.constant 0 : index
    %c0_12 = arith.constant 0 : index
    %9 = vector.load %arg9[%c0_11, %c0_12] : memref<80x128xf32, #tpu.memory_space<vmem>>, vector<80x128xf32>
    tpu.vector_store %arg9[%c0_11, %c0_12], %8 {strides = array<i32>} : memref<80x128xf32, #tpu.memory_space<vmem>>, vector<80x128xf32>,
    %c0_13 = arith.constant 0 : index
    %c1 = arith.constant 1 : index
    %c0_14 = arith.constant 0 : index
    %c0_15 = arith.constant 0 : index
    %10 = vector.load %arg1[%c0_13, %c1, %c0_14, %c0_15] : memref<1x4x110x128xbf16, #tpu.memory_space<vmem>>, vector<1x1x80x128xbf16>
    %11 = vector.shape_cast %10 : vector<1x1x80x128xbf16> to vector<80x128xbf16>
    %c0_16 = arith.constant 0 : index
    %c0_17 = arith.constant 0 : index
    %12 = vector.load %arg9[%c0_16, %c0_17] : memref<80x128xf32, #tpu.memory_space<vmem>>, vector<80x128xf32>
    %c1_18 = arith.constant 1 : index
    %c0_19 = arith.constant 0 : index
    %c0_20 = arith.constant 0 : index
    %13 = vector.load %arg2[%c1_18, %c0_19, %c0_20] : memref<9x128x128xbf16, #tpu.memory_space<vmem>>, vector<1x128x128xbf16>
    %14 = vector.shape_cast %13 : vector<1x128x128xbf16> to vector<128x128xbf16>
    %cst_21 = arith.constant dense<0.000000e+00> : vector<80x128xf32>
    %15 = tpu.matmul %11, %14, %cst_21 {dimension_numbers = #tpu.dot_dimension_numbers<[1], [0], [0], [1], [0, 0, 1, 1], [], []>} : vector<80x128xbf16>, vector<128x128xbf16>, vector<80x128xf32> -> vector<80x128xf32>
    %16 = arith.addf %12, %15 : vector<80x128xf32>
    %c0_22 = arith.constant 0 : index
    %c0_23 = arith.constant 0 : index
    %17 = vector.load %arg9[%c0_22, %c0_23] : memref<80x128xf32, #tpu.memory_space<vmem>>, vector<80x128xf32>
    tpu.vector_store %arg9[%c0_22, %c0_23], %16 {strides = array<i32>} : memref<80x128xf32, #tpu.memory_space<vmem>>, vector<80x128xf32>,
    %c0_24 = arith.constant 0 : index
    %c0_25 = arith.constant 0 : index
    %c1_26 = arith.constant 1 : index
    %c0_27 = arith.constant 0 : index
    %18 = vector.load %arg1[%c0_24, %c0_25, %c1_26, %c0_27] : memref<1x4x110x128xbf16, #tpu.memory_space<vmem>>, vector<1x1x80x128xbf16>
    %19 = vector.shape_cast %18 : vector<1x1x80x128xbf16> to vector<80x128xbf16>
    %c0_28 = arith.constant 0 : index
    %c0_29 = arith.constant 0 : index
    %20 = vector.load %arg9[%c0_28, %c0_29] : memref<80x128xf32, #tpu.memory_space<vmem>>, vector<80x128xf32>
    %c2 = arith.constant 2 : index
    %c0_30 = arith.constant 0 : index
    %c0_31 = arith.constant 0 : index
    %21 = vector.load %arg2[%c2, %c0_30, %c0_31] : memref<9x128x128xbf16, #tpu.memory_space<vmem>>, vector<1x128x128xbf16>
    %22 = vector.shape_cast %21 : vector<1x128x128xbf16> to vector<128x128xbf16>
    %cst_32 = arith.constant dense<0.000000e+00> : vector<80x128xf32>
    %23 = tpu.matmul %19, %22, %cst_32 {dimension_numbers = #tpu.dot_dimension_numbers<[1], [0], [0], [1], [0, 0, 1, 1], [], []>} : vector<80x128xbf16>, vector<128x128xbf16>, vector<80x128xf32> -> vector<80x128xf32>
    %24 = arith.addf %20, %23 : vector<80x128xf32>
    %c0_33 = arith.constant 0 : index
    %c0_34 = arith.constant 0 : index
    %25 = vector.load %arg9[%c0_33, %c0_34] : memref<80x128xf32, #tpu.memory_space<vmem>>, vector<80x128xf32>
    tpu.vector_store %arg9[%c0_33, %c0_34], %24 {strides = array<i32>} : memref<80x128xf32, #tpu.memory_space<vmem>>, vector<80x128xf32>,
    %c0_35 = arith.constant 0 : index
    %c2_36 = arith.constant 2 : index
    %c0_37 = arith.constant 0 : index
    %c0_38 = arith.constant 0 : index
    %26 = vector.load %arg1[%c0_35, %c2_36, %c0_37, %c0_38] : memref<1x4x110x128xbf16, #tpu.memory_space<vmem>>, vector<1x1x80x128xbf16>
    %27 = vector.shape_cast %26 : vector<1x1x80x128xbf16> to vector<80x128xbf16>
    %c0_39 = arith.constant 0 : index
    %c0_40 = arith.constant 0 : index
    %28 = vector.load %arg9[%c0_39, %c0_40] : memref<80x128xf32, #tpu.memory_space<vmem>>, vector<80x128xf32>
    %c3 = arith.constant 3 : index
    %c0_41 = arith.constant 0 : index
    %c0_42 = arith.constant 0 : index
    %29 = vector.load %arg2[%c3, %c0_41, %c0_42] : memref<9x128x128xbf16, #tpu.memory_space<vmem>>, vector<1x128x128xbf16>
    %30 = vector.shape_cast %29 : vector<1x128x128xbf16> to vector<128x128xbf16>
    %cst_43 = arith.constant dense<0.000000e+00> : vector<80x128xf32>
    %31 = tpu.matmul %27, %30, %cst_43 {dimension_numbers = #tpu.dot_dimension_numbers<[1], [0], [0], [1], [0, 0, 1, 1], [], []>} : vector<80x128xbf16>, vector<128x128xbf16>, vector<80x128xf32> -> vector<80x128xf32>
    %32 = arith.addf %28, %31 : vector<80x128xf32>
    %c0_44 = arith.constant 0 : index
    %c0_45 = arith.constant 0 : index
    %33 = vector.load %arg9[%c0_44, %c0_45] : memref<80x128xf32, #tpu.memory_space<vmem>>, vector<80x128xf32>
    tpu.vector_store %arg9[%c0_44, %c0_45], %32 {strides = array<i32>} : memref<80x128xf32, #tpu.memory_space<vmem>>, vector<80x128xf32>,
    %c0_46 = arith.constant 0 : index
    %c3_47 = arith.constant 3 : index
    %c0_48 = arith.constant 0 : index
    %c0_49 = arith.constant 0 : index
    %34 = vector.load %arg1[%c0_46, %c3_47, %c0_48, %c0_49] : memref<1x4x110x128xbf16, #tpu.memory_space<vmem>>, vector<1x1x80x128xbf16>
    %35 = vector.shape_cast %34 : vector<1x1x80x128xbf16> to vector<80x128xbf16>
    %c0_50 = arith.constant 0 : index
    %c0_51 = arith.constant 0 : index
    %36 = vector.load %arg9[%c0_50, %c0_51] : memref<80x128xf32, #tpu.memory_space<vmem>>, vector<80x128xf32>
    %c4 = arith.constant 4 : index
    %c0_52 = arith.constant 0 : index
    %c0_53 = arith.constant 0 : index
    %37 = vector.load %arg2[%c4, %c0_52, %c0_53] : memref<9x128x128xbf16, #tpu.memory_space<vmem>>, vector<1x128x128xbf16>
    %38 = vector.shape_cast %37 : vector<1x128x128xbf16> to vector<128x128xbf16>
    %cst_54 = arith.constant dense<0.000000e+00> : vector<80x128xf32>
    %39 = tpu.matmul %35, %38, %cst_54 {dimension_numbers = #tpu.dot_dimension_numbers<[1], [0], [0], [1], [0, 0, 1, 1], [], []>} : vector<80x128xbf16>, vector<128x128xbf16>, vector<80x128xf32> -> vector<80x128xf32>
    %40 = arith.addf %36, %39 : vector<80x128xf32>
    %c0_55 = arith.constant 0 : index
    %c0_56 = arith.constant 0 : index
    %41 = vector.load %arg9[%c0_55, %c0_56] : memref<80x128xf32, #tpu.memory_space<vmem>>, vector<80x128xf32>
    tpu.vector_store %arg9[%c0_55, %c0_56], %40 {strides = array<i32>} : memref<80x128xf32, #tpu.memory_space<vmem>>, vector<80x128xf32>,
    %c0_57 = arith.constant 0 : index
    %c2_58 = arith.constant 2 : index
    %c1_59 = arith.constant 1 : index
    %c0_60 = arith.constant 0 : index
    %42 = vector.load %arg1[%c0_57, %c2_58, %c1_59, %c0_60] : memref<1x4x110x128xbf16, #tpu.memory_space<vmem>>, vector<1x1x80x128xbf16>
    %43 = vector.shape_cast %42 : vector<1x1x80x128xbf16> to vector<80x128xbf16>
    %c0_61 = arith.constant 0 : index
    %c0_62 = arith.constant 0 : index
    %44 = vector.load %arg9[%c0_61, %c0_62] : memref<80x128xf32, #tpu.memory_space<vmem>>, vector<80x128xf32>
    %c5 = arith.constant 5 : index
    %c0_63 = arith.constant 0 : index
    %c0_64 = arith.constant 0 : index
    %45 = vector.load %arg2[%c5, %c0_63, %c0_64] : memref<9x128x128xbf16, #tpu.memory_space<vmem>>, vector<1x128x128xbf16>
    %46 = vector.shape_cast %45 : vector<1x128x128xbf16> to vector<128x128xbf16>
    %cst_65 = arith.constant dense<0.000000e+00> : vector<80x128xf32>
    %47 = tpu.matmul %43, %46, %cst_65 {dimension_numbers = #tpu.dot_dimension_numbers<[1], [0], [0], [1], [0, 0, 1, 1], [], []>} : vector<80x128xbf16>, vector<128x128xbf16>, vector<80x128xf32> -> vector<80x128xf32>
    %48 = arith.addf %44, %47 : vector<80x128xf32>
    %c0_66 = arith.constant 0 : index
    %c0_67 = arith.constant 0 : index
    %49 = vector.load %arg9[%c0_66, %c0_67] : memref<80x128xf32, #tpu.memory_space<vmem>>, vector<80x128xf32>
    tpu.vector_store %arg9[%c0_66, %c0_67], %48 {strides = array<i32>} : memref<80x128xf32, #tpu.memory_space<vmem>>, vector<80x128xf32>,
    %c0_68 = arith.constant 0 : index
    %c0_69 = arith.constant 0 : index
    %c10 = arith.constant 10 : index
    %c0_70 = arith.constant 0 : index
    %50 = vector.load %arg1[%c0_68, %c0_69, %c10, %c0_70] : memref<1x4x110x128xbf16, #tpu.memory_space<vmem>>, vector<1x1x80x128xbf16>
    %51 = vector.shape_cast %50 : vector<1x1x80x128xbf16> to vector<80x128xbf16>
    %c0_71 = arith.constant 0 : index
    %c0_72 = arith.constant 0 : index
    %52 = vector.load %arg9[%c0_71, %c0_72] : memref<80x128xf32, #tpu.memory_space<vmem>>, vector<80x128xf32>
    %c6 = arith.constant 6 : index
    %c0_73 = arith.constant 0 : index
    %c0_74 = arith.constant 0 : index
    %53 = vector.load %arg2[%c6, %c0_73, %c0_74] : memref<9x128x128xbf16, #tpu.memory_space<vmem>>, vector<1x128x128xbf16>
    %54 = vector.shape_cast %53 : vector<1x128x128xbf16> to vector<128x128xbf16>
    %cst_75 = arith.constant dense<0.000000e+00> : vector<80x128xf32>
    %55 = tpu.matmul %51, %54, %cst_75 {dimension_numbers = #tpu.dot_dimension_numbers<[1], [0], [0], [1], [0, 0, 1, 1], [], []>} : vector<80x128xbf16>, vector<128x128xbf16>, vector<80x128xf32> -> vector<80x128xf32>
    %56 = arith.addf %52, %55 : vector<80x128xf32>
    %c0_76 = arith.constant 0 : index
    %c0_77 = arith.constant 0 : index
    %57 = vector.load %arg9[%c0_76, %c0_77] : memref<80x128xf32, #tpu.memory_space<vmem>>, vector<80x128xf32>
    tpu.vector_store %arg9[%c0_76, %c0_77], %56 {strides = array<i32>} : memref<80x128xf32, #tpu.memory_space<vmem>>, vector<80x128xf32>,
    %c0_78 = arith.constant 0 : index
    %c1_79 = arith.constant 1 : index
    %c10_80 = arith.constant 10 : index
    %c0_81 = arith.constant 0 : index
    %58 = vector.load %arg1[%c0_78, %c1_79, %c10_80, %c0_81] : memref<1x4x110x128xbf16, #tpu.memory_space<vmem>>, vector<1x1x80x128xbf16>
    %59 = vector.shape_cast %58 : vector<1x1x80x128xbf16> to vector<80x128xbf16>
    %c0_82 = arith.constant 0 : index
    %c0_83 = arith.constant 0 : index
    %60 = vector.load %arg9[%c0_82, %c0_83] : memref<80x128xf32, #tpu.memory_space<vmem>>, vector<80x128xf32>
    %c7 = arith.constant 7 : index
    %c0_84 = arith.constant 0 : index
    %c0_85 = arith.constant 0 : index
    %61 = vector.load %arg2[%c7, %c0_84, %c0_85] : memref<9x128x128xbf16, #tpu.memory_space<vmem>>, vector<1x128x128xbf16>
    %62 = vector.shape_cast %61 : vector<1x128x128xbf16> to vector<128x128xbf16>
    %cst_86 = arith.constant dense<0.000000e+00> : vector<80x128xf32>
    %63 = tpu.matmul %59, %62, %cst_86 {dimension_numbers = #tpu.dot_dimension_numbers<[1], [0], [0], [1], [0, 0, 1, 1], [], []>} : vector<80x128xbf16>, vector<128x128xbf16>, vector<80x128xf32> -> vector<80x128xf32>
    %64 = arith.addf %60, %63 : vector<80x128xf32>
    %c0_87 = arith.constant 0 : index
    %c0_88 = arith.constant 0 : index
    %65 = vector.load %arg9[%c0_87, %c0_88] : memref<80x128xf32, #tpu.memory_space<vmem>>, vector<80x128xf32>
    tpu.vector_store %arg9[%c0_87, %c0_88], %64 {strides = array<i32>} : memref<80x128xf32, #tpu.memory_space<vmem>>, vector<80x128xf32>,
    %c0_89 = arith.constant 0 : index
    %c0_90 = arith.constant 0 : index
    %c11 = arith.constant 11 : index
    %c0_91 = arith.constant 0 : index
    %66 = vector.load %arg1[%c0_89, %c0_90, %c11, %c0_91] : memref<1x4x110x128xbf16, #tpu.memory_space<vmem>>, vector<1x1x80x128xbf16>
    %67 = vector.shape_cast %66 : vector<1x1x80x128xbf16> to vector<80x128xbf16>
    %c0_92 = arith.constant 0 : index
    %c0_93 = arith.constant 0 : index
    %68 = vector.load %arg9[%c0_92, %c0_93] : memref<80x128xf32, #tpu.memory_space<vmem>>, vector<80x128xf32>
    %c8 = arith.constant 8 : index
    %c0_94 = arith.constant 0 : index
    %c0_95 = arith.constant 0 : index
    %69 = vector.load %arg2[%c8, %c0_94, %c0_95] : memref<9x128x128xbf16, #tpu.memory_space<vmem>>, vector<1x128x128xbf16>
    %70 = vector.shape_cast %69 : vector<1x128x128xbf16> to vector<128x128xbf16>
    %cst_96 = arith.constant dense<0.000000e+00> : vector<80x128xf32>
    %71 = tpu.matmul %67, %70, %cst_96 {dimension_numbers = #tpu.dot_dimension_numbers<[1], [0], [0], [1], [0, 0, 1, 1], [], []>} : vector<80x128xbf16>, vector<128x128xbf16>, vector<80x128xf32> -> vector<80x128xf32>
    %72 = arith.addf %68, %71 : vector<80x128xf32>
    %c0_97 = arith.constant 0 : index
    %c0_98 = arith.constant 0 : index
    %73 = vector.load %arg9[%c0_97, %c0_98] : memref<80x128xf32, #tpu.memory_space<vmem>>, vector<80x128xf32>
    tpu.vector_store %arg9[%c0_97, %c0_98], %72 {strides = array<i32>} : memref<80x128xf32, #tpu.memory_space<vmem>>, vector<80x128xf32>,
    %c0_99 = arith.constant 0 : index
    %c0_100 = arith.constant 0 : index
    %74 = vector.load %arg9[%c0_99, %c0_100] : memref<80x128xf32, #tpu.memory_space<vmem>>, vector<80x128xf32>
    %c0_101 = arith.constant 0 : index
    %c0_102 = arith.constant 0 : index
    %75 = vector.load %arg4[%c0_101, %c0_102] : memref<80x1xf32, #tpu.memory_space<vmem>>, vector<80x1xf32>
    %cst_103 = arith.constant 5.000000e-01 : f32
    %76 = vector.broadcast %cst_103 : f32 to vector<80x1xf32>
    %77 = arith.cmpf ogt, %75, %76 : vector<80x1xf32>
    %cst_104 = arith.constant 0.000000e+00 : f32
    %78 = vector.shape_cast %77 : vector<80x1xi1> to vector<80x1xi1>
    %79 = vector.broadcast %78 : vector<80x1xi1> to vector<80x128xi1>
    %80 = vector.broadcast %cst_104 : f32 to vector<80x128xf32>
    %81 = arith.select %79, %74, %80 : vector<80x128xi1>, vector<80x128xf32>
    %cst_105 = arith.constant 1.000000e+00 : f32
    %82 = vector.broadcast %cst_105 : f32 to vector<1x80xf32>
    %cst_106 = arith.constant dense<0.000000e+00> : vector<1x128xf32>
    %83 = tpu.matmul %82, %81, %cst_106 {dimension_numbers = #tpu.dot_dimension_numbers<[1], [0], [0], [1], [0, 0, 1, 1], [], []>} : vector<1x80xf32>, vector<80x128xf32>, vector<1x128xf32> -> vector<1x128xf32>
    %c0_107 = arith.constant 0 : index
    %c0_108 = arith.constant 0 : index
    %c0_109 = arith.constant 0 : index
    %84 = vector.load %arg7[%c0_107, %c0_108, %c0_109] : memref<1x2x128xf32, #tpu.memory_space<vmem>>, vector<1x1x128xf32>
    %85 = vector.shape_cast %84 : vector<1x1x128xf32> to vector<1x128xf32>
    %86 = vector.shape_cast %83 : vector<1x128xf32> to vector<1x1x128xf32>
    tpu.vector_store %arg7[%c0_107, %c0_108, %c0_109], %86 {strides = array<i32>} : memref<1x2x128xf32, #tpu.memory_space<vmem>>, vector<1x1x128xf32>,
    %87 = arith.mulf %81, %81 : vector<80x128xf32>
    %cst_110 = arith.constant dense<0.000000e+00> : vector<1x128xf32>
    %88 = tpu.matmul %82, %87, %cst_110 {dimension_numbers = #tpu.dot_dimension_numbers<[1], [0], [0], [1], [0, 0, 1, 1], [], []>} : vector<1x80xf32>, vector<80x128xf32>, vector<1x128xf32> -> vector<1x128xf32>
    %c0_111 = arith.constant 0 : index
    %c1_112 = arith.constant 1 : index
    %c0_113 = arith.constant 0 : index
    %89 = vector.load %arg7[%c0_111, %c1_112, %c0_113] : memref<1x2x128xf32, #tpu.memory_space<vmem>>, vector<1x1x128xf32>
    %90 = vector.shape_cast %89 : vector<1x1x128xf32> to vector<1x128xf32>
    %91 = vector.shape_cast %88 : vector<1x128xf32> to vector<1x1x128xf32>
    tpu.vector_store %arg7[%c0_111, %c1_112, %c0_113], %91 {strides = array<i32>} : memref<1x2x128xf32, #tpu.memory_space<vmem>>, vector<1x1x128xf32>,
    %cst_114 = arith.constant 0.000000e+00 : bf16
    %92 = vector.broadcast %cst_114 : bf16 to vector<11x128xbf16>
    %c0_115 = arith.constant 0 : index
    %c0_116 = arith.constant 0 : index
    %c0_117 = arith.constant 0 : index
    %93 = vector.load %arg5[%c0_115, %c0_116, %c0_117] : memref<1x110x128xbf16, #tpu.memory_space<vmem>>, vector<1x11x128xbf16>
    %94 = vector.shape_cast %93 : vector<1x11x128xbf16> to vector<11x128xbf16>
    %95 = vector.shape_cast %92 : vector<11x128xbf16> to vector<1x11x128xbf16>
    tpu.vector_store %arg5[%c0_115, %c0_116, %c0_117], %95 {strides = array<i32>} : memref<1x110x128xbf16, #tpu.memory_space<vmem>>, vector<1x11x128xbf16>,
    %96 = arith.truncf %74 : vector<80x128xf32> to vector<80x128xbf16>
    %c0_118 = arith.constant 0 : index
    %c11_119 = arith.constant 11 : index
    %c0_120 = arith.constant 0 : index
    %97 = vector.load %arg5[%c0_118, %c11_119, %c0_120] : memref<1x110x128xbf16, #tpu.memory_space<vmem>>, vector<1x80x128xbf16>
    %98 = vector.shape_cast %97 : vector<1x80x128xbf16> to vector<80x128xbf16>
    %99 = vector.shape_cast %96 : vector<80x128xbf16> to vector<1x80x128xbf16>
    tpu.vector_store %arg5[%c0_118, %c11_119, %c0_120], %99 {strides = array<i32>} : memref<1x110x128xbf16, #tpu.memory_space<vmem>>, vector<1x80x128xbf16>,
    %cst_121 = arith.constant 0.000000e+00 : bf16
    %100 = vector.broadcast %cst_121 : bf16 to vector<19x128xbf16>
    %c0_122 = arith.constant 0 : index
    %c91 = arith.constant 91 : index
    %c0_123 = arith.constant 0 : index
    %101 = vector.load %arg5[%c0_122, %c91, %c0_123] : memref<1x110x128xbf16, #tpu.memory_space<vmem>>, vector<1x19x128xbf16>
    %102 = vector.shape_cast %101 : vector<1x19x128xbf16> to vector<19x128xbf16>
    %103 = vector.shape_cast %100 : vector<19x128xbf16> to vector<1x19x128xbf16>
    tpu.vector_store %arg5[%c0_122, %c91, %c0_123], %103 {strides = array<i32>} : memref<1x110x128xbf16, #tpu.memory_space<vmem>>, vector<1x19x128xbf16>,
    %c0_124 = arith.constant 0 : index
    %c3_125 = arith.constant 3 : index
    %c0_126 = arith.constant 0 : index
    %c0_127 = arith.constant 0 : index
    %104 = vector.load %arg1[%c0_124, %c3_125, %c0_126, %c0_127] : memref<1x4x110x128xbf16, #tpu.memory_space<vmem>>, vector<1x1x80x128xbf16>
    %105 = vector.shape_cast %104 : vector<1x1x80x128xbf16> to vector<80x128xbf16>
    %c0_128 = arith.constant 0 : index
    %c0_129 = arith.constant 0 : index
    %106 = vector.load %arg3[%c0_128, %c0_129] : memref<128x128xbf16, #tpu.memory_space<vmem>>, vector<128x128xbf16>
    %cst_130 = arith.constant dense<0.000000e+00> : vector<80x128xf32>
    %107 = tpu.matmul %105, %106, %cst_130 {dimension_numbers = #tpu.dot_dimension_numbers<[1], [0], [0], [1], [0, 0, 1, 1], [], []>} : vector<80x128xbf16>, vector<128x128xbf16>, vector<80x128xf32> -> vector<80x128xf32>
    %cst_131 = arith.constant 0.000000e+00 : f32
    %108 = vector.shape_cast %77 : vector<80x1xi1> to vector<80x1xi1>
    %109 = vector.broadcast %108 : vector<80x1xi1> to vector<80x128xi1>
    %110 = vector.broadcast %cst_131 : f32 to vector<80x128xf32>
    %111 = arith.select %109, %107, %110 : vector<80x128xi1>, vector<80x128xf32>
    %cst_132 = arith.constant dense<0.000000e+00> : vector<1x128xf32>
    %112 = tpu.matmul %82, %111, %cst_132 {dimension_numbers = #tpu.dot_dimension_numbers<[1], [0], [0], [1], [0, 0, 1, 1], [], []>} : vector<1x80xf32>, vector<80x128xf32>, vector<1x128xf32> -> vector<1x128xf32>
    %c0_133 = arith.constant 0 : index
    %c0_134 = arith.constant 0 : index
    %c0_135 = arith.constant 0 : index
    %113 = vector.load %arg8[%c0_133, %c0_134, %c0_135] : memref<1x2x128xf32, #tpu.memory_space<vmem>>, vector<1x1x128xf32>
    %114 = vector.shape_cast %113 : vector<1x1x128xf32> to vector<1x128xf32>
    %115 = vector.shape_cast %112 : vector<1x128xf32> to vector<1x1x128xf32>
    tpu.vector_store %arg8[%c0_133, %c0_134, %c0_135], %115 {strides = array<i32>} : memref<1x2x128xf32, #tpu.memory_space<vmem>>, vector<1x1x128xf32>,
    %116 = arith.mulf %111, %111 : vector<80x128xf32>
    %cst_136 = arith.constant dense<0.000000e+00> : vector<1x128xf32>
    %117 = tpu.matmul %82, %116, %cst_136 {dimension_numbers = #tpu.dot_dimension_numbers<[1], [0], [0], [1], [0, 0, 1, 1], [], []>} : vector<1x80xf32>, vector<80x128xf32>, vector<1x128xf32> -> vector<1x128xf32>
    %c0_137 = arith.constant 0 : index
    %c1_138 = arith.constant 1 : index
    %c0_139 = arith.constant 0 : index
    %118 = vector.load %arg8[%c0_137, %c1_138, %c0_139] : memref<1x2x128xf32, #tpu.memory_space<vmem>>, vector<1x1x128xf32>
    %119 = vector.shape_cast %118 : vector<1x1x128xf32> to vector<1x128xf32>
    %120 = vector.shape_cast %117 : vector<1x128xf32> to vector<1x1x128xf32>
    tpu.vector_store %arg8[%c0_137, %c1_138, %c0_139], %120 {strides = array<i32>} : memref<1x2x128xf32, #tpu.memory_space<vmem>>, vector<1x1x128xf32>,
    %121 = arith.truncf %107 : vector<80x128xf32> to vector<80x128xbf16>
    %c0_140 = arith.constant 0 : index
    %c0_141 = arith.constant 0 : index
    %c0_142 = arith.constant 0 : index
    %122 = vector.load %arg6[%c0_140, %c0_141, %c0_142] : memref<1x80x128xbf16, #tpu.memory_space<vmem>>, vector<1x80x128xbf16>
    %123 = vector.shape_cast %122 : vector<1x80x128xbf16> to vector<80x128xbf16>
    %124 = vector.shape_cast %121 : vector<80x128xbf16> to vector<1x80x128xbf16>
    tpu.vector_store %arg6[%c0_140, %c0_141, %c0_142], %124 {strides = array<i32>} : memref<1x80x128xbf16, #tpu.memory_space<vmem>>, vector<1x80x128xbf16>,
    return
  }
  func.func @transform_0(%arg0: i32) -> (i32, i32, i32, i32) {
    %c0_i32 = arith.constant 0 : i32
    %c0_i32_0 = arith.constant 0 : i32
    %c0_i32_1 = arith.constant 0 : i32
    %c0_i32_2 = arith.constant 0 : i32
    return %arg0, %c0_i32, %c0_i32_0, %c0_i32_1 : i32, i32, i32, i32
  }
  func.func @transform_1(%arg0: i32) -> (i32, i32, i32) {
    %c0_i32 = arith.constant 0 : i32
    %c0_i32_0 = arith.constant 0 : i32
    %c0_i32_1 = arith.constant 0 : i32
    %c0_i32_2 = arith.constant 0 : i32
    return %c0_i32, %c0_i32_0, %c0_i32_1 : i32, i32, i32
  }
  func.func @transform_2(%arg0: i32) -> (i32, i32) {
    %c0_i32 = arith.constant 0 : i32
    %c0_i32_0 = arith.constant 0 : i32
    %c0_i32_1 = arith.constant 0 : i32
    return %c0_i32, %c0_i32_0 : i32, i32
  }
  func.func @transform_3(%arg0: i32) -> (i32, i32) {
    %c0_i32 = arith.constant 0 : i32
    %c0_i32_0 = arith.constant 0 : i32
    %c0_i32_1 = arith.constant 0 : i32
    return %c0_i32, %c0_i32_0 : i32, i32
  }
  func.func @transform_4(%arg0: i32) -> (i32, i32, i32) {
    %c0_i32 = arith.constant 0 : i32
    %c0_i32_0 = arith.constant 0 : i32
    %c0_i32_1 = arith.constant 0 : i32
    return %arg0, %c0_i32, %c0_i32_0 : i32, i32, i32
  }
  func.func @transform_5(%arg0: i32) -> (i32, i32, i32) {
    %c0_i32 = arith.constant 0 : i32
    %c0_i32_0 = arith.constant 0 : i32
    %c0_i32_1 = arith.constant 0 : i32
    return %arg0, %c0_i32, %c0_i32_0 : i32, i32, i32
  }
  func.func @transform_6(%arg0: i32) -> (i32, i32, i32) {
    %c0_i32 = arith.constant 0 : i32
    %c0_i32_0 = arith.constant 0 : i32
    %c0_i32_1 = arith.constant 0 : i32
    return %arg0, %c0_i32, %c0_i32_0 : i32, i32, i32
  }
  func.func @transform_7(%arg0: i32) -> (i32, i32, i32) {
    %c0_i32 = arith.constant 0 : i32
    %c0_i32_0 = arith.constant 0 : i32
    %c0_i32_1 = arith.constant 0 : i32
    return %arg0, %c0_i32, %c0_i32_0 : i32, i32, i32
  }
}

module attributes {stable_mosaic.version = 11 : i64} {
  func.func @kernel(%arg0: i32, %arg1: memref<1x110x128xbf16, #tpu.memory_space<vmem>>, %arg2: memref<9x128x128xbf16, #tpu.memory_space<vmem>>, %arg3: memref<1x128xf32, #tpu.memory_space<vmem>>, %arg4: memref<1x128xf32, #tpu.memory_space<vmem>>, %arg5: memref<110x1xf32, #tpu.memory_space<vmem>>, %arg6: memref<80x1xf32, #tpu.memory_space<vmem>>, %arg7: memref<1x80x128xbf16, #tpu.memory_space<vmem>>, %arg8: memref<1x2x128xf32, #tpu.memory_space<vmem>>, %arg9: memref<110x128xbf16, #tpu.memory_space<vmem>>, %arg10: memref<80x128xf32, #tpu.memory_space<vmem>>) attributes {dimension_semantics = [#tpu.dimension_semantics<parallel>], iteration_bounds = array<i64: 2>, scalar_prefetch = 0 : i64, scratch_operands = 2 : i64, tpu.core_type = #tpu.core_type<tc>, window_params = [{transform_indices = @transform_0, window_bounds = array<i64: 1, 110, 128>}, {pipeline_mode = #tpu.pipeline_mode<synchronous>, transform_indices = @transform_1, window_bounds = array<i64: 9, 128, 128>}, {pipeline_mode = #tpu.pipeline_mode<synchronous>, transform_indices = @transform_2, window_bounds = array<i64: 1, 128>}, {pipeline_mode = #tpu.pipeline_mode<synchronous>, transform_indices = @transform_3, window_bounds = array<i64: 1, 128>}, {pipeline_mode = #tpu.pipeline_mode<synchronous>, transform_indices = @transform_4, window_bounds = array<i64: 110, 1>}, {pipeline_mode = #tpu.pipeline_mode<synchronous>, transform_indices = @transform_5, window_bounds = array<i64: 80, 1>}, {transform_indices = @transform_6, window_bounds = array<i64: 1, 80, 128>}, {transform_indices = @transform_7, window_bounds = array<i64: 1, 2, 128>}]} {
    %c0 = arith.constant 0 : index
    %c0_0 = arith.constant 0 : index
    %c0_1 = arith.constant 0 : index
    %0 = vector.load %arg1[%c0, %c0_0, %c0_1] : memref<1x110x128xbf16, #tpu.memory_space<vmem>>, vector<1x110x128xbf16>
    %1 = vector.shape_cast %0 : vector<1x110x128xbf16> to vector<110x128xbf16>
    %2 = arith.extf %1 : vector<110x128xbf16> to vector<110x128xf32>
    %c0_2 = arith.constant 0 : index
    %c0_3 = arith.constant 0 : index
    %3 = vector.load %arg3[%c0_2, %c0_3] : memref<1x128xf32, #tpu.memory_space<vmem>>, vector<1x128xf32>
    %4 = vector.broadcast %3 : vector<1x128xf32> to vector<110x128xf32>
    %5 = arith.mulf %2, %4 : vector<110x128xf32>
    %c0_4 = arith.constant 0 : index
    %c0_5 = arith.constant 0 : index
    %6 = vector.load %arg4[%c0_4, %c0_5] : memref<1x128xf32, #tpu.memory_space<vmem>>, vector<1x128xf32>
    %7 = vector.broadcast %6 : vector<1x128xf32> to vector<110x128xf32>
    %8 = arith.addf %5, %7 : vector<110x128xf32>
    %cst = arith.constant 0.000000e+00 : f32
    %9 = vector.broadcast %cst : f32 to vector<110x128xf32>
    %10 = arith.maximumf %8, %9 : vector<110x128xf32>
    %c0_6 = arith.constant 0 : index
    %c0_7 = arith.constant 0 : index
    %11 = vector.load %arg5[%c0_6, %c0_7] : memref<110x1xf32, #tpu.memory_space<vmem>>, vector<110x1xf32>
    %cst_8 = arith.constant 5.000000e-01 : f32
    %12 = vector.broadcast %cst_8 : f32 to vector<110x1xf32>
    %13 = arith.cmpf ogt, %11, %12 : vector<110x1xf32>
    %cst_9 = arith.constant 0.000000e+00 : f32
    %14 = vector.shape_cast %13 : vector<110x1xi1> to vector<110x1xi1>
    %15 = vector.broadcast %14 : vector<110x1xi1> to vector<110x128xi1>
    %16 = vector.broadcast %cst_9 : f32 to vector<110x128xf32>
    %17 = arith.select %15, %10, %16 : vector<110x128xi1>, vector<110x128xf32>
    %18 = arith.truncf %17 : vector<110x128xf32> to vector<110x128xbf16>
    %c0_10 = arith.constant 0 : index
    %c0_11 = arith.constant 0 : index
    %19 = vector.load %arg9[%c0_10, %c0_11] : memref<110x128xbf16, #tpu.memory_space<vmem>>, vector<110x128xbf16>
    tpu.vector_store %arg9[%c0_10, %c0_11], %18 {strides = array<i32>} : memref<110x128xbf16, #tpu.memory_space<vmem>>, vector<110x128xbf16>,
    %cst_12 = arith.constant 0.000000e+00 : f32
    %20 = vector.broadcast %cst_12 : f32 to vector<80x128xf32>
    %c0_13 = arith.constant 0 : index
    %c0_14 = arith.constant 0 : index
    %21 = vector.load %arg10[%c0_13, %c0_14] : memref<80x128xf32, #tpu.memory_space<vmem>>, vector<80x128xf32>
    tpu.vector_store %arg10[%c0_13, %c0_14], %20 {strides = array<i32>} : memref<80x128xf32, #tpu.memory_space<vmem>>, vector<80x128xf32>,
    %c0_15 = arith.constant 0 : index
    %c0_16 = arith.constant 0 : index
    %22 = vector.load %arg10[%c0_15, %c0_16] : memref<80x128xf32, #tpu.memory_space<vmem>>, vector<80x128xf32>
    %c0_17 = arith.constant 0 : index
    %c0_18 = arith.constant 0 : index
    %23 = vector.load %arg9[%c0_17, %c0_18] : memref<110x128xbf16, #tpu.memory_space<vmem>>, vector<80x128xbf16>
    %c0_19 = arith.constant 0 : index
    %c0_20 = arith.constant 0 : index
    %c0_21 = arith.constant 0 : index
    %24 = vector.load %arg2[%c0_19, %c0_20, %c0_21] : memref<9x128x128xbf16, #tpu.memory_space<vmem>>, vector<1x128x128xbf16>
    %25 = vector.shape_cast %24 : vector<1x128x128xbf16> to vector<128x128xbf16>
    %cst_22 = arith.constant dense<0.000000e+00> : vector<80x128xf32>
    %26 = tpu.matmul %23, %25, %cst_22 {dimension_numbers = #tpu.dot_dimension_numbers<[1], [0], [0], [1], [0, 0, 1, 1], [], []>} : vector<80x128xbf16>, vector<128x128xbf16>, vector<80x128xf32> -> vector<80x128xf32>
    %27 = arith.addf %22, %26 : vector<80x128xf32>
    %c0_23 = arith.constant 0 : index
    %c0_24 = arith.constant 0 : index
    %28 = vector.load %arg10[%c0_23, %c0_24] : memref<80x128xf32, #tpu.memory_space<vmem>>, vector<80x128xf32>
    tpu.vector_store %arg10[%c0_23, %c0_24], %27 {strides = array<i32>} : memref<80x128xf32, #tpu.memory_space<vmem>>, vector<80x128xf32>,
    %c0_25 = arith.constant 0 : index
    %c0_26 = arith.constant 0 : index
    %29 = vector.load %arg10[%c0_25, %c0_26] : memref<80x128xf32, #tpu.memory_space<vmem>>, vector<80x128xf32>
    %c1 = arith.constant 1 : index
    %c0_27 = arith.constant 0 : index
    %30 = vector.load %arg9[%c1, %c0_27] : memref<110x128xbf16, #tpu.memory_space<vmem>>, vector<80x128xbf16>
    %c1_28 = arith.constant 1 : index
    %c0_29 = arith.constant 0 : index
    %c0_30 = arith.constant 0 : index
    %31 = vector.load %arg2[%c1_28, %c0_29, %c0_30] : memref<9x128x128xbf16, #tpu.memory_space<vmem>>, vector<1x128x128xbf16>
    %32 = vector.shape_cast %31 : vector<1x128x128xbf16> to vector<128x128xbf16>
    %cst_31 = arith.constant dense<0.000000e+00> : vector<80x128xf32>
    %33 = tpu.matmul %30, %32, %cst_31 {dimension_numbers = #tpu.dot_dimension_numbers<[1], [0], [0], [1], [0, 0, 1, 1], [], []>} : vector<80x128xbf16>, vector<128x128xbf16>, vector<80x128xf32> -> vector<80x128xf32>
    %34 = arith.addf %29, %33 : vector<80x128xf32>
    %c0_32 = arith.constant 0 : index
    %c0_33 = arith.constant 0 : index
    %35 = vector.load %arg10[%c0_32, %c0_33] : memref<80x128xf32, #tpu.memory_space<vmem>>, vector<80x128xf32>
    tpu.vector_store %arg10[%c0_32, %c0_33], %34 {strides = array<i32>} : memref<80x128xf32, #tpu.memory_space<vmem>>, vector<80x128xf32>,
    %c0_34 = arith.constant 0 : index
    %c0_35 = arith.constant 0 : index
    %36 = vector.load %arg10[%c0_34, %c0_35] : memref<80x128xf32, #tpu.memory_space<vmem>>, vector<80x128xf32>
    %c2 = arith.constant 2 : index
    %c0_36 = arith.constant 0 : index
    %37 = vector.load %arg9[%c2, %c0_36] : memref<110x128xbf16, #tpu.memory_space<vmem>>, vector<80x128xbf16>
    %c2_37 = arith.constant 2 : index
    %c0_38 = arith.constant 0 : index
    %c0_39 = arith.constant 0 : index
    %38 = vector.load %arg2[%c2_37, %c0_38, %c0_39] : memref<9x128x128xbf16, #tpu.memory_space<vmem>>, vector<1x128x128xbf16>
    %39 = vector.shape_cast %38 : vector<1x128x128xbf16> to vector<128x128xbf16>
    %cst_40 = arith.constant dense<0.000000e+00> : vector<80x128xf32>
    %40 = tpu.matmul %37, %39, %cst_40 {dimension_numbers = #tpu.dot_dimension_numbers<[1], [0], [0], [1], [0, 0, 1, 1], [], []>} : vector<80x128xbf16>, vector<128x128xbf16>, vector<80x128xf32> -> vector<80x128xf32>
    %41 = arith.addf %36, %40 : vector<80x128xf32>
    %c0_41 = arith.constant 0 : index
    %c0_42 = arith.constant 0 : index
    %42 = vector.load %arg10[%c0_41, %c0_42] : memref<80x128xf32, #tpu.memory_space<vmem>>, vector<80x128xf32>
    tpu.vector_store %arg10[%c0_41, %c0_42], %41 {strides = array<i32>} : memref<80x128xf32, #tpu.memory_space<vmem>>, vector<80x128xf32>,
    %c0_43 = arith.constant 0 : index
    %c0_44 = arith.constant 0 : index
    %43 = vector.load %arg10[%c0_43, %c0_44] : memref<80x128xf32, #tpu.memory_space<vmem>>, vector<80x128xf32>
    %c10 = arith.constant 10 : index
    %c0_45 = arith.constant 0 : index
    %44 = vector.load %arg9[%c10, %c0_45] : memref<110x128xbf16, #tpu.memory_space<vmem>>, vector<80x128xbf16>
    %c3 = arith.constant 3 : index
    %c0_46 = arith.constant 0 : index
    %c0_47 = arith.constant 0 : index
    %45 = vector.load %arg2[%c3, %c0_46, %c0_47] : memref<9x128x128xbf16, #tpu.memory_space<vmem>>, vector<1x128x128xbf16>
    %46 = vector.shape_cast %45 : vector<1x128x128xbf16> to vector<128x128xbf16>
    %cst_48 = arith.constant dense<0.000000e+00> : vector<80x128xf32>
    %47 = tpu.matmul %44, %46, %cst_48 {dimension_numbers = #tpu.dot_dimension_numbers<[1], [0], [0], [1], [0, 0, 1, 1], [], []>} : vector<80x128xbf16>, vector<128x128xbf16>, vector<80x128xf32> -> vector<80x128xf32>
    %48 = arith.addf %43, %47 : vector<80x128xf32>
    %c0_49 = arith.constant 0 : index
    %c0_50 = arith.constant 0 : index
    %49 = vector.load %arg10[%c0_49, %c0_50] : memref<80x128xf32, #tpu.memory_space<vmem>>, vector<80x128xf32>
    tpu.vector_store %arg10[%c0_49, %c0_50], %48 {strides = array<i32>} : memref<80x128xf32, #tpu.memory_space<vmem>>, vector<80x128xf32>,
    %c0_51 = arith.constant 0 : index
    %c0_52 = arith.constant 0 : index
    %50 = vector.load %arg10[%c0_51, %c0_52] : memref<80x128xf32, #tpu.memory_space<vmem>>, vector<80x128xf32>
    %c11 = arith.constant 11 : index
    %c0_53 = arith.constant 0 : index
    %51 = vector.load %arg9[%c11, %c0_53] : memref<110x128xbf16, #tpu.memory_space<vmem>>, vector<80x128xbf16>
    %c4 = arith.constant 4 : index
    %c0_54 = arith.constant 0 : index
    %c0_55 = arith.constant 0 : index
    %52 = vector.load %arg2[%c4, %c0_54, %c0_55] : memref<9x128x128xbf16, #tpu.memory_space<vmem>>, vector<1x128x128xbf16>
    %53 = vector.shape_cast %52 : vector<1x128x128xbf16> to vector<128x128xbf16>
    %cst_56 = arith.constant dense<0.000000e+00> : vector<80x128xf32>
    %54 = tpu.matmul %51, %53, %cst_56 {dimension_numbers = #tpu.dot_dimension_numbers<[1], [0], [0], [1], [0, 0, 1, 1], [], []>} : vector<80x128xbf16>, vector<128x128xbf16>, vector<80x128xf32> -> vector<80x128xf32>
    %55 = arith.addf %50, %54 : vector<80x128xf32>
    %c0_57 = arith.constant 0 : index
    %c0_58 = arith.constant 0 : index
    %56 = vector.load %arg10[%c0_57, %c0_58] : memref<80x128xf32, #tpu.memory_space<vmem>>, vector<80x128xf32>
    tpu.vector_store %arg10[%c0_57, %c0_58], %55 {strides = array<i32>} : memref<80x128xf32, #tpu.memory_space<vmem>>, vector<80x128xf32>,
    %c0_59 = arith.constant 0 : index
    %c0_60 = arith.constant 0 : index
    %57 = vector.load %arg10[%c0_59, %c0_60] : memref<80x128xf32, #tpu.memory_space<vmem>>, vector<80x128xf32>
    %c12 = arith.constant 12 : index
    %c0_61 = arith.constant 0 : index
    %58 = vector.load %arg9[%c12, %c0_61] : memref<110x128xbf16, #tpu.memory_space<vmem>>, vector<80x128xbf16>
    %c5 = arith.constant 5 : index
    %c0_62 = arith.constant 0 : index
    %c0_63 = arith.constant 0 : index
    %59 = vector.load %arg2[%c5, %c0_62, %c0_63] : memref<9x128x128xbf16, #tpu.memory_space<vmem>>, vector<1x128x128xbf16>
    %60 = vector.shape_cast %59 : vector<1x128x128xbf16> to vector<128x128xbf16>
    %cst_64 = arith.constant dense<0.000000e+00> : vector<80x128xf32>
    %61 = tpu.matmul %58, %60, %cst_64 {dimension_numbers = #tpu.dot_dimension_numbers<[1], [0], [0], [1], [0, 0, 1, 1], [], []>} : vector<80x128xbf16>, vector<128x128xbf16>, vector<80x128xf32> -> vector<80x128xf32>
    %62 = arith.addf %57, %61 : vector<80x128xf32>
    %c0_65 = arith.constant 0 : index
    %c0_66 = arith.constant 0 : index
    %63 = vector.load %arg10[%c0_65, %c0_66] : memref<80x128xf32, #tpu.memory_space<vmem>>, vector<80x128xf32>
    tpu.vector_store %arg10[%c0_65, %c0_66], %62 {strides = array<i32>} : memref<80x128xf32, #tpu.memory_space<vmem>>, vector<80x128xf32>,
    %c0_67 = arith.constant 0 : index
    %c0_68 = arith.constant 0 : index
    %64 = vector.load %arg10[%c0_67, %c0_68] : memref<80x128xf32, #tpu.memory_space<vmem>>, vector<80x128xf32>
    %c20 = arith.constant 20 : index
    %c0_69 = arith.constant 0 : index
    %65 = vector.load %arg9[%c20, %c0_69] : memref<110x128xbf16, #tpu.memory_space<vmem>>, vector<80x128xbf16>
    %c6 = arith.constant 6 : index
    %c0_70 = arith.constant 0 : index
    %c0_71 = arith.constant 0 : index
    %66 = vector.load %arg2[%c6, %c0_70, %c0_71] : memref<9x128x128xbf16, #tpu.memory_space<vmem>>, vector<1x128x128xbf16>
    %67 = vector.shape_cast %66 : vector<1x128x128xbf16> to vector<128x128xbf16>
    %cst_72 = arith.constant dense<0.000000e+00> : vector<80x128xf32>
    %68 = tpu.matmul %65, %67, %cst_72 {dimension_numbers = #tpu.dot_dimension_numbers<[1], [0], [0], [1], [0, 0, 1, 1], [], []>} : vector<80x128xbf16>, vector<128x128xbf16>, vector<80x128xf32> -> vector<80x128xf32>
    %69 = arith.addf %64, %68 : vector<80x128xf32>
    %c0_73 = arith.constant 0 : index
    %c0_74 = arith.constant 0 : index
    %70 = vector.load %arg10[%c0_73, %c0_74] : memref<80x128xf32, #tpu.memory_space<vmem>>, vector<80x128xf32>
    tpu.vector_store %arg10[%c0_73, %c0_74], %69 {strides = array<i32>} : memref<80x128xf32, #tpu.memory_space<vmem>>, vector<80x128xf32>,
    %c0_75 = arith.constant 0 : index
    %c0_76 = arith.constant 0 : index
    %71 = vector.load %arg10[%c0_75, %c0_76] : memref<80x128xf32, #tpu.memory_space<vmem>>, vector<80x128xf32>
    %c21 = arith.constant 21 : index
    %c0_77 = arith.constant 0 : index
    %72 = vector.load %arg9[%c21, %c0_77] : memref<110x128xbf16, #tpu.memory_space<vmem>>, vector<80x128xbf16>
    %c7 = arith.constant 7 : index
    %c0_78 = arith.constant 0 : index
    %c0_79 = arith.constant 0 : index
    %73 = vector.load %arg2[%c7, %c0_78, %c0_79] : memref<9x128x128xbf16, #tpu.memory_space<vmem>>, vector<1x128x128xbf16>
    %74 = vector.shape_cast %73 : vector<1x128x128xbf16> to vector<128x128xbf16>
    %cst_80 = arith.constant dense<0.000000e+00> : vector<80x128xf32>
    %75 = tpu.matmul %72, %74, %cst_80 {dimension_numbers = #tpu.dot_dimension_numbers<[1], [0], [0], [1], [0, 0, 1, 1], [], []>} : vector<80x128xbf16>, vector<128x128xbf16>, vector<80x128xf32> -> vector<80x128xf32>
    %76 = arith.addf %71, %75 : vector<80x128xf32>
    %c0_81 = arith.constant 0 : index
    %c0_82 = arith.constant 0 : index
    %77 = vector.load %arg10[%c0_81, %c0_82] : memref<80x128xf32, #tpu.memory_space<vmem>>, vector<80x128xf32>
    tpu.vector_store %arg10[%c0_81, %c0_82], %76 {strides = array<i32>} : memref<80x128xf32, #tpu.memory_space<vmem>>, vector<80x128xf32>,
    %c0_83 = arith.constant 0 : index
    %c0_84 = arith.constant 0 : index
    %78 = vector.load %arg10[%c0_83, %c0_84] : memref<80x128xf32, #tpu.memory_space<vmem>>, vector<80x128xf32>
    %c22 = arith.constant 22 : index
    %c0_85 = arith.constant 0 : index
    %79 = vector.load %arg9[%c22, %c0_85] : memref<110x128xbf16, #tpu.memory_space<vmem>>, vector<80x128xbf16>
    %c8 = arith.constant 8 : index
    %c0_86 = arith.constant 0 : index
    %c0_87 = arith.constant 0 : index
    %80 = vector.load %arg2[%c8, %c0_86, %c0_87] : memref<9x128x128xbf16, #tpu.memory_space<vmem>>, vector<1x128x128xbf16>
    %81 = vector.shape_cast %80 : vector<1x128x128xbf16> to vector<128x128xbf16>
    %cst_88 = arith.constant dense<0.000000e+00> : vector<80x128xf32>
    %82 = tpu.matmul %79, %81, %cst_88 {dimension_numbers = #tpu.dot_dimension_numbers<[1], [0], [0], [1], [0, 0, 1, 1], [], []>} : vector<80x128xbf16>, vector<128x128xbf16>, vector<80x128xf32> -> vector<80x128xf32>
    %83 = arith.addf %78, %82 : vector<80x128xf32>
    %c0_89 = arith.constant 0 : index
    %c0_90 = arith.constant 0 : index
    %84 = vector.load %arg10[%c0_89, %c0_90] : memref<80x128xf32, #tpu.memory_space<vmem>>, vector<80x128xf32>
    tpu.vector_store %arg10[%c0_89, %c0_90], %83 {strides = array<i32>} : memref<80x128xf32, #tpu.memory_space<vmem>>, vector<80x128xf32>,
    %c0_91 = arith.constant 0 : index
    %c0_92 = arith.constant 0 : index
    %85 = vector.load %arg10[%c0_91, %c0_92] : memref<80x128xf32, #tpu.memory_space<vmem>>, vector<80x128xf32>
    %c0_93 = arith.constant 0 : index
    %c0_94 = arith.constant 0 : index
    %86 = vector.load %arg6[%c0_93, %c0_94] : memref<80x1xf32, #tpu.memory_space<vmem>>, vector<80x1xf32>
    %cst_95 = arith.constant 5.000000e-01 : f32
    %87 = vector.broadcast %cst_95 : f32 to vector<80x1xf32>
    %88 = arith.cmpf ogt, %86, %87 : vector<80x1xf32>
    %cst_96 = arith.constant 0.000000e+00 : f32
    %89 = vector.shape_cast %88 : vector<80x1xi1> to vector<80x1xi1>
    %90 = vector.broadcast %89 : vector<80x1xi1> to vector<80x128xi1>
    %91 = vector.broadcast %cst_96 : f32 to vector<80x128xf32>
    %92 = arith.select %90, %85, %91 : vector<80x128xi1>, vector<80x128xf32>
    %cst_97 = arith.constant 1.000000e+00 : f32
    %93 = vector.broadcast %cst_97 : f32 to vector<1x80xf32>
    %cst_98 = arith.constant dense<0.000000e+00> : vector<1x128xf32>
    %94 = tpu.matmul %93, %92, %cst_98 {dimension_numbers = #tpu.dot_dimension_numbers<[1], [0], [0], [1], [0, 0, 1, 1], [], []>} : vector<1x80xf32>, vector<80x128xf32>, vector<1x128xf32> -> vector<1x128xf32>
    %c0_99 = arith.constant 0 : index
    %c0_100 = arith.constant 0 : index
    %c0_101 = arith.constant 0 : index
    %95 = vector.load %arg8[%c0_99, %c0_100, %c0_101] : memref<1x2x128xf32, #tpu.memory_space<vmem>>, vector<1x1x128xf32>
    %96 = vector.shape_cast %95 : vector<1x1x128xf32> to vector<1x128xf32>
    %97 = vector.shape_cast %94 : vector<1x128xf32> to vector<1x1x128xf32>
    tpu.vector_store %arg8[%c0_99, %c0_100, %c0_101], %97 {strides = array<i32>} : memref<1x2x128xf32, #tpu.memory_space<vmem>>, vector<1x1x128xf32>,
    %98 = arith.mulf %92, %92 : vector<80x128xf32>
    %cst_102 = arith.constant dense<0.000000e+00> : vector<1x128xf32>
    %99 = tpu.matmul %93, %98, %cst_102 {dimension_numbers = #tpu.dot_dimension_numbers<[1], [0], [0], [1], [0, 0, 1, 1], [], []>} : vector<1x80xf32>, vector<80x128xf32>, vector<1x128xf32> -> vector<1x128xf32>
    %c0_103 = arith.constant 0 : index
    %c1_104 = arith.constant 1 : index
    %c0_105 = arith.constant 0 : index
    %100 = vector.load %arg8[%c0_103, %c1_104, %c0_105] : memref<1x2x128xf32, #tpu.memory_space<vmem>>, vector<1x1x128xf32>
    %101 = vector.shape_cast %100 : vector<1x1x128xf32> to vector<1x128xf32>
    %102 = vector.shape_cast %99 : vector<1x128xf32> to vector<1x1x128xf32>
    tpu.vector_store %arg8[%c0_103, %c1_104, %c0_105], %102 {strides = array<i32>} : memref<1x2x128xf32, #tpu.memory_space<vmem>>, vector<1x1x128xf32>,
    %103 = arith.truncf %85 : vector<80x128xf32> to vector<80x128xbf16>
    %c0_106 = arith.constant 0 : index
    %c0_107 = arith.constant 0 : index
    %c0_108 = arith.constant 0 : index
    %104 = vector.load %arg7[%c0_106, %c0_107, %c0_108] : memref<1x80x128xbf16, #tpu.memory_space<vmem>>, vector<1x80x128xbf16>
    %105 = vector.shape_cast %104 : vector<1x80x128xbf16> to vector<80x128xbf16>
    %106 = vector.shape_cast %103 : vector<80x128xbf16> to vector<1x80x128xbf16>
    tpu.vector_store %arg7[%c0_106, %c0_107, %c0_108], %106 {strides = array<i32>} : memref<1x80x128xbf16, #tpu.memory_space<vmem>>, vector<1x80x128xbf16>,
    return
  }
  func.func @transform_0(%arg0: i32) -> (i32, i32, i32) {
    %c0_i32 = arith.constant 0 : i32
    %c0_i32_0 = arith.constant 0 : i32
    %c0_i32_1 = arith.constant 0 : i32
    return %arg0, %c0_i32, %c0_i32_0 : i32, i32, i32
  }
  func.func @transform_1(%arg0: i32) -> (i32, i32, i32) {
    %c0_i32 = arith.constant 0 : i32
    %c0_i32_0 = arith.constant 0 : i32
    %c0_i32_1 = arith.constant 0 : i32
    %c0_i32_2 = arith.constant 0 : i32
    return %c0_i32, %c0_i32_0, %c0_i32_1 : i32, i32, i32
  }
  func.func @transform_2(%arg0: i32) -> (i32, i32) {
    %c0_i32 = arith.constant 0 : i32
    %c0_i32_0 = arith.constant 0 : i32
    %c0_i32_1 = arith.constant 0 : i32
    return %c0_i32, %c0_i32_0 : i32, i32
  }
  func.func @transform_3(%arg0: i32) -> (i32, i32) {
    %c0_i32 = arith.constant 0 : i32
    %c0_i32_0 = arith.constant 0 : i32
    %c0_i32_1 = arith.constant 0 : i32
    return %c0_i32, %c0_i32_0 : i32, i32
  }
  func.func @transform_4(%arg0: i32) -> (i32, i32) {
    %c0_i32 = arith.constant 0 : i32
    %c0_i32_0 = arith.constant 0 : i32
    %c0_i32_1 = arith.constant 0 : i32
    return %c0_i32, %c0_i32_0 : i32, i32
  }
  func.func @transform_5(%arg0: i32) -> (i32, i32) {
    %c0_i32 = arith.constant 0 : i32
    %c0_i32_0 = arith.constant 0 : i32
    %c0_i32_1 = arith.constant 0 : i32
    return %c0_i32, %c0_i32_0 : i32, i32
  }
  func.func @transform_6(%arg0: i32) -> (i32, i32, i32) {
    %c0_i32 = arith.constant 0 : i32
    %c0_i32_0 = arith.constant 0 : i32
    %c0_i32_1 = arith.constant 0 : i32
    return %arg0, %c0_i32, %c0_i32_0 : i32, i32, i32
  }
  func.func @transform_7(%arg0: i32) -> (i32, i32, i32) {
    %c0_i32 = arith.constant 0 : i32
    %c0_i32_0 = arith.constant 0 : i32
    %c0_i32_1 = arith.constant 0 : i32
    return %arg0, %c0_i32, %c0_i32_0 : i32, i32, i32
  }
}

module attributes {stable_mosaic.version = 11 : i64} {
  func.func @kernel(%arg0: i32, %arg1: memref<1x80x128xbf16, #tpu.memory_space<vmem>>, %arg2: memref<1x80x128xbf16, #tpu.memory_space<vmem>>, %arg3: memref<1x128xf32, #tpu.memory_space<vmem>>, %arg4: memref<1x128xf32, #tpu.memory_space<vmem>>, %arg5: memref<1x128xf32, #tpu.memory_space<vmem>>, %arg6: memref<1x128xf32, #tpu.memory_space<vmem>>, %arg7: memref<1x80x128xf32, #tpu.memory_space<vmem>>) attributes {dimension_semantics = [#tpu.dimension_semantics<parallel>], iteration_bounds = array<i64: 2>, scalar_prefetch = 0 : i64, scratch_operands = 0 : i64, tpu.core_type = #tpu.core_type<tc>, window_params = [{transform_indices = @transform_0, window_bounds = array<i64: 1, 80, 128>}, {transform_indices = @transform_1, window_bounds = array<i64: 1, 80, 128>}, {pipeline_mode = #tpu.pipeline_mode<synchronous>, transform_indices = @transform_2, window_bounds = array<i64: 1, 128>}, {pipeline_mode = #tpu.pipeline_mode<synchronous>, transform_indices = @transform_3, window_bounds = array<i64: 1, 128>}, {pipeline_mode = #tpu.pipeline_mode<synchronous>, transform_indices = @transform_4, window_bounds = array<i64: 1, 128>}, {pipeline_mode = #tpu.pipeline_mode<synchronous>, transform_indices = @transform_5, window_bounds = array<i64: 1, 128>}, {transform_indices = @transform_6, window_bounds = array<i64: 1, 80, 128>}]} {
    %c0 = arith.constant 0 : index
    %c0_0 = arith.constant 0 : index
    %c0_1 = arith.constant 0 : index
    %0 = vector.load %arg1[%c0, %c0_0, %c0_1] : memref<1x80x128xbf16, #tpu.memory_space<vmem>>, vector<1x80x128xbf16>
    %1 = vector.shape_cast %0 : vector<1x80x128xbf16> to vector<80x128xbf16>
    %2 = arith.extf %1 : vector<80x128xbf16> to vector<80x128xf32>
    %c0_2 = arith.constant 0 : index
    %c0_3 = arith.constant 0 : index
    %3 = vector.load %arg3[%c0_2, %c0_3] : memref<1x128xf32, #tpu.memory_space<vmem>>, vector<1x128xf32>
    %4 = vector.broadcast %3 : vector<1x128xf32> to vector<80x128xf32>
    %5 = arith.mulf %2, %4 : vector<80x128xf32>
    %c0_4 = arith.constant 0 : index
    %c0_5 = arith.constant 0 : index
    %6 = vector.load %arg4[%c0_4, %c0_5] : memref<1x128xf32, #tpu.memory_space<vmem>>, vector<1x128xf32>
    %7 = vector.broadcast %6 : vector<1x128xf32> to vector<80x128xf32>
    %8 = arith.addf %5, %7 : vector<80x128xf32>
    %c0_6 = arith.constant 0 : index
    %c0_7 = arith.constant 0 : index
    %c0_8 = arith.constant 0 : index
    %9 = vector.load %arg2[%c0_6, %c0_7, %c0_8] : memref<1x80x128xbf16, #tpu.memory_space<vmem>>, vector<1x80x128xbf16>
    %10 = vector.shape_cast %9 : vector<1x80x128xbf16> to vector<80x128xbf16>
    %11 = arith.extf %10 : vector<80x128xbf16> to vector<80x128xf32>
    %c0_9 = arith.constant 0 : index
    %c0_10 = arith.constant 0 : index
    %12 = vector.load %arg5[%c0_9, %c0_10] : memref<1x128xf32, #tpu.memory_space<vmem>>, vector<1x128xf32>
    %13 = vector.broadcast %12 : vector<1x128xf32> to vector<80x128xf32>
    %14 = arith.mulf %11, %13 : vector<80x128xf32>
    %c0_11 = arith.constant 0 : index
    %c0_12 = arith.constant 0 : index
    %15 = vector.load %arg6[%c0_11, %c0_12] : memref<1x128xf32, #tpu.memory_space<vmem>>, vector<1x128xf32>
    %16 = vector.broadcast %15 : vector<1x128xf32> to vector<80x128xf32>
    %17 = arith.addf %14, %16 : vector<80x128xf32>
    %18 = arith.addf %8, %17 : vector<80x128xf32>
    %cst = arith.constant 0.000000e+00 : f32
    %19 = vector.broadcast %cst : f32 to vector<80x128xf32>
    %20 = arith.maximumf %18, %19 : vector<80x128xf32>
    %c0_13 = arith.constant 0 : index
    %c0_14 = arith.constant 0 : index
    %c0_15 = arith.constant 0 : index
    %21 = vector.load %arg7[%c0_13, %c0_14, %c0_15] : memref<1x80x128xf32, #tpu.memory_space<vmem>>, vector<1x80x128xf32>
    %22 = vector.shape_cast %21 : vector<1x80x128xf32> to vector<80x128xf32>
    %23 = vector.shape_cast %20 : vector<80x128xf32> to vector<1x80x128xf32>
    tpu.vector_store %arg7[%c0_13, %c0_14, %c0_15], %23 {strides = array<i32>} : memref<1x80x128xf32, #tpu.memory_space<vmem>>, vector<1x80x128xf32>,
    return
  }
  func.func @transform_0(%arg0: i32) -> (i32, i32, i32) {
    %c0_i32 = arith.constant 0 : i32
    %c0_i32_0 = arith.constant 0 : i32
    %c0_i32_1 = arith.constant 0 : i32
    return %arg0, %c0_i32, %c0_i32_0 : i32, i32, i32
  }
  func.func @transform_1(%arg0: i32) -> (i32, i32, i32) {
    %c0_i32 = arith.constant 0 : i32
    %c0_i32_0 = arith.constant 0 : i32
    %c0_i32_1 = arith.constant 0 : i32
    return %arg0, %c0_i32, %c0_i32_0 : i32, i32, i32
  }
  func.func @transform_2(%arg0: i32) -> (i32, i32) {
    %c0_i32 = arith.constant 0 : i32
    %c0_i32_0 = arith.constant 0 : i32
    %c0_i32_1 = arith.constant 0 : i32
    return %c0_i32, %c0_i32_0 : i32, i32
  }
  func.func @transform_3(%arg0: i32) -> (i32, i32) {
    %c0_i32 = arith.constant 0 : i32
    %c0_i32_0 = arith.constant 0 : i32
    %c0_i32_1 = arith.constant 0 : i32
    return %c0_i32, %c0_i32_0 : i32, i32
  }
  func.func @transform_4(%arg0: i32) -> (i32, i32) {
    %c0_i32 = arith.constant 0 : i32
    %c0_i32_0 = arith.constant 0 : i32
    %c0_i32_1 = arith.constant 0 : i32
    return %c0_i32, %c0_i32_0 : i32, i32
  }
  func.func @transform_5(%arg0: i32) -> (i32, i32) {
    %c0_i32 = arith.constant 0 : i32
    %c0_i32_0 = arith.constant 0 : i32
    %c0_i32_1 = arith.constant 0 : i32
    return %c0_i32, %c0_i32_0 : i32, i32
  }
  func.func @transform_6(%arg0: i32) -> (i32, i32, i32) {
    %c0_i32 = arith.constant 0 : i32
    %c0_i32_0 = arith.constant 0 : i32
    %c0_i32_1 = arith.constant 0 : i32
    return %arg0, %c0_i32, %c0_i32_0 : i32, i32, i32
  }
}

</mosaic_0001>

<bundles_post_ra>
// kernel: _basic_block_forward.5
= control target key start
LH: loop header
LB: loop body
LE: loop exit
PB: predicated region body
PF: predicated region fallthrough
CT: control target
= control target key end

     0   :  { %s580_s21 = smov 0   ;;  %s690_s0 = inlined_call_operand.vmem [shape: bf16[2,80,128], index: 0, kind: input, shape index: {}]   ;;  %s691_s1 = inlined_call_operand.vmem [shape: bf16[2,80,128], index: 1, kind: input, shape index: {}]   ;;  %s692_s2 = inlined_call_operand.vmem [shape: f32[1,128], index: 2, kind: input, shape index: {}]   ;;  %s693_s3 = inlined_call_operand.vmem [shape: f32[1,128], index: 3, kind: input, shape index: {}]   ;;  %s694_s4 = inlined_call_operand.vmem [shape: f32[1,128], index: 4, kind: input, shape index: {}]   ;;  %s695_s5 = inlined_call_operand.vmem [shape: f32[1,128], index: 5, kind: input, shape index: {}]   ;;  %s696_s6 = inlined_call_operand.vmem [shape: f32[2,80,128], index: 6, kind: output, shape index: {}]  }
   0x1 LB: > { %s465_s22 = sadd.s32 4294967295, %s543_s21   ;;  %p469_p0 = scmp.ge.s32.totalorder %s543_s21, 1  ;;  %s543_s21 = sphi %s580_s21, %s16_s21  }
   0x2   : > { %p222_p1 = scmp.lt.s32.totalorder %s543_s21, 3 }
   0x4   : > { %p223_p2 = pnand %p469_p0, %p222_p1 }
   0x5   : > { %p257_p3 = scmp.lt.s32.totalorder (!%p223_p2), %s465_s22, 1 }
   0x6   : > { %226 = sbr.rel (%p223_p2) target bundleno = 43 (0x2b), region = 44 }
   0xb   : > { %s698_s22 = smov (!%p257_p3, %s465_s22), 1  ;;  %v604_v0 = vld [vmem:[%s692_s2] ss:$0 sm:$0xff] }
   0xc   : > { %s523_s23 = smul.u32 40, %s698_s22  ;;  %v609_v1 = vld [vmem:[%s694_s4] ss:$0 sm:$0xff] }
   0xd   : > { %v617_v6 = vld [vmem:[%s693_s3] ss:$0 sm:$0xff]  ;;  %s524_s14 = smul.u32 80, %s698_s22 }
   0xe   : > { %s594_s26 = scalar_lea.vmem %s690_s0, %s523_s23  ;;  %s599_s29 = scalar_lea.vmem %s691_s1, %s523_s23  ;;  %v622_v8 = vld [vmem:[%s695_s5] ss:$0 sm:$0xff] }
   0xf   : > { %v476_v2 = vld [vmem:[%s594_s26] sm:$0xff]   ;;  %v515_v4 = vld [vmem:[%s594_s26 + $0x8] sm:$0xff]   ;;  %v516_v24 = vld [vmem:[%s594_s26 + $0x10] sm:$0xff]   ;;  %s647_s17 = scalar_lea.vmem %s696_s6, %s524_s14 }
  0x10   : > { %v496_v3 = vld [vmem:[%s599_s29] sm:$0xff]   ;;  %v477_v5 = vunpack.c.l.bf16 %v476_v2  ;;  %v478_v9 = vunpack.c.h.bf16 %v476_v2  ;;  %v519_v11 = vld [vmem:[%s599_s29 + $0x8] sm:$0xff]   ;;  %v481_v12 = vunpack.c.l.bf16 %v515_v4  ;;  %v482_v14 = vunpack.c.h.bf16 %v515_v4  ;;  %v520_v25 = vld [vmem:[%s599_s29 + $0x10] sm:$0xff]  }
  0x11   : > { %v497_v7 = vunpack.c.l.bf16 %v496_v3  ;;  %v498_v10 = vunpack.c.h.bf16 %v496_v3  ;;  %v501_v13 = vunpack.c.l.bf16 %v519_v11  ;;  %v502_v15 = vunpack.c.h.bf16 %v519_v11  ;;  %v517_v42 = vld [vmem:[%s594_s26 + $0x18] sm:$0xff]   ;;  %v518_v52 = vld [vmem:[%s594_s26 + $0x20] sm:$0xff]  }
  0x12   : > { %v296_v16 = vmul.f32 %v604_v0, %v477_v5  ;;  %v297_v18 = vmul.f32 %v604_v0, %v478_v9  ;;  %v298_v20 = vmul.f32 %v604_v0, %v481_v12  ;;  %v299_v22 = vmul.f32 %v604_v0, %v482_v14  ;;  %v521_v43 = vld [vmem:[%s599_s29 + $0x18] sm:$0xff]   ;;  %v522_v57 = vld [vmem:[%s599_s29 + $0x20] sm:$0xff]  }
  0x13   : > { %v344_v17 = vmul.f32 %v609_v1, %v497_v7  ;;  %v345_v19 = vmul.f32 %v609_v1, %v498_v10  ;;  %v346_v21 = vmul.f32 %v609_v1, %v501_v13  ;;  %v347_v23 = vmul.f32 %v609_v1, %v502_v15 }
  0x14   : > { %v310_v26 = vadd.f32 %v617_v6, %v296_v16  ;;  %v311_v28 = vadd.f32 %v617_v6, %v297_v18  ;;  %v312_v30 = vadd.f32 %v617_v6, %v298_v20  ;;  %v313_v32 = vadd.f32 %v617_v6, %v299_v22 }
  0x15   : > { %v358_v27 = vadd.f32 %v622_v8, %v344_v17  ;;  %v359_v29 = vadd.f32 %v622_v8, %v345_v19  ;;  %v360_v31 = vadd.f32 %v622_v8, %v346_v21  ;;  %v361_v33 = vadd.f32 %v622_v8, %v347_v23 }
  0x16   : > { %v485_v36 = vunpack.c.l.bf16 %v516_v24  ;;  %v505_v37 = vunpack.c.l.bf16 %v520_v25  ;;  %v486_v40 = vunpack.c.h.bf16 %v516_v24  ;;  %v506_v41 = vunpack.c.h.bf16 %v520_v25 }
  0x17   : > { %v368_v34 = vadd.f32 %v358_v27, %v310_v26  ;;  %v369_v35 = vadd.f32 %v359_v29, %v311_v28  ;;  %v370_v38 = vadd.f32 %v360_v31, %v312_v30  ;;  %v371_v39 = vadd.f32 %v361_v33, %v313_v32 }
  0x18   : > { %v300_v46 = vmul.f32 %v604_v0, %v485_v36  ;;  %v348_v47 = vmul.f32 %v609_v1, %v505_v37  ;;  %v301_v50 = vmul.f32 %v604_v0, %v486_v40  ;;  %v349_v51 = vmul.f32 %v609_v1, %v506_v41 }
  0x19   : > { %v378_v44 = vmax.f32 %v368_v34, 0.0  ;;  %v379_v45 = vmax.f32 %v369_v35, 0.0  ;;  %v380_v48 = vmax.f32 %v370_v38, 0.0  ;;  %v381_v49 = vmax.f32 %v371_v39, 0.0 }
  0x1a   : > { %v314_v53 = vadd.f32 %v617_v6, %v300_v46  ;;  %v362_v54 = vadd.f32 %v622_v8, %v348_v47  ;;  %v489_v55 = vunpack.c.l.bf16 %v517_v42  ;;  %v509_v56 = vunpack.c.l.bf16 %v521_v43 }
  0x1b   : > { %388 = vst [vmem:[%s647_s17] sm:$0xff] %v378_v44  ;;  %v315_v58 = vadd.f32 %v617_v6, %v301_v50  ;;  %v363_v59 = vadd.f32 %v622_v8, %v349_v51  ;;  %v490_v60 = vunpack.c.h.bf16 %v517_v42  ;;  %v510_v61 = vunpack.c.h.bf16 %v521_v43 }
  0x1c   : > { %389 = vst [vmem:[%s647_s17 + $0x8] sm:$0xff] %v379_v45  ;;  %v372_v62 = vadd.f32 %v362_v54, %v314_v53  ;;  %v302_v63 = vmul.f32 %v604_v0, %v489_v55  ;;  %v350_v2 = vmul.f32 %v609_v1, %v509_v56  ;;  %v493_v3 = vunpack.c.l.bf16 %v518_v52 }
  0x1d   : > { %390 = vst [vmem:[%s647_s17 + $0x10] sm:$0xff] %v380_v48  ;;  %v373_v4 = vadd.f32 %v363_v59, %v315_v58  ;;  %v303_v5 = vmul.f32 %v604_v0, %v490_v60  ;;  %v351_v7 = vmul.f32 %v609_v1, %v510_v61  ;;  %v513_v9 = vunpack.c.l.bf16 %v522_v57 }
  0x1e   : > { %391 = vst [vmem:[%s647_s17 + $0x18] sm:$0xff] %v381_v49  ;;  %v382_v10 = vmax.f32 %v372_v62, 0.0  ;;  %v316_v11 = vadd.f32 %v617_v6, %v302_v63  ;;  %v364_v12 = vadd.f32 %v622_v8, %v350_v2  ;;  %v304_v13 = vmul.f32 %v604_v0, %v493_v3 }
  0x1f   : > { %v383_v14 = vmax.f32 %v373_v4, 0.0  ;;  %v317_v15 = vadd.f32 %v617_v6, %v303_v5  ;;  %v365_v16 = vadd.f32 %v622_v8, %v351_v7  ;;  %v352_v17 = vmul.f32 %v609_v1, %v513_v9 }
  0x20   : > { %392 = vst [vmem:[%s647_s17 + $0x20] sm:$0xff] %v382_v10  ;;  %v374_v18 = vadd.f32 %v364_v12, %v316_v11  ;;  %v318_v19 = vadd.f32 %v617_v6, %v304_v13  ;;  %v494_v20 = vunpack.c.h.bf16 %v518_v52  ;;  %v514_v21 = vunpack.c.h.bf16 %v522_v57 }
  0x21   : > { %393 = vst [vmem:[%s647_s17 + $0x28] sm:$0xff] %v383_v14  ;;  %v375_v22 = vadd.f32 %v365_v16, %v317_v15  ;;  %v366_v23 = vadd.f32 %v622_v8, %v352_v17 }
  0x22   : > { %v384_v24 = vmax.f32 %v374_v18, 0.0  ;;  %v305_v25 = vmul.f32 %v604_v0, %v494_v20  ;;  %v353_v26 = vmul.f32 %v609_v1, %v514_v21 }
  0x23   : > { %v385_v27 = vmax.f32 %v375_v22, 0.0  ;;  %v376_v28 = vadd.f32 %v366_v23, %v318_v19 }
  0x24   : > { %394 = vst [vmem:[%s647_s17 + $0x30] sm:$0xff] %v384_v24  ;;  %v319_v29 = vadd.f32 %v617_v6, %v305_v25  ;;  %v367_v30 = vadd.f32 %v622_v8, %v353_v26 }
  0x25   : > { %395 = vst [vmem:[%s647_s17 + $0x38] sm:$0xff] %v385_v27  ;;  %v386_v31 = vmax.f32 %v376_v28, 0.0 }
  0x26   : > { %v377_v32 = vadd.f32 %v367_v30, %v319_v29 }
  0x27   : > { %396 = vst [vmem:[%s647_s17 + $0x40] sm:$0xff] %v386_v31 }
  0x28   : > { %v387_v33 = vmax.f32 %v377_v32, 0.0 }
  0x2a   : > { %397 = vst [vmem:[%s647_s17 + $0x48] sm:$0xff] %v387_v33 }
  0x2b PF: > { %s16_s21 = sadd.s32 1, %s543_s21  }
  0x2c   : > { %p13_p4 = scmp.ge.s32.totalorder %s16_s21, 4  }
  0x2e   :  { %15 = sbr.rel (!%p13_p4) target bundleno = 1 (0x1), region = 77 }

// kernel: _basic_block_forward.3
= control target key start
LH: loop header
LB: loop body
LE: loop exit
PB: predicated region body
PF: predicated region fallthrough
CT: control target
= control target key end

     0   :  { %s3687_s24 = smov 0   ;;  %s4462_s0 = inlined_call_operand.vmem [shape: bf16[2,4,110,128], index: 0, kind: input, shape index: {}]   ;;  %s4463_s1 = inlined_call_operand.vmem [shape: bf16[9,128,128], index: 1, kind: input, shape index: {}]   ;;  %s4464_s2 = inlined_call_operand.vmem [shape: bf16[128,128], index: 2, kind: input, shape index: {}]   ;;  %s4465_s3 = inlined_call_operand.vmem [shape: f32[80,1], index: 3, kind: input, shape index: {}]   ;;  %s4466_s4 = inlined_call_operand.vmem [shape: bf16[2,110,128], index: 4, kind: output, shape index: {0}]   ;;  %s4467_s5 = inlined_call_operand.vmem [shape: bf16[2,80,128], index: 5, kind: output, shape index: {1}]   ;;  %s4468_s6 = inlined_call_operand.vmem [shape: f32[2,2,128], index: 6, kind: output, shape index: {2}]   ;;  %s4469_s7 = inlined_call_operand.vmem [shape: f32[2,2,128], index: 7, kind: output, shape index: {3}]  }
   0x1 LB: > { %s2700_s25 = sadd.s32 4294967295, %s3643_s24   ;;  %p2704_p0 = scmp.ge.s32.totalorder %s3643_s24, 1  ;;  %s3643_s24 = sphi %s3687_s24, %s18_s24  }
   0x2   : > { %p244_p1 = scmp.lt.s32.totalorder %s3643_s24, 3 }
   0x4   : > { %p245_p2 = pnand %p2704_p0, %p244_p1 }
   0x5   : > { %p289_p3 = scmp.lt.s32.totalorder (!%p245_p2), %s2700_s25, 1 }
   0x6   : > { %248 = sbr.rel (%p245_p2) target bundleno = 558 (0x22e), region = 36 }
   0xb   : > { %v3458_v0 = vld [vmem:[%s4463_s1 + $0x38] sm:$0xff]  ;;  %v3457_v4 = vld [vmem:[%s4463_s1 + $0x30] sm:$0xff]  ;;  %s4477_s25 = smov (!%p289_p3, %s2700_s25), 1  ;;  %v3456_v8 = vld [vmem:[%s4463_s1 + $0x28] sm:$0xff]  ;;  %vm727_vm0 = vsmask.f32 7424 }
   0xc   : > { %v3471_v1 = vld [vmem:[%s4463_s1 + $0x78] sm:$0xff]  ;;  %437 = vmatpush.bf16.msra.mxu0 %v3458_v0  ;;  %v3470_v5 = vld [vmem:[%s4463_s1 + $0x70] sm:$0xff]  ;;  %v3469_v9 = vld [vmem:[%s4463_s1 + $0x68] sm:$0xff]  ;;  %s3621_s29 = smul.u32 224, %s4477_s25  ;;  %vm1502_vm1 = vcmask 1046528   ;;  %vm2179_vm13 = vcmask 1041408  }
   0xd   : > { %v3484_v2 = vld [vmem:[%s4463_s1 + $0xb8] sm:$0xff]  ;;  %607 = vmatpush.bf16.msra.mxu1 %v3471_v1  ;;  %v3483_v6 = vld [vmem:[%s4463_s1 + $0xb0] sm:$0xff]  ;;  %v3482_v10 = vld [vmem:[%s4463_s1 + $0xa8] sm:$0xff]  ;;  %vm1871_vm11 = vsmask.f32 6400  ;;  %s3622_s28 = smul.u32 56, %s4477_s25 }
   0xe   : > { %v3497_v3 = vld [vmem:[%s4463_s1 + $0xf8] sm:$0xff]  ;;  %825 = vmatpush.bf16.msra.mxu2 %v3484_v2  ;;  %v3496_v7 = vld [vmem:[%s4463_s1 + $0xf0] sm:$0xff]  ;;  %v3495_v11 = vld [vmem:[%s4463_s1 + $0xe8] sm:$0xff]  ;;  %s3749_s17 = scalar_lea.vmem %s4462_s0, %s3621_s29  ;;  %vm2180_vm14 = vsmask.f32 1280  ;;  %s2708_s12 = sshll.u32 %s4477_s25, 1 }
   0xf   : > { %995 = vmatpush.bf16.msra.mxu3 %v3497_v3  ;;  %v3455_v12 = vld [vmem:[%s4463_s1 + $0x20] sm:$0xff]  ;;  %v3454_v16 = vld [vmem:[%s4463_s1 + $0x18] sm:$0xff]  ;;  %v3453_v21 = vld [vmem:[%s4463_s1 + $0x10] sm:$0xff]  ;;  %s4127_s8 = scalar_lea.vmem %s4466_s4, %s3622_s28  ;;  %s307_s15 = scalar_lea.vmem %s4468_s6, %s2708_s12 }
  0x10   : > { %438 = vmatpush.bf16.msra.mxu0 %v3457_v4  ;;  %v3468_v13 = vld [vmem:[%s4463_s1 + $0x60] sm:$0xff]  ;;  %v3467_v17 = vld [vmem:[%s4463_s1 + $0x58] sm:$0xff]  ;;  %v3466_v22 = vld [vmem:[%s4463_s1 + $0x50] sm:$0xff]  ;;  %s311_s19 = scalar_lea.vmem %s4469_s7, %s2708_s12 }
  0x11   : > { %608 = vmatpush.bf16.msra.mxu1 %v3470_v5  ;;  %v3481_v14 = vld [vmem:[%s4463_s1 + $0xa0] sm:$0xff]  ;;  %v3480_v18 = vld [vmem:[%s4463_s1 + $0x98] sm:$0xff]  ;;  %v3479_v23 = vld [vmem:[%s4463_s1 + $0x90] sm:$0xff] }
  0x12   : > { %826 = vmatpush.bf16.msra.mxu2 %v3483_v6  ;;  %v3494_v15 = vld [vmem:[%s4463_s1 + $0xe0] sm:$0xff]  ;;  %v3493_v19 = vld [vmem:[%s4463_s1 + $0xd8] sm:$0xff]  ;;  %v3492_v24 = vld [vmem:[%s4463_s1 + $0xd0] sm:$0xff] }
  0x13   : > { %996 = vmatpush.bf16.msra.mxu3 %v3496_v7  ;;  %v3472_v20 = vld [vmem:[%s3749_s17] sm:$0xff]  ;;  %v3473_v25 = vld [vmem:[%s3749_s17 + $0x8] sm:$0xff]  ;;  %v3510_v40 = vld [vmem:[%s4463_s1 + $0x138] sm:$0xff] }
  0x14   : > { %439 = vmatpush.bf16.msra.mxu0 %v3456_v8  ;;  %v731_v26 = vshll.u32 %v3472_v20, 16  ;;  %v3452_v27 = vld [vmem:[%s4463_s1 + $0x8] sm:$0xff]  ;;  %v729_v31 = vshrl.u32 %v3472_v20, 16  ;;  %v736_v33 = vshll.u32 %v3473_v25, 16  ;;  %v3451_v34 = vld [vmem:[%s4463_s1] sm:$0xff]  ;;  %v3807_v41 = vld [vmem:[%s4463_s1 + $0x1f8] sm:$0xff] }
  0x15   : > { %609 = vmatpush.bf16.msra.mxu1 %v3469_v9  ;;  %v3465_v28 = vld [vmem:[%s4463_s1 + $0x48] sm:$0xff]  ;;  %v3464_v35 = vld [vmem:[%s4463_s1 + $0x40] sm:$0xff]  ;;  %v3459_v43 = vld [vmem:[%s3749_s17 + $0x38] sm:$0xff]  ;;  %v740_v51 = vshrl.u32 %v3473_v25, 16 }
  0x16   : > { %827 = vmatpush.bf16.msra.mxu2 %v3482_v10  ;;  %v3478_v29 = vld [vmem:[%s4463_s1 + $0x88] sm:$0xff]  ;;  %v733_v32 = vrot.slane %v731_v26, 1  ;;  %v3477_v36 = vld [vmem:[%s4463_s1 + $0x80] sm:$0xff]  ;;  %v738_v39 = vrot.slane %v736_v33, 1  ;;  %v3485_v44 = vld [vmem:[%s3749_s17 + $0x70] sm:$0xff] }
  0x17   : > { %997 = vmatpush.bf16.msra.mxu3 %v3495_v11  ;;  %v3491_v30 = vld [vmem:[%s4463_s1 + $0xc8] sm:$0xff]  ;;  %v3490_v37 = vld [vmem:[%s4463_s1 + $0xc0] sm:$0xff]  ;;  %v3509_v46 = vld [vmem:[%s4463_s1 + $0x130] sm:$0xff] }
  0x18   : > { %440 = vmatpush.bf16.msra.mxu0 %v3455_v12  ;;  %v734_v38 = vor.u32 %v733_v32, %v729_v31  ;;  %v3446_v42 = vld [vmem:[%s3749_s17] sm:$0xff]  ;;  %v3820_v47 = vld [vmem:[%s4463_s1 + $0x1f0] sm:$0xff]  ;;  %v3508_v49 = vld [vmem:[%s4463_s1 + $0x128] sm:$0xff]  ;;  %v742_v55 = vor.u32 %v740_v51, %v738_v39 }
  0x19   : > { %610 = vmatpush.bf16.msra.mxu1 %v3468_v13  ;;  %v3474_v48 = vld [vmem:[%s3749_s17 + $0x10] sm:$0xff]  ;;  %v3830_v50 = vld [vmem:[%s4463_s1 + $0x1e8] sm:$0xff]  ;;  %v3507_v53 = vld [vmem:[%s4463_s1 + $0x120] sm:$0xff] }
  0x1a   : > { %828 = vmatpush.bf16.msra.mxu2 %v3481_v14  ;;  %v739_v45 = vsel %vm727_vm0, %v734_v38, %v738_v39  ;;  %v744_v52 = vshll.u32 %v3474_v48, 16  ;;  %v3839_v54 = vld [vmem:[%s4463_s1 + $0x1e0] sm:$0xff]  ;;  %v3447_v57 = vld [vmem:[%s3749_s17 + $0x8] sm:$0xff]  ;;  %v3486_v59 = vld [vmem:[%s3749_s17 + $0x78] sm:$0xff]  ;;  %v748_v6 = vshrl.u32 %v3474_v48, 16 }
  0x1b   : > { %998 = vmatpush.bf16.msra.mxu3 %v3494_v15  ;;  %v3460_v58 = vld [vmem:[%s3749_s17 + $0x40] sm:$0xff]  ;;  %v3523_v61 = vld [vmem:[%s4463_s1 + $0x178] sm:$0xff]  ;;  %v3522_v2 = vld [vmem:[%s4463_s1 + $0x170] sm:$0xff] }
  0x1c   : > { %441 = vmatpush.bf16.msra.mxu0 %v3454_v16  ;;  %v746_v56 = vrot.slane %v744_v52, 1  ;;  %v3536_v62 = vld [vmem:[%s4463_s1 + $0x1b8] sm:$0xff]  ;;  %v3535_v3 = vld [vmem:[%s4463_s1 + $0x1b0] sm:$0xff]  ;;  %v3521_v8 = vld [vmem:[%s4463_s1 + $0x168] sm:$0xff] }
  0x1d   : > { %611 = vmatpush.bf16.msra.mxu1 %v3467_v17  ;;  %v3506_v63 = vld [vmem:[%s4463_s1 + $0x118] sm:$0xff]  ;;  %v3505_v4 = vld [vmem:[%s4463_s1 + $0x110] sm:$0xff]  ;;  %v3534_v9 = vld [vmem:[%s4463_s1 + $0x1a8] sm:$0xff] }
  0x1e   : > { %829 = vmatpush.bf16.msra.mxu2 %v3480_v18  ;;  %v747_v60 = vsel %vm727_vm0, %v742_v55, %v746_v56  ;;  %v3858_v0 = vld [vmem:[%s4463_s1 + $0x1d8] sm:$0xff]  ;;  %v3874_v5 = vld [vmem:[%s4463_s1 + $0x1d0] sm:$0xff]  ;;  %v750_v10 = vor.u32 %v748_v6, %v746_v56  ;;  %v3520_v12 = vld [vmem:[%s4463_s1 + $0x160] sm:$0xff] }
  0x1f   : > { %999 = vmatpush.bf16.msra.mxu3 %v3493_v19  ;;  %v3475_v1 = vld [vmem:[%s3749_s17 + $0x18] sm:$0xff]  ;;  %v3533_v13 = vld [vmem:[%s4463_s1 + $0x1a0] sm:$0xff]  ;;  %v3448_v14 = vld [vmem:[%s3749_s17 + $0x10] sm:$0xff] }
  0x20   : > { %442 = vmatpush.bf16.msra.mxu0 %v3453_v21  ;;  %v752_v7 = vshll.u32 %v3475_v1, 16  ;;  %v3461_v15 = vld [vmem:[%s3749_s17 + $0x48] sm:$0xff]  ;;  %v3487_v16 = vld [vmem:[%s3749_s17 + $0x80] sm:$0xff]  ;;  %v3519_v18 = vld [vmem:[%s4463_s1 + $0x158] sm:$0xff] }
  0x21   : > { %612 = vmatpush.bf16.msra.mxu1 %v3466_v22  ;;  %v3532_v19 = vld [vmem:[%s4463_s1 + $0x198] sm:$0xff]  ;;  %v3476_v20 = vld [vmem:[%s3749_s17 + $0x20] sm:$0xff]  ;;  %v3504_v21 = vld [vmem:[%s4463_s1 + $0x108] sm:$0xff] }
  0x22   : > { %830 = vmatpush.bf16.msra.mxu2 %v3479_v23  ;;  %v754_v11 = vrot.slane %v752_v7, 1  ;;  %v3518_v22 = vld [vmem:[%s4463_s1 + $0x150] sm:$0xff]  ;;  %v3503_v25 = vld [vmem:[%s4463_s1 + $0x100] sm:$0xff]  ;;  %v3488_v38 = vld [vmem:[%s3749_s17 + $0x88] sm:$0xff] }
  0x23   : > { %1000 = vmatpush.bf16.msra.mxu3 %v3492_v24  ;;  %v3531_v23 = vld [vmem:[%s4463_s1 + $0x190] sm:$0xff]  ;;  %v3912_v24 = vld [vmem:[%s4463_s1 + $0x1c8] sm:$0xff]  ;;  %v3921_v26 = vld [vmem:[%s4463_s1 + $0x1c0] sm:$0xff] }
  0x24   : > { %443 = vmatpush.bf16.msra.mxu0 %v3452_v27  ;;  %v755_v17 = vsel %vm727_vm0, %v750_v10, %v754_v11  ;;  %v756_v27 = vshrl.u32 %v3475_v1, 16  ;;  %v3516_v33 = vld [vmem:[%s4463_s1 + $0x140] sm:$0xff]  ;;  %v3463_v51 = vld [vmem:[%s3749_s17 + $0x58] sm:$0xff]  ;;  %v3489_v52 = vld [vmem:[%s3749_s17 + $0x90] sm:$0xff] }
  0x25   : > { %613 = vmatpush.bf16.msra.mxu1 %v3465_v28  ;;  %v760_v28 = vshll.u32 %v3476_v20, 16  ;;  %v3525_v1 = vld [vmem:[%s3749_s17 + $0xc] sm:$0xff]  ;;  %vm4176_vm15 = vmand %vm2179_vm13, %vm2180_vm14 }
  0x26   : > { %831 = vmatpush.bf16.msra.mxu2 %v3478_v29  ;;  %v3517_v29 = vld [vmem:[%s4463_s1 + $0x148] sm:$0xff]  ;;  %v758_v31 = vor.u32 %v756_v27, %v754_v11 }
  0x27   : > { %1001 = vmatpush.bf16.msra.mxu3 %v3491_v30  ;;  %v3530_v30 = vld [vmem:[%s4463_s1 + $0x188] sm:$0xff]  ;;  %v762_v32 = vrot.slane %v760_v28, 1 }
  0x28   : > { %444 = vmatpush.bf16.msra.mxu0 %v3451_v34  ;;  %v3529_v34 = vld [vmem:[%s4463_s1 + $0x180] sm:$0xff]  ;;  %v3498_v11 = vld [vmem:[%s3749_s17 + $0xa8] sm:$0xff] }
  0x29   : > { %614 = vmatpush.bf16.msra.mxu1 %v3464_v35  ;;  %v671_v35 = vld [vmem:[%s3749_s17 + $0x28] sm:$0x1]  ;;  %v763_v39 = vsel %vm727_vm0, %v758_v31, %v762_v32  ;;  %v3570_v31 = vld [vmem:[%s4464_s2 + $0x10] sm:$0xff] }
  0x2a   : > { %832 = vmatpush.bf16.msra.mxu2 %v3477_v36  ;;  %v3449_v36 = vld [vmem:[%s3749_s17 + $0x18] sm:$0xff] }
  0x2b   : > { %1002 = vmatpush.bf16.msra.mxu3 %v3490_v37  ;;  %445 = vmatmul.bf16.vlgmr.msra.gmra.mxu0 %v3446_v42  ;;  %v3462_v37 = vld [vmem:[%s3749_s17 + $0x50] sm:$0xff]  ;;  %v3562_v42 = vld [vmem:[%s4463_s1 + $0x238] sm:$0xff] }
  0x2c   : > { %1165 = vmatpush.bf16.msrb.mxu0 %v3510_v40  ;;  %615 = vmatmul.bf16.vlgmr.msra.gmra.mxu1 %v3459_v43  ;;  %v720_v40 = vunpack.c.l.b16 %v671_v35  ;;  %v3575_v43 = vld [vmem:[%s4464_s2 + $0x38] sm:$0xff] }
  0x2d   : > { %833 = vmatmul.bf16.vlgmr.msra.gmra.mxu2 %v739_v45  ;;  %1382 = vmatpush.bf16.msrb.mxu1 %v3523_v61  ;;  %v3541_v35 = vld [vmem:[%s3749_s17 + $0x5c] sm:$0xff] }
  0x2e   : > { %1003 = vmatmul.bf16.vlgmr.msra.gmra.mxu3 %v3485_v44  ;;  %1567 = vmatpush.bf16.msrb.mxu2 %v3536_v62  ;;  %v726_v44 = vpack.c.b16 %v720_v40, %v720_v40 }
  0x2f   : > { %3605 = vmatpush.bf16.msrb.mxu3 %v3807_v41 }
  0x30   : > { %1166 = vmatpush.bf16.msrb.mxu0 %v3509_v46  ;;  %v768_v45 = vshll.u32 %v726_v44, 16  ;;  %v3568_v44 = vld [vmem:[%s4464_s2] sm:$0xff] }
  0x31   : > { %1383 = vmatpush.bf16.msrb.mxu1 %v3522_v2 }
  0x32   : > { %1568 = vmatpush.bf16.msrb.mxu2 %v3535_v3  ;;  %v770_v48 = vrot.slane %v768_v45, 1  ;;  %v3974_v3 = vld [vmem:[%s3749_s17 + $0x44] sm:$0xff] }
  0x33   : > { %3606 = vmatpush.bf16.msrb.mxu3 %v3820_v47 }
  0x34   : > { %1167 = vmatpush.bf16.msrb.mxu0 %v3508_v49  ;;  %v3450_v49 = vld [vmem:[%s3749_s17 + $0x20] sm:$0xff] }
  0x35   : > { %1384 = vmatpush.bf16.msrb.mxu1 %v3521_v8  ;;  %v1504_v8 = vrot.slane %v3525_v1, 1 }
  0x36   : > { %1569 = vmatpush.bf16.msrb.mxu2 %v3534_v9  ;;  %v1688_v9 = vrot.slane %v3974_v3, 1 }
  0x37   : > { %3607 = vmatpush.bf16.msrb.mxu3 %v3830_v50 }
  0x38   : > { %1168 = vmatpush.bf16.msrb.mxu0 %v3507_v53  ;;  %v3511_v53 = vld [vmem:[%s3749_s17 + $0x70] sm:$0xff] }
  0x39   : > { %1385 = vmatpush.bf16.msrb.mxu1 %v3520_v12  ;;  %v1288_v56 = vshll.u32 %v3511_v53, 16  ;;  %v1286_v61 = vshrl.u32 %v3511_v53, 16 }
  0x3a   : > { %1570 = vmatpush.bf16.msrb.mxu2 %v3533_v13 }
  0x3b   : > { %3608 = vmatpush.bf16.msrb.mxu3 %v3839_v54  ;;  %450 = vmatmul.bf16.gmra.mxu0 %v3447_v57  ;;  %v3161_v57 = vld [vmem:[%s3749_s17 + $0x4] sm:$0xe]  ;;  %v1290_v62 = vrot.slane %v1288_v56, 1 }
  0x3c   : > { %620 = vmatmul.bf16.gmra.mxu1 %v3460_v58  ;;  %1169 = vmatpush.bf16.msrb.mxu0 %v3506_v63  ;;  %v3524_v58 = vld [vmem:[%s3749_s17 + $0x4] sm:$0xf0] }
  0x3d   : > { %838 = vmatmul.bf16.gmra.mxu2 %v747_v60  ;;  %1386 = vmatpush.bf16.msrb.mxu1 %v3519_v18  ;;  %v3560_v60 = vld [vmem:[%s4463_s1 + $0x228] sm:$0xff]  ;;  %v3162_v2 = vor.u32 %v3524_v58, %v3161_v57 }
  0x3e   : > { %1008 = vmatmul.bf16.gmra.mxu3 %v3486_v59  ;;  %1571 = vmatpush.bf16.msrb.mxu2 %v3532_v19  ;;  %v3573_v59 = vld [vmem:[%s4464_s2 + $0x28] sm:$0xff] }
  0x3f   : > { %3609 = vmatpush.bf16.msrb.mxu3 %v3858_v0  ;;  %v1503_v7 = vrot.slane %v3162_v2, 1  ;;  %v3556_v58 = vld [vmem:[%s4463_s1 + $0x208] sm:$0xff] }
  0x40   : > { %1170 = vmatpush.bf16.msrb.mxu0 %v3505_v4  ;;  %v1291_v4 = vor.u32 %v1290_v62, %v1286_v61  ;;  %v3074_v62 = vld [vmem:[%s3749_s17 + $0x98] sm:$0x1] }
  0x41   : > { %1387 = vmatpush.bf16.msrb.mxu1 %v3518_v22  ;;  %v1505_v13 = vsel %vm1502_vm1, %v1503_v7, %v1504_v8 }
  0x42   : > { %1572 = vmatpush.bf16.msrb.mxu2 %v3531_v23 }
  0x43   : > { %3610 = vmatpush.bf16.msrb.mxu3 %v3874_v5 }
  0x44   : > { %1171 = vmatpush.bf16.msrb.mxu0 %v3504_v21  ;;  %v3540_v21 = vld [vmem:[%s3749_s17 + $0x54] sm:$0xff] }
  0x45   : > { %1388 = vmatpush.bf16.msrb.mxu1 %v3517_v29 }
  0x46   : > { %1573 = vmatpush.bf16.msrb.mxu2 %v3530_v30  ;;  %v3514_v30 = vld [vmem:[%s3749_s17 + $0x88] sm:$0xff] }
  0x47   : > { %3611 = vmatpush.bf16.msrb.mxu3 %v3912_v24  ;;  %v1313_v56 = vshrl.u32 %v3514_v30, 16 }
  0x48   : > { %1172 = vmatpush.bf16.msrb.mxu0 %v3503_v25  ;;  %v1692_v25 = vrot.slane %v3540_v21, 1 }
  0x49   : > { %1389 = vmatpush.bf16.msrb.mxu1 %v3516_v33  ;;  %v1309_v33 = vshll.u32 %v3514_v30, 16  ;;  %v2042_v30 = vld [vmem:[%s4465_s3] sm:$0xff] }
  0x4a   : > { %1574 = vmatpush.bf16.msrb.mxu2 %v3529_v34  ;;  %v3527_v34 = vld [vmem:[%s3749_s17 + $0x1c] sm:$0xff]  ;;  %vm2052_vm6 = vcmp.gt.f32.partialorder %v2042_v30, 0.5 }
  0x4b   : > { %455 = vmatmul.bf16.gmra.mxu0 %v3448_v14  ;;  %3612 = vmatpush.bf16.msrb.mxu3 %v3921_v26  ;;  %v3513_v14 = vld [vmem:[%s3749_s17 + $0x80] sm:$0xff]  ;;  %v1508_v40 = vrot.slane %v3527_v34, 1  ;;  %v3550_v34 = vld [vmem:[%s3749_s17 + $0x4] sm:$0xf0] }
  0x4c   : > { %625 = vmatmul.bf16.gmra.mxu1 %v3461_v15  ;;  %1978 = vmatpush.bf16.msra.mxu0 %v3562_v42  ;;  %v3572_v15 = vld [vmem:[%s4464_s2 + $0x20] sm:$0xff]  ;;  %v1301_v19 = vshll.u32 %v3513_v14, 16 }
  0x4d   : > { %843 = vmatmul.bf16.gmra.mxu2 %v755_v17  ;;  %3613 = vmatpush.bf16.msra.mxu1 %v3562_v42  ;;  %v3571_v17 = vld [vmem:[%s4464_s2 + $0x18] sm:$0xff]  ;;  %v1694_v42 = vrot.slane %v3541_v35, 1 }
  0x4e   : > { %1013 = vmatmul.bf16.gmra.mxu3 %v3487_v16  ;;  %1751 = vmatpush.bf16.msra.mxu2 %v3807_v41  ;;  %v764_v41 = vshrl.u32 %v3476_v20, 16  ;;  %v3559_v16 = vld [vmem:[%s4463_s1 + $0x220] sm:$0xff]  ;;  %v3526_v20 = vld [vmem:[%s3749_s17 + $0x14] sm:$0xff]  ;;  %v1303_v23 = vrot.slane %v1301_v19, 1 }
  0x4f   : > { %2434 = vmatpush.bf16.msra.mxu3 %v3575_v43  ;;  %v3500_v43 = vld [vmem:[%s3749_s17 + $0xb8] sm:$0xff] }
  0x50   : > { %v766_v46 = vor.u32 %v764_v41, %v762_v32  ;;  %v1305_v32 = vshrl.u32 %v3513_v14, 16 }
  0x52   : > { %1752 = vmatpush.bf16.msra.mxu2 %v3820_v47  ;;  %v771_v55 = vsel %vm727_vm0, %v766_v46, %v770_v48  ;;  %v3512_v47 = vld [vmem:[%s3749_s17 + $0x78] sm:$0xff]  ;;  %v1695_v46 = vsel %vm1502_vm1, %v1692_v25, %v1694_v42  ;;  %v3221_v48 = vld [vmem:[%s3749_s17 + $0x64] sm:$0x1] }
  0x53   : > { %v1293_v63 = vshll.u32 %v3512_v47, 16  ;;  %v1297_v18 = vshrl.u32 %v3512_v47, 16  ;;  %v1680_v53 = vunpack.c.l.b16 %v3221_v48 }
  0x55   : > { %v1295_v6 = vrot.slane %v1293_v63, 1  ;;  %v1686_v57 = vpack.c.b16 %v1680_v53, %v1680_v53 }
  0x56   : > { %1753 = vmatpush.bf16.msra.mxu2 %v3830_v50  ;;  %v3574_v50 = vld [vmem:[%s4464_s2 + $0x30] sm:$0xff] }
  0x57   : > { %2435 = vmatpush.bf16.msra.mxu3 %v3574_v50  ;;  %v1296_v12 = vsel %vm727_vm0, %v1291_v4, %v1295_v6  ;;  %v1299_v22 = vor.u32 %v1297_v18, %v1295_v6  ;;  %v1696_v2 = vrot.slane %v1686_v57, 1  ;;  %v1278_v4 = vunpack.c.l.b16 %v3074_v62  ;;  %v3555_v6 = vld [vmem:[%s4463_s1 + $0x200] sm:$0xff] }
  0x59   : > { %v1304_v27 = vsel %vm727_vm0, %v1299_v22, %v1303_v23  ;;  %v1284_v14 = vpack.c.b16 %v1278_v4, %v1278_v4 }
  0x5a   : > { %1754 = vmatpush.bf16.msra.mxu2 %v3839_v54  ;;  %v3561_v54 = vld [vmem:[%s4463_s1 + $0x230] sm:$0xff] }
  0x5b   : > { %460 = vmatmul.bf16.gmra.mxu0 %v3449_v36  ;;  %3614 = vmatpush.bf16.msra.mxu1 %v3561_v54  ;;  %v3558_v36 = vld [vmem:[%s4463_s1 + $0x218] sm:$0xff] }
  0x5c   : > { %630 = vmatmul.bf16.gmra.mxu1 %v3462_v37  ;;  %1979 = vmatpush.bf16.msra.mxu0 %v3561_v54  ;;  %v3569_v37 = vld [vmem:[%s4464_s2 + $0x8] sm:$0xff] }
  0x5d   : > { %848 = vmatmul.bf16.gmra.mxu2 %v763_v39  ;;  %2436 = vmatpush.bf16.msra.mxu3 %v3573_v59  ;;  %v1311_v39 = vrot.slane %v1309_v33, 1  ;;  %v4038_v54 = vld [vmem:[%s3749_s17 + $0x24] sm:$0xff] }
  0x5e   : > { %1018 = vmatmul.bf16.gmra.mxu3 %v3488_v38  ;;  %1755 = vmatpush.bf16.msra.mxu2 %v3858_v0  ;;  %v3539_v0 = vld [vmem:[%s3749_s17 + $0x4c] sm:$0xff]  ;;  %v1307_v38 = vor.u32 %v1305_v32, %v1303_v23  ;;  %v2050_v59 = vld [vmem:[%s4465_s3 + $0x40] sm:$0xff]  ;;  %v1510_v1 = vrot.slane %v4038_v54, 1 }
  0x5f   : > { %3615 = vmatpush.bf16.msra.mxu1 %v3560_v60  ;;  %v1690_v10 = vrot.slane %v3539_v0, 1  ;;  %vm2060_vm3 = vcmp.gt.f32.partialorder %v2050_v59, 0.5  ;;  %v3501_v0 = vld [vmem:[%s3749_s17 + $0xc0] sm:$0xff]  ;;  %v2048_v54 = vld [vmem:[%s4465_s3 + $0x30] sm:$0xff] }
  0x60   : > { %1980 = vmatpush.bf16.msra.mxu0 %v3560_v60  ;;  %v1312_v41 = vsel %vm727_vm0, %v1307_v38, %v1311_v39  ;;  %v1315_v60 = vor.u32 %v1313_v56, %v1311_v39  ;;  %v3308_v33 = vld [vmem:[%s3749_s17 + $0x4] sm:$0xe]  ;;  %v3551_v39 = vld [vmem:[%s3749_s17 + $0xc] sm:$0xff]  ;;  %vm2058_vm7 = vcmp.gt.f32.partialorder %v2048_v54, 0.5 }
  0x61   : > { %2437 = vmatpush.bf16.msra.mxu3 %v3572_v15  ;;  %v1693_v29 = vsel %vm1502_vm1, %v1690_v10, %v1692_v25  ;;  %v2045_v15 = vld [vmem:[%s4465_s3 + $0x18] sm:$0xff]  ;;  %v1884_v59 = vshll.u32 %v3551_v39, 16 }
  0x62   : > { %1756 = vmatpush.bf16.msra.mxu2 %v3874_v5  ;;  %v1691_v5 = vsel %vm1502_vm1, %v1688_v9, %v1690_v10  ;;  %vm2055_vm4 = vcmp.gt.f32.partialorder %v2045_v15, 0.5 }
  0x63   : > { %3616 = vmatpush.bf16.msra.mxu1 %v3559_v16 }
  0x64   : > { %1981 = vmatpush.bf16.msra.mxu0 %v3559_v16 }
  0x65   : > { %2438 = vmatpush.bf16.msra.mxu3 %v3571_v17 }
  0x66   : > { %1757 = vmatpush.bf16.msra.mxu2 %v3912_v24  ;;  %v1506_v24 = vrot.slane %v3526_v20, 1  ;;  %v1325_v20 = vshll.u32 %v1284_v14, 16 }
  0x67   : > { %3617 = vmatpush.bf16.msra.mxu1 %v3558_v36 }
  0x68   : > { %v1507_v28 = vsel %vm1502_vm1, %v1504_v8, %v1506_v24  ;;  %1982 = vmatpush.bf16.msra.mxu0 %v3558_v36  ;;  %v1509_v45 = vsel %vm1502_vm1, %v1506_v24, %v1508_v40 }
  0x69   : > { %2439 = vmatpush.bf16.msra.mxu3 %v3570_v31  ;;  %v1327_v31 = vrot.slane %v1325_v20, 1 }
  0x6a   : > { %1758 = vmatpush.bf16.msra.mxu2 %v3921_v26  ;;  %v3499_v26 = vld [vmem:[%s3749_s17 + $0xb0] sm:$0xff] }
  0x6b   : > { %465 = vmatmul.bf16.gmra.mxu0 %v3450_v49  ;;  %v3557_v49 = vld [vmem:[%s4463_s1 + $0x210] sm:$0xff] }
  0x6c   : > { %635 = vmatmul.bf16.gmra.mxu1 %v3463_v51  ;;  %v4027_v51 = vld [vmem:[%s3749_s17 + $0x90] sm:$0xff]  ;;  %1983 = vmatpush.bf16.msra.mxu0 %v3557_v49 }
  0x6d   : > { %853 = vmatmul.bf16.gmra.mxu2 %v771_v55  ;;  %2440 = vmatpush.bf16.msra.mxu3 %v3569_v37  ;;  %v3645_v55 = vmov 0   ;;  %v1317_v50 = vshll.u32 %v4027_v51, 16  ;;  %v1321_v24 = vshrl.u32 %v4027_v51, 16  ;;  %v3563_v51 = vld [vmem:[%s3749_s17 + $0xa8] sm:$0xff] }
  0x6e   : > { %1023 = vmatmul.bf16.gmra.mxu3 %v3489_v52  ;;  %v2051_v52 = vld [vmem:[%s4465_s3 + $0x48] sm:$0xff]  ;;  %3634 = vset.pattern.permute.xlu0 %v3645_v55  ;;  %v2070_v63 = vsel %vm2060_vm3, 1, %v3645_v55  ;;  %v2065_v17 = vsel %vm2055_vm4, 1, %v3645_v55  ;;  %v2062_v37 = vsel %vm2052_vm6, 1, %v3645_v55  ;;  %2178 = vst [vmem:[%s4127_s8] sm:$0xf] %v3645_v55 }
  0x6f   : > { %vm2061_vm2 = vcmp.gt.f32.partialorder %v2051_v52, 0.5  ;;  %3618 = vmatpush.bf16.msra.mxu1 %v3557_v49  ;;  %3635 = vset.pattern.permute.xlu1 %v3645_v55  ;;  %v1319_v61 = vrot.slane %v1317_v50, 1  ;;  %v1881_v50 = vshrl.u32 %v3551_v39, 16  ;;  %2328 = vst [vmem:[%s4127_s8 + $0x30] sm:$0xf] %v3645_v55 }
  0x70   : > { %v2071_v47 = vsel %vm2061_vm2, 1, %v3645_v55  ;;  %3636 = vset.pattern.permute.xlu2 %v3645_v55  ;;  %1984 = vmatpush.bf16.msra.mxu0 %v3556_v58  ;;  %2329 = vst [vmem:[%s4127_s8 + $0x34] sm:$0x7] %v3645_v55  ;;  %vm2307_vm2 = vcmask 1043457   ;;  %vm2195_vm3 = vsmask.f32 5392 }
  0x71   : > { %2441 = vmatpush.bf16.msra.mxu3 %v3568_v44  ;;  %2100 = vperm.xlu0 %3634, %v2071_v47   ;;  %v1320_v10 = vsel %vm727_vm0, %v1315_v60, %v1319_v61  ;;  %v1323_v32 = vor.u32 %v1321_v24, %v1319_v61  ;;  %v3309_v44 = vor.u32 %v3550_v34, %v3308_v33  ;;  %v1883_v4 = vrot.slane %v1881_v50, 1  ;;  %v2044_v24 = vld [vmem:[%s4465_s3 + $0x10] sm:$0xff] }
  0x72   : > { %vm2054_vm10 = vcmp.gt.f32.partialorder %v2044_v24, 0.5  ;;  %vm2308_vm4 = vsmask.f32 7942 }
  0x73   : > { %3619 = vmatpush.bf16.msra.mxu1 %v3556_v58  ;;  %v1328_v49 = vsel %vm727_vm0, %v1323_v32, %v1327_v31  ;;  %v1873_v57 = vshrl.u32 %v3309_v44, 16  ;;  %v1876_v58 = vshll.u32 %v3309_v44, 16  ;;  %v2064_v31 = vsel %vm2054_vm10, 1, %v3645_v55  ;;  %vm4237_vm6 = vmand %vm2307_vm2, %vm2308_vm4 }
  0x74   : > { %1985 = vmatpush.bf16.msra.mxu0 %v3555_v6 }
  0x77   : > { %3620 = vmatpush.bf16.msra.mxu1 %v3555_v6  ;;  %v2068_v6 = vsel %vm2058_vm7, 1, %v3645_v55 }
  0x79   : > { %2097 = vperm.xlu0 %3634, %v2070_v63  }
  0x7b   : > { %1173 = vmatmul.bf16.vlgmr.msrb.gmra.mxu0 %v3498_v11 }
  0x7c   : > { %1390 = vmatmul.bf16.vlgmr.msrb.gmra.mxu1 %v1296_v12  ;;  %v1511_v12 = vsel %vm1502_vm1, %v1508_v40, %v1510_v1 }
  0x7d   : > { %1575 = vmatmul.bf16.vlgmr.msrb.gmra.mxu2 %v1505_v13  ;;  %v1697_v13 = vsel %vm1502_vm1, %v1694_v42, %v1696_v2  ;;  %v3240_v2 = vld [vmem:[%s3749_s17 + $0x3c] sm:$0xe] }
  0x7e   : > { %1764 = vmatmul.bf16.vlgmr.msrb.gmra.mxu3 %v1691_v5  ;;  %v1446_v5 = vld [vmem:[%s3749_s17 + $0x2c] sm:$0x1] }
  0x7f   : > { %v1495_v16 = vunpack.c.l.b16 %v1446_v5 }
  0x81   : > { %2082 = vperm.xlu0 %3634, %v2065_v17  }
  0x89   : > { %2073 = vperm.xlu0 %3634, %v2062_v37  }
  0x8b   : > { %1178 = vmatmul.bf16.gmra.mxu0 %v3499_v26  ;;  %v1501_v26 = vpack.c.b16 %v1495_v16, %v1495_v16 }
  0x8c   : > { %1395 = vmatmul.bf16.gmra.mxu1 %v1304_v27  ;;  %v1815_v27 = vld [vmem:[%s3749_s17 + $0x2c] sm:$0x3] }
  0x8d   : > { %1580 = vmatmul.bf16.gmra.mxu2 %v1507_v28  ;;  %v1864_v35 = vunpack.c.l.b16 %v1815_v27  ;;  %v1512_v38 = vrot.slane %v1501_v26, 1 }
  0x8e   : > { %1769 = vmatmul.bf16.gmra.mxu3 %v1693_v29  ;;  %v2049_v29 = vld [vmem:[%s4465_s3 + $0x38] sm:$0xff] }
  0x8f   : > { %vm2059_vm5 = vcmp.gt.f32.partialorder %v2049_v29, 0.5  ;;  %v1870_v52 = vpack.c.b16 %v1864_v35, %v1864_v35  ;;  %v1513_v47 = vsel %vm1502_vm1, %v1510_v1, %v1512_v38  ;;  %v2047_v1 = vld [vmem:[%s4465_s3 + $0x28] sm:$0xff] }
  0x90   : > { %v2069_v36 = vsel %vm2059_vm5, 1, %v3645_v55  ;;  %vm2057_vm8 = vcmp.gt.f32.partialorder %v2047_v1, 0.5  ;;  %vm4230_vm5 = vmor %vm2180_vm14, %vm2195_vm3 }
  0x91   : > { %2094 = vperm.xlu1 %3635, %v2069_v36   ;;  %v1917_v62 = vshrl.u32 %v1870_v52, 16  ;;  %v1920_v63 = vshll.u32 %v1870_v52, 16 }
  0x99   : > { %2091 = vperm.xlu1 %3635, %v2068_v6  }
  0x9b   : > { %1183 = vmatmul.bf16.gmra.mxu0 %v3500_v43  ;;  %v3502_v43 = vld [vmem:[%s3749_s17 + $0xc8] sm:$0xff] }
  0x9c   : > { %1400 = vmatmul.bf16.gmra.mxu1 %v1312_v41  ;;  %v3554_v41 = vld [vmem:[%s3749_s17 + $0x24] sm:$0xff] }
  0x9d   : > { %1585 = vmatmul.bf16.gmra.mxu2 %v1509_v45  ;;  %v1908_v60 = vshrl.u32 %v3554_v41, 16  ;;  %v1911_v61 = vshll.u32 %v3554_v41, 16 }
  0x9e   : > { %1774 = vmatmul.bf16.gmra.mxu3 %v1695_v46 }
  0x9f   : > { %v1910_v5 = vrot.slane %v1908_v60, 1  ;;  %v1913_v17 = vrot.slane %v1911_v61, 2 }
  0xa1   : > { %v4105_v27 = vor.u32 %v1913_v17, %v1910_v5  ;;  %2079 = vperm.xlu1 %3635, %v2064_v31  }
  0xa8   : > { %v446_v7 = vpop.f32.mrf.mxu0 }
  0xa9   : > { %v616_v8 = vpop.f32.mrf.mxu1 }
  0xaa   : > { %v641_v11 = vadd.f32 %v616_v8, %v446_v7  ;;  %v2067_v7 = vsel %vm2057_vm8, 1, %v3645_v55 }
  0xab   : > { %1188 = vmatmul.bf16.gmra.mxu0 %v3501_v0  ;;  %v3537_v0 = vld [vmem:[%s3749_s17 + $0x3c] sm:$0xf0]  ;;  %2088 = vperm.xlu2 %3636, %v2067_v7  }
  0xac   : > { %1405 = vmatmul.bf16.gmra.mxu1 %v1320_v10 }
  0xad   : > { %1590 = vmatmul.bf16.gmra.mxu2 %v1511_v12  ;;  %v1878_v12 = vrot.slane %v1876_v58, 2 }
  0xae   : > { %1779 = vmatmul.bf16.gmra.mxu3 %v1697_v13  ;;  %v1886_v13 = vrot.slane %v1884_v59, 2 }
  0xb0   : > { %v834_v18 = vpop.f32.mrf.mxu2  ;;  %v448_v22 = vpop.f32.mrf.mxu0  ;;  %v1887_v26 = vor.u32 %v1886_v13, %v1883_v4 }
  0xb1   : > { %v1004_v19 = vpop.f32.mrf.mxu3  ;;  %v859_v21 = vadd.f32 %v834_v18, %v641_v11  ;;  %v618_v23 = vpop.f32.mrf.mxu1  ;;  %v1875_v11 = vrot.slane %v1873_v57, 1  ;;  %v1919_v18 = vrot.slane %v1917_v62, 1 }
  0xb2   : > { %v642_v25 = vadd.f32 %v618_v23, %v448_v22  ;;  %v2046_v23 = vld [vmem:[%s4465_s3 + $0x20] sm:$0xff] }
  0xb3   : > { %v4065_v28 = vadd.f32 %v1004_v19, %v859_v21  ;;  %v1922_v19 = vrot.slane %v1920_v63, 2  ;;  %v3241_v21 = vor.u32 %v3537_v0, %v3240_v2  ;;  %vm2056_vm9 = vcmp.gt.f32.partialorder %v2046_v23, 0.5  ;;  %v3565_v2 = vld [vmem:[%s3749_s17 + $0xb8] sm:$0xff] }
  0xb4   : > { %v2066_v30 = vsel %vm2056_vm9, 1, %v3645_v55  ;;  %v3553_v0 = vld [vmem:[%s3749_s17 + $0x1c] sm:$0xff] }
  0xb5   : > { %v1923_v29 = vor.u32 %v1922_v19, %v1919_v18  ;;  %v1687_v32 = vrot.slane %v3241_v21, 1  ;;  %2085 = vperm.xlu2 %3636, %v2066_v30   ;;  %v1899_v7 = vshrl.u32 %v3553_v0, 16 }
  0xb7   : > { %v1924_v39 = vsel %vm1871_vm11, %v4105_v27, %v1923_v29  ;;  %v1689_v44 = vsel %vm1502_vm1, %v1687_v32, %v1688_v9  ;;  %v1901_v5 = vrot.slane %v1899_v7, 1 }
  0xb8   : > { %v836_v40 = vpop.f32.mrf.mxu2  ;;  %v451_v46 = vpop.f32.mrf.mxu0 }
  0xb9   : > { %v1006_v42 = vpop.f32.mrf.mxu3  ;;  %v860_v45 = vadd.f32 %v836_v40, %v642_v25  ;;  %v621_v48 = vpop.f32.mrf.mxu1  ;;  %v1879_v25 = vor.u32 %v1878_v12, %v1875_v11  ;;  %v3564_v40 = vld [vmem:[%s3749_s17 + $0xb0] sm:$0xff] }
  0xba   : > { %v643_v53 = vadd.f32 %v621_v48, %v451_v46  ;;  %v2043_v48 = vld [vmem:[%s4465_s3 + $0x8] sm:$0xff] }
  0xbb   : > { %v4085_v56 = vadd.f32 %v1006_v42, %v860_v45  ;;  %1193 = vmatmul.bf16.gmra.mxu0 %v3502_v43  ;;  %v1888_v38 = vsel %vm1871_vm11, %v1879_v25, %v1887_v26  ;;  %v3552_v42 = vld [vmem:[%s3749_s17 + $0x14] sm:$0xff]  ;;  %vm2053_vm12 = vcmp.gt.f32.partialorder %v2043_v48, 0.5  ;;  %v3566_v25 = vld [vmem:[%s3749_s17 + $0xc0] sm:$0xff] }
  0xbc   : > { %1410 = vmatmul.bf16.gmra.mxu1 %v1328_v49  ;;  %v1890_v45 = vshrl.u32 %v3552_v42, 16  ;;  %v1893_v46 = vshll.u32 %v3552_v42, 16  ;;  %v2063_v49 = vsel %vm2053_vm12, 1, %v3645_v55 }
  0xbd   : > { %1595 = vmatmul.bf16.gmra.mxu2 %v1513_v47  ;;  %2076 = vperm.xlu2 %3636, %v2063_v49  }
  0xbe   : > { %2442 = vmatmul.bf16.vlgmr.msra.gmra.mxu3 %v3563_v51  ;;  %v1892_v47 = vrot.slane %v1890_v45, 1  ;;  %v1895_v50 = vrot.slane %v1893_v46, 2 }
  0xc0   : > { %v839_v8 = vpop.f32.mrf.mxu2  ;;  %v453_v15 = vpop.f32.mrf.mxu0  ;;  %v1896_v59 = vor.u32 %v1895_v50, %v1892_v47 }
  0xc1   : > { %v1009_v10 = vpop.f32.mrf.mxu3  ;;  %v861_v14 = vadd.f32 %v839_v8, %v643_v53  ;;  %v623_v16 = vpop.f32.mrf.mxu1  ;;  %v1902_v8 = vshll.u32 %v3553_v0, 16 }
  0xc2   : > { %v644_v20 = vadd.f32 %v623_v16, %v453_v15  ;;  %v1897_v1 = vsel %vm1871_vm11, %v1887_v26, %v1896_v59 }
  0xc3   : > { %v4097_v22 = vadd.f32 %v1009_v10, %v861_v14  ;;  %v1904_v14 = vrot.slane %v1902_v8, 2 }
  0xc5   : > { %v1905_v17 = vor.u32 %v1904_v14, %v1901_v5 }
  0xc7   : > { %v1906_v24 = vsel %vm1871_vm11, %v1896_v59, %v1905_v17 }
  0xc8   : > { %v841_v33 = vpop.f32.mrf.mxu2  ;;  %v456_v36 = vpop.f32.mrf.mxu0 }
  0xc9   : > { %v1011_v34 = vpop.f32.mrf.mxu3  ;;  %v862_v35 = vadd.f32 %v841_v33, %v644_v20  ;;  %v626_v37 = vpop.f32.mrf.mxu1 }
  0xca   : > { %v645_v43 = vadd.f32 %v626_v37, %v456_v36 }
  0xcb   : > { %v4117_v41 = vadd.f32 %v1011_v34, %v862_v35  ;;  %1986 = vmatmul.bf16.vlgmr.msra.gmra.mxu0 %v1888_v38 }
  0xcc   : > { %2006 = vmatmul.bf16.vlgmr.msra.gmra.mxu1 %v1924_v39 }
  0xcd   : > { %1759 = vmatmul.bf16.vlgmr.msra.gmra.mxu2 %v1689_v44  ;;  %v3567_v44 = vld [vmem:[%s3749_s17 + $0xc8] sm:$0xff]  ;;  %s3623_s17 = smul.u32 40, %s4477_s25 }
  0xce   : > { %2447 = vmatmul.bf16.gmra.mxu3 %v3564_v40 }
  0xcf   : > { %s4198_s11 = scalar_lea.vmem %s4467_s5, %s3623_s17 }
  0xd0   : > { %v844_v51 = vpop.f32.mrf.mxu2  ;;  %v458_v9 = vpop.f32.mrf.mxu0 }
  0xd1   : > { %v1014_v52 = vpop.f32.mrf.mxu3  ;;  %v863_v3 = vadd.f32 %v844_v51, %v645_v43  ;;  %v628_v53 = vpop.f32.mrf.mxu1  ;;  %v1915_v43 = vsel %vm1871_vm11, %v1905_v17, %v4105_v27 }
  0xd2   : > { %v646_v57 = vadd.f32 %v628_v53, %v458_v9 }
  0xd3   : > { %v4129_v58 = vadd.f32 %v1014_v52, %v863_v3 }
  0xd8   : > { %v846_v60 = vpop.f32.mrf.mxu2  ;;  %v461_v63 = vpop.f32.mrf.mxu0 }
  0xd9   : > { %v1016_v61 = vpop.f32.mrf.mxu3  ;;  %v864_v62 = vadd.f32 %v846_v60, %v646_v57  ;;  %v631_v54 = vpop.f32.mrf.mxu1 }
  0xda   : > { %v647_v4 = vadd.f32 %v631_v54, %v461_v63 }
  0xdb   : > { %v4140_v6 = vadd.f32 %v1016_v61, %v864_v62  ;;  %1991 = vmatmul.bf16.gmra.mxu0 %v1897_v1 }
  0xde   : > { %2452 = vmatmul.bf16.gmra.mxu3 %v3565_v2 }
  0xe0   : > { %v849_v10 = vpop.f32.mrf.mxu2  ;;  %v463_v12 = vpop.f32.mrf.mxu0 }
  0xe1   : > { %v1019_v11 = vpop.f32.mrf.mxu3  ;;  %v865_v55 = vadd.f32 %v849_v10, %v647_v4  ;;  %v633_v13 = vpop.f32.mrf.mxu1 }
  0xe2   : > { %v648_v15 = vadd.f32 %v633_v13, %v463_v12 }
  0xe3   : > { %v4142_v16 = vadd.f32 %v1019_v11, %v865_v55 }
  0xe8   : > { %v851_v18 = vpop.f32.mrf.mxu2  ;;  %v466_v21 = vpop.f32.mrf.mxu0 }
  0xe9   : > { %v1021_v19 = vpop.f32.mrf.mxu3  ;;  %v866_v20 = vadd.f32 %v851_v18, %v648_v15  ;;  %v636_v23 = vpop.f32.mrf.mxu1 }
  0xea   : > { %v649_v26 = vadd.f32 %v636_v23, %v466_v21 }
  0xeb   : > { %v4146_v29 = vadd.f32 %v1021_v19, %v866_v20  ;;  %1996 = vmatmul.bf16.gmra.mxu0 %v1906_v24 }
  0xee   : > { %2457 = vmatmul.bf16.gmra.mxu3 %v3566_v25 }
  0xf0   : > { %v854_v30 = vpop.f32.mrf.mxu2  ;;  %v468_v33 = vpop.f32.mrf.mxu0 }
  0xf1   : > { %v1024_v31 = vpop.f32.mrf.mxu3  ;;  %v867_v32 = vadd.f32 %v854_v30, %v649_v26  ;;  %v638_v34 = vpop.f32.mrf.mxu1 }
  0xf2   : > { %v650_v35 = vadd.f32 %v638_v34, %v468_v33 }
  0xf3   : > { %v4148_v36 = vadd.f32 %v1024_v31, %v867_v32 }
  0xf8   : > { %v856_v37 = vpop.f32.mrf.mxu2  ;;  %v1174_v40 = vpop.f32.mrf.mxu0 }
  0xf9   : > { %v1026_v38 = vpop.f32.mrf.mxu3  ;;  %v868_v39 = vadd.f32 %v856_v37, %v650_v35  ;;  %v1391_v42 = vpop.f32.mrf.mxu1  ;;  %v1199_v45 = vadd.f32 %v1174_v40, %v4065_v28 }
  0xfb   : > { %v4154_v46 = vadd.f32 %v1026_v38, %v868_v39  ;;  %v1416_v48 = vadd.f32 %v1391_v42, %v1199_v45  ;;  %2001 = vmatmul.bf16.gmra.mxu0 %v1915_v43  ;;  %v2182_v39 = vld [vmem:[%s4127_s8 + $0x4] sm:$0x3] }
  0xfc   : > { %v2183_v42 = vsel %vm4176_vm15, 0, %v2182_v39 }
  0xfd   : > { %2184 = vst [vmem:[%s4127_s8 + $0x4] sm:$0x3] %v2183_v42 }
  0xfe   : > { %2462 = vmatmul.bf16.gmra.mxu3 %v3567_v44 }
 0x100   : > { %v1576_v49 = vpop.f32.mrf.mxu2  ;;  %v1176_v3 = vpop.f32.mrf.mxu0 }
 0x101   : > { %v1765_v51 = vpop.f32.mrf.mxu3  ;;  %v4156_v52 = vadd.f32 %v1576_v49, %v1416_v48  ;;  %v1393_v9 = vpop.f32.mrf.mxu1  ;;  %v1200_v53 = vadd.f32 %v1176_v3, %v4085_v56 }
 0x103   : > { %v1417_v47 = vadd.f32 %v1393_v9, %v1200_v53 }
 0x108   : > { %v1578_v50 = vpop.f32.mrf.mxu2  ;;  %v1179_v59 = vpop.f32.mrf.mxu0 }
 0x109   : > { %v1767_v57 = vpop.f32.mrf.mxu3  ;;  %v4159_v27 = vadd.f32 %v1578_v50, %v1417_v47  ;;  %v1396_v28 = vpop.f32.mrf.mxu1  ;;  %v1201_v60 = vadd.f32 %v1179_v59, %v4097_v22 }
 0x10a   : > { %v4192_v59 = vpop.permute.xlu0 %2100 }
 0x10b   : > { %v1418_v61 = vadd.f32 %v1396_v28, %v1201_v60  ;;  %vm2111_vm0 = vcmp.eq.s32.totalorder %v4192_v59, 1 }
 0x110   : > { %v1581_v62 = vpop.f32.mrf.mxu2  ;;  %v1181_v1 = vpop.f32.mrf.mxu0 }
 0x111   : > { %v1770_v63 = vpop.f32.mrf.mxu3  ;;  %v1603_v54 = vadd.f32 %v1581_v62, %v1418_v61  ;;  %v1398_v2 = vpop.f32.mrf.mxu1  ;;  %v1202_v0 = vadd.f32 %v1181_v1, %v4117_v41 }
 0x113   : > { %v4163_v4 = vadd.f32 %v1765_v51, %v1603_v54  ;;  %v1419_v56 = vadd.f32 %v1398_v2, %v1202_v0 }
 0x118   : > { %v1583_v7 = vpop.f32.mrf.mxu2  ;;  %v1184_v11 = vpop.f32.mrf.mxu0 }
 0x119   : > { %v1772_v8 = vpop.f32.mrf.mxu3  ;;  %v1604_v10 = vadd.f32 %v1583_v7, %v1419_v56  ;;  %v1401_v55 = vpop.f32.mrf.mxu1  ;;  %v1203_v12 = vadd.f32 %v1184_v11, %v4129_v58 }
 0x11b   : > { %v4166_v13 = vadd.f32 %v1767_v57, %v1604_v10  ;;  %v1420_v22 = vadd.f32 %v1401_v55, %v1203_v12 }
 0x120   : > { %v1586_v5 = vpop.f32.mrf.mxu2  ;;  %v1186_v17 = vpop.f32.mrf.mxu0 }
 0x121   : > { %v1775_v14 = vpop.f32.mrf.mxu3  ;;  %v1605_v15 = vadd.f32 %v1586_v5, %v1420_v22  ;;  %v1403_v18 = vpop.f32.mrf.mxu1  ;;  %v1204_v41 = vadd.f32 %v1186_v17, %v4140_v6 }
 0x123   : > { %v4169_v19 = vadd.f32 %v1770_v63, %v1605_v15  ;;  %v1421_v20 = vadd.f32 %v1403_v18, %v1204_v41 }
 0x128   : > { %v1588_v21 = vpop.f32.mrf.mxu2  ;;  %v1189_v25 = vpop.f32.mrf.mxu0 }
 0x129   : > { %v1777_v23 = vpop.f32.mrf.mxu3  ;;  %v1606_v24 = vadd.f32 %v1588_v21, %v1421_v20  ;;  %v1406_v26 = vpop.f32.mrf.mxu1  ;;  %v1205_v58 = vadd.f32 %v1189_v25, %v4142_v16 }
 0x12b   : > { %v4172_v30 = vadd.f32 %v1772_v8, %v1606_v24  ;;  %v1422_v31 = vadd.f32 %v1406_v26, %v1205_v58  ;;  %v4205_v8 = vpop.permute.xlu0 %2097 }
 0x12c   : > { %vm2110_vm1 = vcmp.eq.s32.totalorder %v4205_v8, 1 }
 0x130   : > { %v1591_v32 = vpop.f32.mrf.mxu2  ;;  %v1191_v35 = vpop.f32.mrf.mxu0 }
 0x131   : > { %v1780_v33 = vpop.f32.mrf.mxu3  ;;  %v1607_v34 = vadd.f32 %v1591_v32, %v1422_v31  ;;  %v1408_v6 = vpop.f32.mrf.mxu1  ;;  %v1206_v37 = vadd.f32 %v1191_v35, %v4146_v29 }
 0x133   : > { %v4181_v16 = vadd.f32 %v1775_v14, %v1607_v34  ;;  %v1423_v40 = vadd.f32 %v1408_v6, %v1206_v37 }
 0x138   : > { %v1593_v43 = vpop.f32.mrf.mxu2  ;;  %v1194_v29 = vpop.f32.mrf.mxu0 }
 0x139   : > { %v1782_v44 = vpop.f32.mrf.mxu3  ;;  %v1608_v45 = vadd.f32 %v1593_v43, %v1423_v40  ;;  %v1411_v48 = vpop.f32.mrf.mxu1  ;;  %v1207_v51 = vadd.f32 %v1194_v29, %v4148_v36  ;;  %v2310_v29 = vld [vmem:[%s4127_s8 + $0x4] sm:$0xe] }
 0x13b   : > { %v4186_v49 = vadd.f32 %v1777_v23, %v1608_v45  ;;  %v1424_v50 = vadd.f32 %v1411_v48, %v1207_v51 }
 0x140   : > { %v1596_v3 = vpop.f32.mrf.mxu2  ;;  %v1196_v53 = vpop.f32.mrf.mxu0 }
 0x141   : > { %v4189_v9 = vpop.f32.mrf.mxu3  ;;  %v1413_v47 = vpop.f32.mrf.mxu1  ;;  %v1609_v57 = vadd.f32 %v1596_v3, %v1424_v50  ;;  %v1208_v28 = vadd.f32 %v1196_v53, %v4154_v46  ;;  %v2322_v53 = vld [vmem:[%s4127_s8 + $0x2c] sm:$0x3] }
 0x143   : > { %v1793_v61 = vadd.f32 %v1780_v33, %v1609_v57  ;;  %v1425_v1 = vadd.f32 %v1413_v47, %v1208_v28 }
 0x148   : > { %v1598_v60 = vpop.f32.mrf.mxu2  ;;  %v1987_v63 = vpop.f32.mrf.mxu0 }
 0x149   : > { %v4200_v36 = vpop.f32.mrf.mxu3  ;;  %v2007_v54 = vpop.f32.mrf.mxu1  ;;  %v1610_v0 = vadd.f32 %v1598_v60, %v1425_v1 }
 0x14a   : > { %v3579_v62 = vpack.c.bf16 %v4200_v36, %v4189_v9  ;;  %v2020_v2 = vadd.f32 %v2007_v54, %v1793_v61 }
 0x14b   : > { %v1794_v55 = vadd.f32 %v1782_v44, %v1610_v0 }
 0x14c   : > { %3580 = vst [vmem:[%s4198_s11] sm:$0xff] %v3579_v62   ;;  %v2193_v46 = vpack.c.bf16 %v2020_v2, %v2020_v2  ;;  %v2120_v21 = vsel %vm2110_vm1, %v2020_v2, 0.0 }
 0x14d   : > { %v2155_v32 = vmul.f32 %v2120_v21, %v2120_v21 }
 0x14e   : > { %v2277_v56 = vshrl.u32 %v2193_v46, 16  ;;  %v2280_v7 = vshll.u32 %v2193_v46, 16 }
 0x150   : > { %v1760_v10 = vpop.f32.mrf.mxu2  ;;  %v1989_v22 = vpop.f32.mrf.mxu0  ;;  %v2279_v14 = vrot.slane %v2277_v56, 6  ;;  %v2282_v15 = vrot.slane %v2280_v7, 7 }
 0x151   : > { %v4207_v11 = vpop.f32.mrf.mxu3  ;;  %v1785_v12 = vadd.f32 %v1760_v10, %v4156_v52  ;;  %v2009_v5 = vpop.f32.mrf.mxu1 }
 0x152   : > { %v2021_v17 = vadd.f32 %v2009_v5, %v1794_v55  ;;  %v4222_v24 = vor.u32 %v2282_v15, %v2279_v14 }
 0x153   : > { %v4212_v18 = vadd.f32 %v1987_v63, %v1785_v12 }
 0x154   : > { %v2121_v41 = vsel %vm2111_vm0, %v2021_v17, 0.0  ;;  %v2194_v20 = vpack.c.bf16 %v2021_v17, %v2021_v17  ;;  %3358 = vmatpush.msk.msrb.mxu1 %vm2111_vm0, %v2021_v17  ;;  %v2285_v44 = vrot.slane %v4222_v24, 4 }
 0x155   : > { %v2185_v52 = vpack.c.bf16 %v4212_v18, %v4212_v18  ;;  %v2156_v23 = vmul.f32 %v2121_v41, %v2121_v41 }
 0x156   : > { %v2287_v25 = vshrl.u32 %v2194_v20, 16  ;;  %v2290_v26 = vshll.u32 %v2194_v20, 16  ;;  %3359 = vmatpush.msk.msrb.mxu1 %vm2110_vm1, %v2020_v2 }
 0x157   : > { %v2198_v58 = vshrl.u32 %v2185_v52, 16  ;;  %v2201_v31 = vshll.u32 %v2185_v52, 16  ;;  %2163 = vmatpush.msrb.mxu2 %v2156_v23 }
 0x158   : > { %v2289_v33 = vrot.slane %v2287_v25, 6  ;;  %v2292_v34 = vrot.slane %v2290_v26, 7  ;;  %v1762_v35 = vpop.f32.mrf.mxu2  ;;  %v1992_v43 = vpop.f32.mrf.mxu0 }
 0x159   : > { %v4226_v6 = vpop.f32.mrf.mxu3  ;;  %v2200_v37 = vrot.slane %v2198_v58, 6  ;;  %v2203_v39 = vrot.slane %v2201_v31, 7  ;;  %v1786_v42 = vadd.f32 %v1762_v35, %v4159_v27  ;;  %2164 = vmatpush.msrb.mxu2 %v2155_v32  ;;  %v4245_v3 = vadd.f32 %v1992_v43, %v4163_v4 }
 0x15a   : > { %v2293_v48 = vor.u32 %v2292_v34, %v2289_v33  ;;  %v3584_v51 = vpack.c.bf16 %v4226_v6, %v4207_v11 }
 0x15b   : > { %v2204_v27 = vor.u32 %v2203_v39, %v2200_v37  ;;  %v4248_v47 = vadd.f32 %v1989_v22, %v1786_v42  ;;  %v2187_v28 = vpack.c.bf16 %v4245_v3, %v4245_v3 }
 0x15c   : > { %v2294_v50 = vsel %vm4230_vm5, %v2285_v44, %v2293_v48  ;;  %v2295_v57 = vrot.slane %v2293_v48, 4  ;;  %3601 = vst [vmem:[%s4198_s11 + $0x8] sm:$0xff] %v3584_v51  }
 0x15d   : > { %v2311_v60 = vsel %vm4237_vm6, %v2204_v27, %v2310_v29  ;;  %2321 = vst [vmem:[%s4127_s8 + $0x28] sm:$0xf] %v2294_v50  ;;  %v2186_v4 = vpack.c.bf16 %v4248_v47, %v4248_v47  ;;  %v2217_v62 = vshrl.u32 %v2187_v28, 16  ;;  %v2220_v63 = vshll.u32 %v2187_v28, 16  ;;  %v4296_v29 = vpop.permute.xlu1 %2094  ;;  %v4302_v50 = vpop.permute.xlu2 %2088 }
 0x15e   : > { %2312 = vst [vmem:[%s4127_s8 + $0x4] sm:$0xe] %v2311_v60  ;;  %v2323_v61 = vsel %vm4176_vm15, %v2295_v57, %v2322_v53  ;;  %v2205_v38 = vrot.slane %v2204_v27, 4  ;;  %vm2109_vm8 = vcmp.eq.s32.totalorder %v4296_v29, 1  ;;  %vm2107_vm9 = vcmp.eq.s32.totalorder %v4302_v50, 1 }
 0x15f   : > { %2324 = vst [vmem:[%s4127_s8 + $0x2c] sm:$0x3] %v2323_v61  ;;  %v2207_v54 = vshrl.u32 %v2186_v4, 16  ;;  %v2210_v1 = vshll.u32 %v2186_v4, 16  ;;  %v2219_v56 = vrot.slane %v2217_v62, 6  ;;  %v2222_v7 = vrot.slane %v2220_v63, 7 }
 0x160   : > { %v1994_v10 = vpop.f32.mrf.mxu0  ;;  %vm2122_vm15 = vcmask 654336  }
 0x161   : > { %v4264_v2 = vpop.f32.mrf.mxu3  ;;  %v2209_v0 = vrot.slane %v2207_v54, 6  ;;  %v2212_v46 = vrot.slane %v2210_v1, 7  ;;  %v4267_v55 = vadd.f32 %v1994_v10, %v4166_v13  ;;  %v2223_v15 = vor.u32 %v2222_v7, %v2219_v56 }
 0x163   : > { %v2213_v12 = vor.u32 %v2212_v46, %v2209_v0  ;;  %v2188_v22 = vpack.c.bf16 %v4267_v55, %v4267_v55  ;;  %v2225_v31 = vrot.slane %v2223_v15, 4 }
 0x165   : > { %v2214_v5 = vsel %vm4230_vm5, %v2205_v38, %v2213_v12  ;;  %v2215_v14 = vrot.slane %v2213_v12, 4  ;;  %v2227_v41 = vshrl.u32 %v2188_v22, 16  ;;  %v2230_v20 = vshll.u32 %v2188_v22, 16  ;;  %v4310_v0 = vpop.permute.xlu1 %2091  ;;  %v4315_v38 = vpop.permute.xlu2 %2085 }
 0x166   : > { %v2325_v17 = vld [vmem:[%s4127_s8 + $0x2c] sm:$0xe]  ;;  %2313 = vst [vmem:[%s4127_s8 + $0x8] sm:$0xf] %v2214_v5  ;;  %vm2108_vm7 = vcmp.eq.s32.totalorder %v4310_v0, 1  ;;  %vm2106_vm10 = vcmp.eq.s32.totalorder %v4315_v38, 1 }
 0x167   : > { %v2326_v13 = vsel %vm4237_vm6, 0, %v2325_v17  ;;  %v2224_v21 = vsel %vm4230_vm5, %v2215_v14, %v2223_v15  ;;  %v2229_v52 = vrot.slane %v2227_v41, 6  ;;  %v2232_v23 = vrot.slane %v2230_v20, 7  ;;  %v4320_v14 = vpop.permute.xlu0 %2082 }
 0x168   : > { %2327 = vst [vmem:[%s4127_s8 + $0x2c] sm:$0xe] %v2326_v13  ;;  %v1997_v58 = vpop.f32.mrf.mxu0  ;;  %vm2105_vm11 = vcmp.eq.s32.totalorder %v4320_v14, 1 }
 0x169   : > { %v4280_v25 = vpop.f32.mrf.mxu3  ;;  %2314 = vst [vmem:[%s4127_s8 + $0xc] sm:$0xf] %v2224_v21  ;;  %v2233_v32 = vor.u32 %v2232_v23, %v2229_v52  ;;  %v4286_v33 = vadd.f32 %v1997_v58, %v4169_v19 }
 0x16a   : > { %v3589_v26 = vpack.c.bf16 %v4280_v25, %v4264_v2 }
 0x16b   : > { %v2234_v34 = vsel %vm4230_vm5, %v2225_v31, %v2233_v32  ;;  %v2189_v35 = vpack.c.bf16 %v4286_v33, %v4286_v33  ;;  %v2235_v19 = vrot.slane %v2233_v32, 4 }
 0x16c   : > { %3602 = vst [vmem:[%s4198_s11 + $0x10] sm:$0xff] %v3589_v26  }
 0x16d   : > { %2315 = vst [vmem:[%s4127_s8 + $0x10] sm:$0xf] %v2234_v34  ;;  %v2237_v37 = vshrl.u32 %v2189_v35, 16  ;;  %v2240_v39 = vshll.u32 %v2189_v35, 16  ;;  %v4335_v23 = vpop.permute.xlu1 %2079 }
 0x16e   : > { %vm2104_vm12 = vcmp.eq.s32.totalorder %v4335_v23, 1 }
 0x16f   : > { %v2239_v42 = vrot.slane %v2237_v37, 6  ;;  %v2242_v43 = vrot.slane %v2240_v39, 7  ;;  %v2116_v39 = vsel %vm2106_vm10, %v4286_v33, 0.0  ;;  %v2470_v0 = vsel %vm2104_vm12, %v4207_v11, 0.0 }
 0x170   : > { %v1999_v45 = vpop.f32.mrf.mxu0 }
 0x171   : > { %v4294_v44 = vpop.f32.mrf.mxu3  ;;  %v2243_v48 = vor.u32 %v2242_v43, %v2239_v42  ;;  %v2017_v51 = vadd.f32 %v1999_v45, %v4172_v30  ;;  %v4349_v45 = vpop.permute.xlu2 %2076 }
 0x172   : > { %vm2103_vm13 = vcmp.eq.s32.totalorder %v4349_v45, 1  ;;  %v2474_v59 = vsel %vm2108_vm7, %v4294_v44, 0.0 }
 0x173   : > { %v2244_v27 = vsel %vm4230_vm5, %v2235_v19, %v2243_v48  ;;  %v2190_v53 = vpack.c.bf16 %v2017_v51, %v2017_v51  ;;  %v2245_v54 = vrot.slane %v2243_v48, 4  ;;  %v2117_v31 = vsel %vm2107_vm9, %v2017_v51, 0.0 }
 0x174   : > { %2316 = vst [vmem:[%s4127_s8 + $0x14] sm:$0xf] %v2244_v27  ;;  %v2152_v43 = vmul.f32 %v2117_v31, %v2117_v31  ;;  %v2151_v27 = vmul.f32 %v2116_v39, %v2116_v39  ;;  %v2505_v8 = vmul.f32 %v2474_v59, %v2474_v59  ;;  %v2469_v50 = vsel %vm2103_vm13, %v4200_v36, 0.0 }
 0x175   : > { %v2247_v57 = vshrl.u32 %v2190_v53, 16  ;;  %v2250_v28 = vshll.u32 %v2190_v53, 16  ;;  %v4358_v53 = vpop.permute.xlu0 %2073 }
 0x176   : > { %vm2102_vm14 = vcmp.eq.s32.totalorder %v4358_v53, 1 }
 0x177   : > { %v2249_v60 = vrot.slane %v2247_v57, 6  ;;  %v2252_v4 = vrot.slane %v2250_v28, 7 }
 0x178   : > { %v2002_v63 = vpop.f32.mrf.mxu0 }
 0x179   : > { %v4304_v61 = vpop.f32.mrf.mxu3  ;;  %v2253_v30 = vor.u32 %v2252_v4, %v2249_v60  ;;  %v2018_v1 = vadd.f32 %v2002_v63, %v4181_v16 }
 0x17a   : > { %v3594_v62 = vpack.c.bf16 %v4304_v61, %v4294_v44 }
 0x17b   : > { %v2254_v46 = vsel %vm4230_vm5, %v2245_v54, %v2253_v30  ;;  %v2191_v56 = vpack.c.bf16 %v2018_v1, %v2018_v1  ;;  %v2255_v15 = vrot.slane %v2253_v30, 4  ;;  %v2118_v52 = vsel %vm2108_vm7, %v2018_v1, 0.0 }
 0x17c   : > { %3603 = vst [vmem:[%s4198_s11 + $0x18] sm:$0xff] %v3594_v62   ;;  %v2153_v32 = vmul.f32 %v2118_v52, %v2118_v52  ;;  %v3646_v30 = vmov 1.0  }
 0x17d   : > { %2317 = vst [vmem:[%s4127_s8 + $0x18] sm:$0xf] %v2254_v46  ;;  %v2257_v7 = vshrl.u32 %v2191_v56, 16  ;;  %v2260_v10 = vshll.u32 %v2191_v56, 16  ;;  %v2473_v56 = vsel %vm2107_vm9, %v4280_v25, 0.0 }
 0x17e   : > { %v2504_v29 = vmul.f32 %v2473_v56, %v2473_v56 }
 0x17f   : > { %v2259_v12 = vrot.slane %v2257_v7, 6  ;;  %v2262_v22 = vrot.slane %v2260_v10, 7  ;;  %v2472_v7 = vsel %vm2106_vm10, %v4264_v2, 0.0  ;;  %v2468_v10 = vsel %vm2102_vm14, %v4189_v9, 0.0 }
 0x180   : > { %v2004_v16 = vpop.f32.mrf.mxu0  ;;  %v2499_v38 = vmul.f32 %v2468_v10, %v2468_v10 }
 0x181   : > { %v4317_v5 = vpop.f32.mrf.mxu3  ;;  %v2263_v17 = vor.u32 %v2262_v22, %v2259_v12  ;;  %v2019_v41 = vadd.f32 %v2004_v16, %v4186_v49 }
 0x182   : > { %v2476_v63 = vsel %vm2110_vm1, %v4317_v5, 0.0 }
 0x183   : > { %v2264_v20 = vsel %vm4230_vm5, %v2255_v15, %v2263_v17  ;;  %v2192_v13 = vpack.c.bf16 %v2019_v41, %v2019_v41  ;;  %3360 = vmatpush.msk.msrb.mxu1 %vm2109_vm8, %v2019_v41  ;;  %v2119_v21 = vsel %vm2109_vm8, %v2019_v41, 0.0  ;;  %v2265_v19 = vrot.slane %v2263_v17, 4 }
 0x184   : > { %2318 = vst [vmem:[%s4127_s8 + $0x1c] sm:$0xf] %v2264_v20  ;;  %v2154_v49 = vmul.f32 %v2119_v21, %v2119_v21 }
 0x185   : > { %v2267_v26 = vshrl.u32 %v2192_v13, 16  ;;  %v2270_v58 = vshll.u32 %v2192_v13, 16  ;;  %3361 = vmatpush.msk.msrb.mxu1 %vm2108_vm7, %v2018_v1  ;;  %v2475_v1 = vsel %vm2109_vm8, %v4304_v61, 0.0 }
 0x186   : > { %2165 = vmatpush.msrb.mxu2 %v2154_v49  ;;  %v2506_v46 = vmul.f32 %v2475_v1, %v2475_v1 }
 0x187   : > { %v2269_v34 = vrot.slane %v2267_v26, 6  ;;  %v2272_v35 = vrot.slane %v2270_v58, 7  ;;  %3362 = vmatpush.msk.msrb.mxu1 %vm2107_vm9, %v2017_v51  ;;  %v2115_v51 = vsel %vm2105_vm11, %v4267_v55, 0.0 }
 0x188   : > { %2166 = vmatpush.msrb.mxu2 %v2153_v32  ;;  %v2150_v60 = vmul.f32 %v2115_v51, %v2115_v51 }
 0x189   : > { %v2465_v37 = vpop.f32.mrf.mxu3  ;;  %v2273_v48 = vor.u32 %v2272_v35, %v2269_v34  ;;  %3363 = vmatpush.msk.msrb.mxu1 %vm2106_vm10, %v4286_v33  ;;  %v2114_v33 = vsel %vm2104_vm12, %v4245_v3, 0.0 }
 0x18a   : > { %v3599_v42 = vpack.c.bf16 %v2465_v37, %v4317_v5  ;;  %2167 = vmatpush.msrb.mxu2 %v2152_v43  ;;  %v2149_v62 = vmul.f32 %v2114_v33, %v2114_v33  ;;  %v2477_v40 = vsel %vm2111_vm0, %v2465_v37, 0.0 }
 0x18b   : > { %v2274_v57 = vsel %vm4230_vm5, %v2265_v19, %v2273_v48  ;;  %v2275_v28 = vrot.slane %v2273_v48, 4  ;;  %3364 = vmatpush.msk.msrb.mxu1 %vm2105_vm11, %v4267_v55  ;;  %v2113_v55 = vsel %vm2103_vm13, %v4248_v47, 0.0  ;;  %v2508_v54 = vmul.f32 %v2477_v40, %v2477_v40 }
 0x18c   : > { %3604 = vst [vmem:[%s4198_s11 + $0x20] sm:$0xff] %v3599_v42   ;;  %2168 = vmatpush.msrb.mxu2 %v2151_v27 }
 0x18d   : > { %2319 = vst [vmem:[%s4127_s8 + $0x20] sm:$0xf] %v2274_v57  ;;  %v2284_v4 = vsel %vm4230_vm5, %v2275_v28, %v4222_v24  ;;  %3365 = vmatpush.msk.msrb.mxu1 %vm2104_vm12, %v4245_v3  ;;  %v2112_v24 = vsel %vm2102_vm14, %v4212_v18, 0.0  ;;  %v2148_v3 = vmul.f32 %v2113_v55, %v2113_v55 }
 0x18e   : > { %2320 = vst [vmem:[%s4127_s8 + $0x24] sm:$0xf] %v2284_v4  ;;  %2169 = vmatpush.msrb.mxu2 %v2150_v60 }
 0x18f   : > { %3366 = vmatpush.msk.msrb.mxu1 %vm2103_vm13, %v4248_v47  ;;  %v2147_v47 = vmul.f32 %v2112_v24, %v2112_v24 }
 0x190   : > { %2170 = vmatpush.msrb.mxu2 %v2149_v62 }
 0x191   : > { %3367 = vmatpush.msk.msrb.mxu1 %vm2102_vm14, %v4212_v18  ;;  %v2507_v18 = vmul.f32 %v2476_v63, %v2476_v63 }
 0x192   : > { %2171 = vmatpush.msrb.mxu2 %v2148_v3  ;;  %3368 = vmatmul.msk.f32.vlgmr.msrb.gmra.mxu1 %vm2122_vm15, %v3646_v30 }
 0x193   : > { %3432 = vmatpush.msk.msra.mxu1 %vm2111_vm0, %v2465_v37 }
 0x194   : > { %2172 = vmatpush.msrb.mxu2 %v2147_v47 }
 0x195   : > { %3433 = vmatpush.msk.msra.mxu1 %vm2110_vm1, %v4317_v5  ;;  %3369 = vmatmul.msk.f32.vlgmr.msrb.gmra.mxu2 %vm2122_vm15, %v3646_v30 }
 0x196   : > { %2515 = vmatpush.msra.mxu2 %v2508_v54 }
 0x197   : > { %3434 = vmatpush.msk.msra.mxu1 %vm2109_vm8, %v4304_v61  ;;  %v2471_v61 = vsel %vm2105_vm11, %v4226_v6, 0.0 }
 0x198   : > { %2516 = vmatpush.msra.mxu2 %v2507_v18 }
 0x199   : > { %3435 = vmatpush.msk.msra.mxu1 %vm2108_vm7, %v4294_v44  ;;  %v2503_v44 = vmul.f32 %v2472_v7, %v2472_v7 }
 0x19a   : > { %2517 = vmatpush.msra.mxu2 %v2506_v46 }
 0x19b   : > { %3436 = vmatpush.msk.msra.mxu1 %vm2107_vm9, %v4280_v25  ;;  %v2502_v25 = vmul.f32 %v2471_v61, %v2471_v61 }
 0x19c   : > { %2518 = vmatpush.msra.mxu2 %v2505_v8 }
 0x19d   : > { %3437 = vmatpush.msk.msra.mxu1 %vm2106_vm10, %v4264_v2  ;;  %v2501_v2 = vmul.f32 %v2470_v0, %v2470_v0 }
 0x19e   : > { %2519 = vmatpush.msra.mxu2 %v2504_v29 }
 0x19f   : > { %3438 = vmatpush.msk.msra.mxu1 %vm2105_vm11, %v4226_v6  ;;  %v2500_v6 = vmul.f32 %v2469_v50, %v2469_v50 }
 0x1a0   : > { %2520 = vmatpush.msra.mxu2 %v2503_v44 }
 0x1a1   : > { %3439 = vmatpush.msk.msra.mxu1 %vm2104_vm12, %v4207_v11 }
 0x1a2   : > { %2521 = vmatpush.msra.mxu2 %v2502_v25 }
 0x1a3   : > { %3440 = vmatpush.msk.msra.mxu1 %vm2103_vm13, %v4200_v36 }
 0x1a4   : > { %2522 = vmatpush.msra.mxu2 %v2501_v2 }
 0x1a5   : > { %3441 = vmatpush.msk.msra.mxu1 %vm2102_vm14, %v4189_v9 }
 0x1a6   : > { %2523 = vmatpush.msra.mxu2 %v2500_v6  ;;  %3442 = vmatmul.msk.f32.vlgmr.msra.gmra.mxu1 %vm2122_vm15, %v3646_v30 }
 0x1a8   : > { %2524 = vmatpush.msra.mxu2 %v2499_v38 }
 0x1a9   : > { %3443 = vmatmul.msk.f32.vlgmr.msra.gmra.mxu2 %vm2122_vm15, %v3646_v30 }
 0x20f   : > { %v2143_v11 = vpop.f32.mrf.mxu1 }
 0x210   : > { %2146 = vst [vmem:[%s307_s15] sm:$0x1] %v2143_v11 }
 0x218   : > { %v2174_v36 = vpop.f32.mrf.mxu2 }
 0x219   : > { %2177 = vst [vmem:[%s307_s15 + $0x1] sm:$0x1] %v2174_v36 }
 0x223   : > { %v2495_v9 = vpop.f32.mrf.mxu1 }
 0x224   : > { %2498 = vst [vmem:[%s311_s19] sm:$0x1] %v2495_v9 }
 0x22c   : > { %v2526_v12 = vpop.f32.mrf.mxu2 }
 0x22d   : > { %2529 = vst [vmem:[%s311_s19 + $0x1] sm:$0x1] %v2526_v12 }
 0x22e PF: > { %s18_s24 = sadd.s32 1, %s3643_s24  }
 0x22f   : > { %p15_p4 = scmp.ge.s32.totalorder %s18_s24, 4  }
 0x231   :  { %17 = sbr.rel (!%p15_p4) target bundleno = 1 (0x1), region = 113 }

// kernel: _basic_block_forward.4
= control target key start
LH: loop header
LB: loop body
LE: loop exit
PB: predicated region body
PF: predicated region fallthrough
CT: control target
= control target key end

     0   :  { %s3444_s24 = smov 0   ;;  %s4005_s0 = inlined_call_operand.vmem [shape: bf16[2,110,128], index: 0, kind: input, shape index: {}]   ;;  %s4006_s1 = inlined_call_operand.vmem [shape: bf16[9,128,128], index: 1, kind: input, shape index: {}]   ;;  %s4007_s2 = inlined_call_operand.vmem [shape: f32[1,128], index: 2, kind: input, shape index: {}]   ;;  %s4008_s3 = inlined_call_operand.vmem [shape: f32[1,128], index: 3, kind: input, shape index: {}]   ;;  %s4009_s4 = inlined_call_operand.vmem [shape: f32[110,1], index: 4, kind: input, shape index: {}]   ;;  %s4010_s5 = inlined_call_operand.vmem [shape: f32[80,1], index: 5, kind: input, shape index: {}]   ;;  %s4011_s6 = inlined_call_operand.vmem [shape: bf16[2,80,128], index: 6, kind: output, shape index: {0}]   ;;  %s4012_s7 = inlined_call_operand.vmem [shape: f32[2,2,128], index: 7, kind: output, shape index: {1}]  }
   0x1 LB: > { %s2533_s25 = sadd.s32 4294967295, %s3400_s24   ;;  %p2537_p0 = scmp.ge.s32.totalorder %s3400_s24, 1  ;;  %s3400_s24 = sphi %s3444_s24, %s18_s24  }
   0x2   : > { %p240_p1 = scmp.lt.s32.totalorder %s3400_s24, 3 }
   0x4   : > { %p241_p2 = pnand %p2537_p0, %p240_p1 }
   0x5   : > { %p276_p3 = scmp.lt.s32.totalorder (!%p241_p2), %s2533_s25, 1 }
   0x6   : > { %244 = sbr.rel (%p241_p2) target bundleno = 624 (0x270), region = 44 }
   0xb   : > { %v374_v0 = vld [vmem:[%s4009_s4 + $0x30] sm:$0xff]  ;;  %v372_v1 = vld [vmem:[%s4009_s4 + $0x20] sm:$0xff]  ;;  %v3402_v3 = vmov 0   ;;  %v375_v7 = vld [vmem:[%s4009_s4 + $0x38] sm:$0xff]  ;;  %s4014_s25 = smov (!%p276_p3, %s2533_s25), 1 }
   0xc   : > { %v368_v2 = vld [vmem:[%s4009_s4] sm:$0xff]  ;;  %3391 = vset.pattern.permute.xlu2 %v3402_v3  ;;  %3390 = vset.pattern.permute.xlu1 %v3402_v3  ;;  %vm388_vm0 = vcmp.gt.f32.partialorder %v374_v0, 0.5  ;;  %vm386_vm1 = vcmp.gt.f32.partialorder %v372_v1, 0.5  ;;  %v373_v8 = vld [vmem:[%s4009_s4 + $0x28] sm:$0xff]  ;;  %vm389_vm3 = vcmp.gt.f32.partialorder %v375_v7, 0.5  ;;  %v370_v14 = vld [vmem:[%s4009_s4 + $0x10] sm:$0xff] }
   0xd   : > { %vm382_vm2 = vcmp.gt.f32.partialorder %v368_v2, 0.5  ;;  %3389 = vset.pattern.permute.xlu0 %v3402_v3  ;;  %v402_v4 = vsel %vm388_vm0, 1, %v3402_v3  ;;  %v400_v5 = vsel %vm386_vm1, 1, %v3402_v3  ;;  %v369_v9 = vld [vmem:[%s4009_s4 + $0x8] sm:$0xff]  ;;  %vm387_vm4 = vcmp.gt.f32.partialorder %v373_v8, 0.5  ;;  %v376_v13 = vld [vmem:[%s4009_s4 + $0x40] sm:$0xff] }
   0xe   : > { %v396_v6 = vsel %vm382_vm2, 1, %v3402_v3  ;;  %429 = vperm.xlu2 %3391, %v402_v4   ;;  %423 = vperm.xlu0 %3389, %v400_v5   ;;  %vm383_vm5 = vcmp.gt.f32.partialorder %v369_v9, 0.5  ;;  %v403_v10 = vsel %vm389_vm3, 1, %v3402_v3  ;;  %v401_v11 = vsel %vm387_vm4, 1, %v3402_v3  ;;  %v371_v15 = vld [vmem:[%s4009_s4 + $0x18] sm:$0xff]  ;;  %v377_v20 = vld [vmem:[%s4009_s4 + $0x48] sm:$0xff] }
   0xf   : > { %411 = vperm.xlu1 %3390, %v396_v6   ;;  %v397_v12 = vsel %vm383_vm5, 1, %v3402_v3  ;;  %vm390_vm6 = vcmp.gt.f32.partialorder %v376_v13, 0.5  ;;  %vm384_vm7 = vcmp.gt.f32.partialorder %v370_v14, 0.5  ;;  %vm385_vm8 = vcmp.gt.f32.partialorder %v371_v15, 0.5  ;;  %v379_v19 = vld [vmem:[%s4009_s4 + $0x58] sm:$0xff]  ;;  %v378_v21 = vld [vmem:[%s4009_s4 + $0x50] sm:$0xff] }
  0x10   : > { %v404_v16 = vsel %vm390_vm6, 1, %v3402_v3  ;;  %v398_v17 = vsel %vm384_vm7, 1, %v3402_v3  ;;  %v399_v18 = vsel %vm385_vm8, 1, %v3402_v3  ;;  %vm393_vm9 = vcmp.gt.f32.partialorder %v379_v19, 0.5  ;;  %v2299_v25 = vld [vmem:[%s4010_s5 + $0x40] sm:$0xff]  ;;  %v2300_v27 = vld [vmem:[%s4010_s5 + $0x48] sm:$0xff] }
  0x11   : > { %vm391_vm10 = vcmp.gt.f32.partialorder %v377_v20, 0.5  ;;  %vm392_vm11 = vcmp.gt.f32.partialorder %v378_v21, 0.5  ;;  %v407_v22 = vsel %vm393_vm9, 1, %v3402_v3  ;;  %v380_v26 = vld [vmem:[%s4009_s4 + $0x60] sm:$0xff]  ;;  %vm2309_vm12 = vcmp.gt.f32.partialorder %v2299_v25, 0.5  ;;  %v2296_v31 = vld [vmem:[%s4010_s5 + $0x28] sm:$0xff] }
  0x12   : > { %v405_v23 = vsel %vm391_vm10, 1, %v3402_v3  ;;  %v406_v24 = vsel %vm392_vm11, 1, %v3402_v3  ;;  %vm394_vm13 = vcmp.gt.f32.partialorder %v380_v26, 0.5  ;;  %vm2310_vm14 = vcmp.gt.f32.partialorder %v2300_v27, 0.5  ;;  %v2298_v32 = vld [vmem:[%s4010_s5 + $0x38] sm:$0xff]  ;;  %v2297_v33 = vld [vmem:[%s4010_s5 + $0x30] sm:$0xff] }
  0x13   : > { %v2319_v28 = vsel %vm2309_vm12, 1, %v3402_v3  ;;  %v408_v29 = vsel %vm394_vm13, 1, %v3402_v3  ;;  %v2320_v30 = vsel %vm2310_vm14, 1, %v3402_v3  ;;  %vm2306_vm15 = vcmp.gt.f32.partialorder %v2296_v31, 0.5  ;;  %v2293_v37 = vld [vmem:[%s4010_s5 + $0x10] sm:$0xff]  ;;  %v2295_v38 = vld [vmem:[%s4010_s5 + $0x20] sm:$0xff] }
  0x14   : > { %vm2308_vm0 = vcmp.gt.f32.partialorder %v2298_v32, 0.5  ;;  %vm2307_vm1 = vcmp.gt.f32.partialorder %v2297_v33, 0.5  ;;  %v2316_v34 = vsel %vm2306_vm15, 1, %v3402_v3  ;;  %v2294_v39 = vld [vmem:[%s4010_s5 + $0x18] sm:$0xff]  ;;  %vm2303_vm2 = vcmp.gt.f32.partialorder %v2293_v37, 0.5  ;;  %v2292_v44 = vld [vmem:[%s4010_s5 + $0x8] sm:$0xff] }
  0x15   : > { %v2318_v35 = vsel %vm2308_vm0, 1, %v3402_v3  ;;  %v2317_v36 = vsel %vm2307_vm1, 1, %v3402_v3  ;;  %vm2305_vm3 = vcmp.gt.f32.partialorder %v2295_v38, 0.5  ;;  %vm2304_vm4 = vcmp.gt.f32.partialorder %v2294_v39, 0.5  ;;  %v381_v43 = vld [vmem:[%s4009_s4 + $0x68] sm:$0x3f] }
  0x16   : > { %432 = vperm.xlu2 %3391, %v403_v10   ;;  %426 = vperm.xlu0 %3389, %v401_v11   ;;  %v2313_v40 = vsel %vm2303_vm2, 1, %v3402_v3  ;;  %v2315_v41 = vsel %vm2305_vm3, 1, %v3402_v3  ;;  %v2314_v42 = vsel %vm2304_vm4, 1, %v3402_v3  ;;  %v2291_v45 = vld [vmem:[%s4010_s5] sm:$0xff]  ;;  %vm395_vm5 = vcmp.gt.f32.partialorder %v381_v43, 0.5  ;;  %v3163_v49 = vld [vmem:[%s4006_s1 + $0x38] sm:$0xff] }
  0x17   : > { %414 = vperm.xlu1 %3390, %v397_v12   ;;  %vm2302_vm6 = vcmp.gt.f32.partialorder %v2292_v44, 0.5  ;;  %vm2301_vm7 = vcmp.gt.f32.partialorder %v2291_v45, 0.5  ;;  %v409_v46 = vsel %vm395_vm5, 1, %v3402_v3  ;;  %632 = vmatpush.bf16.msra.mxu0 %v3163_v49  ;;  %s3377_s11 = smul.u32 56, %s4014_s25  ;;  %v3162_v50 = vld [vmem:[%s4006_s1 + $0x30] sm:$0xff]  ;;  %v3161_v51 = vld [vmem:[%s4006_s1 + $0x28] sm:$0xff] }
  0x18   : > { %v2312_v47 = vsel %vm2302_vm6, 1, %v3402_v3  ;;  %v2311_v48 = vsel %vm2301_vm7, 1, %v3402_v3  ;;  %3361 = vmatpush.bf16.msra.mxu3 %v3163_v49  ;;  %v3189_v54 = vld [vmem:[%s4006_s1 + $0xb8] sm:$0xff]  ;;  %v3579_v55 = vld [vmem:[%s4007_s2] ss:$0 sm:$0xff]  ;;  %v3188_v59 = vld [vmem:[%s4006_s1 + $0xb0] sm:$0xff] }
  0x19   : > { %s3567_s16 = scalar_lea.vmem %s4005_s0, %s3377_s11  ;;  %v3160_v57 = vld [vmem:[%s4006_s1 + $0x20] sm:$0xff]  ;;  %1035 = vmatpush.bf16.msra.mxu2 %v3189_v54  ;;  %v3176_v58 = vld [vmem:[%s4006_s1 + $0x78] sm:$0xff]  ;;  %v3175_v0 = vld [vmem:[%s4006_s1 + $0x70] sm:$0xff]  ;;  %vm970_vm4 = vcmask 1046528   ;;  %vm752_vm6 = vsmask.f32 7424 }
  0x1a   : > { %v3349_v52 = vld [vmem:[%s3567_s16 + $0x18] sm:$0xff]   ;;  %850 = vmatpush.bf16.msra.mxu1 %v3176_v58  ;;  %v3597_v62 = vld [vmem:[%s4008_s3] ss:$0 sm:$0xff]  ;;  %v3187_v3 = vld [vmem:[%s4006_s1 + $0xa8] sm:$0xff]  ;;  %vm1339_vm7 = vsmask.f32 6400 }
  0x1b   : > { %633 = vmatpush.bf16.msra.mxu0 %v3162_v50  ;;  %v3282_v53 = vunpack.c.l.bf16 %v3349_v52  ;;  %v3283_v56 = vunpack.c.h.bf16 %v3349_v52  ;;  %v3159_v61 = vld [vmem:[%s4006_s1 + $0x18] sm:$0xff]  ;;  %v3158_v5 = vld [vmem:[%s4006_s1 + $0x10] sm:$0xff]  ;;  %v3174_v6 = vld [vmem:[%s4006_s1 + $0x68] sm:$0xff]  ;;  %s3378_s17 = smul.u32 40, %s4014_s25  ;;  %s2540_s21 = sshll.u32 %s4014_s25, 1 }
  0x1c   : > { %3362 = vmatpush.bf16.msra.mxu3 %v3162_v50  ;;  %v3186_v8 = vld [vmem:[%s4006_s1 + $0xa0] sm:$0xff]  ;;  %v3157_v10 = vld [vmem:[%s4006_s1 + $0x8] sm:$0xff]  ;;  %v3185_v14 = vld [vmem:[%s4006_s1 + $0x98] sm:$0xff]  ;;  %s289_s26 = scalar_lea.vmem %s4012_s7, %s2540_s21 }
  0x1d   : > { %v328_v60 = vmul.f32 %v3579_v55, %v3282_v53  ;;  %v329_v63 = vmul.f32 %v3579_v55, %v3283_v56  ;;  %1036 = vmatpush.bf16.msra.mxu2 %v3188_v59  ;;  %v3173_v11 = vld [vmem:[%s4006_s1 + $0x60] sm:$0xff]  ;;  %v3184_v19 = vld [vmem:[%s4006_s1 + $0x90] sm:$0xff]  ;;  %v3215_v21 = vld [vmem:[%s4006_s1 + $0x138] sm:$0xff]  ;;  %s3946_s20 = scalar_lea.vmem %s4011_s6, %s3378_s17 }
  0x1e   : > { %435 = vperm.xlu2 %3391, %v404_v16   ;;  %417 = vperm.xlu0 %3389, %v398_v17   ;;  %v3156_v16 = vld [vmem:[%s4006_s1] sm:$0xff]  ;;  %v3183_v26 = vld [vmem:[%s4006_s1 + $0x88] sm:$0xff]  ;;  %v3202_v59 = vld [vmem:[%s4006_s1 + $0xf8] sm:$0xff] }
  0x1f   : > { %420 = vperm.xlu1 %3390, %v399_v18   ;;  %634 = vmatpush.bf16.msra.mxu0 %v3161_v51  ;;  %v346_v2 = vadd.f32 %v3597_v62, %v328_v60  ;;  %v347_v4 = vadd.f32 %v3597_v62, %v329_v63  ;;  %v3172_v18 = vld [vmem:[%s4006_s1 + $0x58] sm:$0xff]  ;;  %v3269_v20 = vld [vmem:[%s3567_s16] sm:$0xff]   ;;  %v3170_v31 = vld [vmem:[%s4006_s1 + $0x48] sm:$0xff] }
  0x20   : > { %3363 = vmatpush.bf16.msra.mxu3 %v3161_v51  ;;  %851 = vmatpush.bf16.msra.mxu1 %v3175_v0  ;;  %v3270_v25 = vunpack.c.l.bf16 %v3269_v20  ;;  %v3182_v33 = vld [vmem:[%s4006_s1 + $0x80] sm:$0xff]  ;;  %v3347_v38 = vld [vmem:[%s3567_s16 + $0x8] sm:$0xff]   ;;  %v3211_v60 = vld [vmem:[%s4006_s1 + $0x118] sm:$0xff] }
  0x21   : > { %1037 = vmatpush.bf16.msra.mxu2 %v3187_v3  ;;  %v360_v7 = vmax.f32 %v346_v2, 0.0  ;;  %v361_v9 = vmax.f32 %v347_v4, 0.0  ;;  %v3169_v39 = vld [vmem:[%s4006_s1 + $0x40] sm:$0xff]  ;;  %v3351_v52 = vld [vmem:[%s3567_s16 + $0x28] sm:$0xff]  }
  0x22   : > { %v322_v32 = vmul.f32 %v3579_v55, %v3270_v25  ;;  %v3212_v49 = vld [vmem:[%s4006_s1 + $0x120] sm:$0xff] }
  0x23   : > { %635 = vmatpush.bf16.msra.mxu0 %v3160_v57  ;;  %v3350_v50 = vld [vmem:[%s3567_s16 + $0x20] sm:$0xff]  }
  0x24   : > { %3364 = vmatpush.bf16.msra.mxu3 %v3160_v57  ;;  %852 = vmatpush.bf16.msra.mxu1 %v3174_v6  ;;  %v340_v43 = vadd.f32 %v3597_v62, %v322_v32  ;;  %v3287_v4 = vunpack.c.h.bf16 %v3350_v50 }
  0x25   : > { %1038 = vmatpush.bf16.msra.mxu2 %v3186_v8  ;;  %v3201_v8 = vld [vmem:[%s4006_s1 + $0xf0] sm:$0xff] }
  0x26   : > { %444 = vperm.xlu2 %3391, %v407_v22   ;;  %438 = vperm.xlu0 %3389, %v405_v23   ;;  %v3348_v22 = vld [vmem:[%s3567_s16 + $0x10] sm:$0xff]   ;;  %v354_v51 = vmax.f32 %v340_v43, 0.0 }
  0x27   : > { %441 = vperm.xlu1 %3390, %v406_v24   ;;  %636 = vmatpush.bf16.msra.mxu0 %v3159_v61  ;;  %v3171_v23 = vld [vmem:[%s4006_s1 + $0x50] sm:$0xff]  ;;  %v3278_v27 = vunpack.c.l.bf16 %v3348_v22 }
  0x28   : > { %3365 = vmatpush.bf16.msra.mxu3 %v3159_v61  ;;  %853 = vmatpush.bf16.msra.mxu1 %v3173_v11  ;;  %v3286_v61 = vunpack.c.l.bf16 %v3350_v50 }
  0x29   : > { %1039 = vmatpush.bf16.msra.mxu2 %v3185_v14 }
  0x2b   : > { %637 = vmatpush.bf16.msra.mxu0 %v3158_v5 }
  0x2c   : > { %3366 = vmatpush.bf16.msra.mxu3 %v3158_v5  ;;  %854 = vmatpush.bf16.msra.mxu1 %v3172_v18  ;;  %v3209_v18 = vld [vmem:[%s4006_s1 + $0x108] sm:$0xff] }
  0x2d   : > { %1040 = vmatpush.bf16.msra.mxu2 %v3184_v19 }
  0x2e   : > { %2346 = vperm.xlu2 %3391, %v2319_v28   ;;  %447 = vperm.xlu0 %3389, %v408_v29   ;;  %v3279_v28 = vunpack.c.h.bf16 %v3348_v22  ;;  %v3214_v29 = vld [vmem:[%s4006_s1 + $0x130] sm:$0xff] }
  0x2f   : > { %2349 = vperm.xlu1 %3390, %v2320_v30   ;;  %638 = vmatpush.bf16.msra.mxu0 %v3157_v10  ;;  %v3271_v30 = vunpack.c.h.bf16 %v3269_v20 }
  0x30   : > { %3367 = vmatpush.bf16.msra.mxu3 %v3157_v10  ;;  %855 = vmatpush.bf16.msra.mxu1 %v3171_v23  ;;  %v302_v23 = vld [vmem:[%s3567_s16 + $0x30] sm:$0xf] }
  0x31   : > { %1041 = vmatpush.bf16.msra.mxu2 %v3183_v26  ;;  %v323_v37 = vmul.f32 %v3579_v55, %v3271_v30 }
  0x33   : > { %639 = vmatpush.bf16.msra.mxu0 %v3156_v16 }
  0x34   : > { %3368 = vmatpush.bf16.msra.mxu3 %v3156_v16  ;;  %856 = vmatpush.bf16.msra.mxu1 %v3170_v31  ;;  %v331_v16 = vmul.f32 %v3579_v55, %v3287_v4  ;;  %v316_v31 = vunpack.c.l.bf16 %v302_v23 }
  0x35   : > { %1042 = vmatpush.bf16.msra.mxu2 %v3182_v33 }
  0x36   : > { %2337 = vperm.xlu2 %3391, %v2316_v34   ;;  %2343 = vperm.xlu0 %3389, %v2318_v35   ;;  %v326_v34 = vmul.f32 %v3579_v55, %v3278_v27  ;;  %v327_v35 = vmul.f32 %v3579_v55, %v3279_v28  ;;  %v334_v43 = vmul.f32 %v3579_v55, %v316_v31 }
  0x37   : > { %2340 = vperm.xlu1 %3390, %v2317_v36   ;;  %1446 = vmatpush.bf16.msrb.mxu0 %v3215_v21  ;;  %v3213_v36 = vld [vmem:[%s4006_s1 + $0x128] sm:$0xff] }
  0x38   : > { %857 = vmatpush.bf16.msra.mxu1 %v3169_v39  ;;  %v344_v44 = vadd.f32 %v3597_v62, %v326_v34  ;;  %v345_v45 = vadd.f32 %v3597_v62, %v327_v35  ;;  %1219 = vmatpush.bf16.msrb.mxu3 %v3202_v59  ;;  %v3199_v35 = vld [vmem:[%s4006_s1 + $0xe0] sm:$0xff] }
  0x3a   : > { %v358_v53 = vmax.f32 %v344_v44, 0.0  ;;  %v359_v54 = vmax.f32 %v345_v45, 0.0 }
  0x3b   : > { %1447 = vmatpush.bf16.msrb.mxu0 %v3214_v29  ;;  %v349_v29 = vadd.f32 %v3597_v62, %v331_v16 }
  0x3c   : > { %1220 = vmatpush.bf16.msrb.mxu3 %v3201_v8 }
  0x3e   : > { %2328 = vperm.xlu2 %3391, %v2313_v40   ;;  %2334 = vperm.xlu0 %3389, %v2315_v41  }
  0x3f   : > { %2331 = vperm.xlu1 %3390, %v2314_v42   ;;  %1448 = vmatpush.bf16.msrb.mxu0 %v3213_v36  ;;  %v3208_v36 = vld [vmem:[%s4006_s1 + $0x100] sm:$0xff] }
  0x43   : > { %1449 = vmatpush.bf16.msrb.mxu0 %v3212_v49 }
  0x46   : > { %450 = vperm.xlu2 %3391, %v409_v46   ;;  %2325 = vperm.xlu0 %3389, %v2312_v47   ;;  %v3274_v46 = vunpack.c.l.bf16 %v3347_v38  ;;  %v341_v47 = vadd.f32 %v3597_v62, %v323_v37 }
  0x47   : > { %2322 = vperm.xlu1 %3390, %v2311_v48   ;;  %v3275_v48 = vunpack.c.h.bf16 %v3347_v38  ;;  %1450 = vmatpush.bf16.msrb.mxu0 %v3211_v60 }
  0x48   : > { %v324_v56 = vmul.f32 %v3579_v55, %v3274_v46  ;;  %v355_v57 = vmax.f32 %v341_v47, 0.0  ;;  %v3198_v47 = vld [vmem:[%s4006_s1 + $0xd8] sm:$0xff] }
  0x49   : > { %v325_v58 = vmul.f32 %v3579_v55, %v3275_v48 }
  0x68   : > { %v430_v1 = vpop.permute.xlu2 %429 }
  0x69   : > { %vm458_vm8 = vcmp.eq.s32.totalorder %v430_v1, 1  ;;  %v3291_v1 = vunpack.c.h.bf16 %v3351_v52 }
  0x6a   : > { %v472_v12 = vsel %vm458_vm8, %v360_v7, 0.0  ;;  %v342_v7 = vadd.f32 %v3597_v62, %v324_v56  ;;  %v352_v56 = vadd.f32 %v3597_v62, %v334_v43  ;;  %v3241_v43 = vld [vmem:[%s4006_s1 + $0x1b8] sm:$0xff]  ;;  %vm1566_vm8 = vcmask 1045504  }
  0x6b   : > { %v333_v20 = vmul.f32 %v3579_v55, %v3291_v1  ;;  %1815 = vmatpush.bf16.msrb.mxu2 %v3241_v43 }
  0x6c   : > { %v356_v19 = vmax.f32 %v342_v7, 0.0 }
  0x6d   : > { %v351_v32 = vadd.f32 %v3597_v62, %v333_v20 }
  0x6f   : > { %v365_v45 = vmax.f32 %v351_v32, 0.0 }
  0x70   : > { %v433_v13 = vpop.permute.xlu2 %432 }
  0x71   : > { %vm459_vm9 = vcmp.eq.s32.totalorder %v433_v13, 1  ;;  %v3290_v13 = vunpack.c.l.bf16 %v3351_v52 }
  0x72   : > { %v473_v15 = vsel %vm459_vm9, %v361_v9, 0.0  ;;  %v3210_v9 = vld [vmem:[%s4006_s1 + $0x110] sm:$0xff]  ;;  %vm2162_vm9 = vcmask 1044480  }
  0x73   : > { %v3310_v17 = vpack.c.bf16 %v473_v15, %v472_v12  ;;  %v343_v12 = vadd.f32 %v3597_v62, %v325_v58  ;;  %v330_v15 = vmul.f32 %v3579_v55, %v3286_v61  ;;  %1451 = vmatpush.bf16.msrb.mxu0 %v3210_v9  ;;  %v332_v22 = vmul.f32 %v3579_v55, %v3290_v13 }
  0x75   : > { %3354 = vst [vmem:[#allocation2 + $0x18] sm:$0xff] %v3310_v17   ;;  %v3200_v17 = vld [vmem:[%s4006_s1 + $0xe8] sm:$0xff]  ;;  %v357_v21 = vmax.f32 %v343_v12, 0.0  ;;  %v348_v27 = vadd.f32 %v3597_v62, %v330_v15  ;;  %v350_v34 = vadd.f32 %v3597_v62, %v332_v22  ;;  %v366_v62 = vmax.f32 %v352_v56, 0.0 }
  0x76   : > { %1221 = vmatpush.bf16.msrb.mxu3 %v3200_v17  ;;  %v3195_v17 = vld [vmem:[%s4006_s1 + $0xc0] sm:$0xff]  ;;  %v3226_v56 = vld [vmem:[%s4006_s1 + $0x168] sm:$0xff] }
  0x77   : > { %1452 = vmatpush.bf16.msrb.mxu0 %v3209_v18  ;;  %v362_v39 = vmax.f32 %v348_v27, 0.0  ;;  %v364_v46 = vmax.f32 %v350_v34, 0.0 }
  0x78   : > { %v3643_v24 = vpop.permute.xlu2 %435 }
  0x79   : > { %vm460_vm0 = vcmp.eq.s32.totalorder %v3643_v24, 1 }
  0x7a   : > { %1222 = vmatpush.bf16.msrb.mxu3 %v3199_v35 }
  0x7b   : > { %1453 = vmatpush.bf16.msrb.mxu0 %v3208_v36 }
  0x7c   : > { %v3154_v16 = vld [vmem:[#allocation2 + $0x18] sm:$0xff] }
  0x7e   : > { %1223 = vmatpush.bf16.msrb.mxu3 %v3198_v47 }
  0x80   : > { %v3668_v40 = vpop.permute.xlu2 %444  ;;  %v424_v41 = vpop.permute.xlu0 %423 }
  0x81   : > { %v412_v42 = vpop.permute.xlu1 %411  ;;  %vm456_vm11 = vcmp.eq.s32.totalorder %v424_v41, 1  ;;  %vm463_vm1 = vcmp.eq.s32.totalorder %v3668_v40, 1  ;;  %v3197_v40 = vld [vmem:[%s4006_s1 + $0xd0] sm:$0xff] }
  0x82   : > { %vm452_vm10 = vcmp.eq.s32.totalorder %v412_v42, 1  ;;  %v470_v5 = vsel %vm456_vm11, %v358_v53, 0.0  ;;  %v363_v42 = vmax.f32 %v349_v29, 0.0  ;;  %v474_v53 = vsel %vm460_vm0, %v362_v39, 0.0  ;;  %1224 = vmatpush.bf16.msrb.mxu3 %v3197_v40 }
  0x83   : > { %v466_v2 = vsel %vm452_vm10, %v354_v51, 0.0  ;;  %vm1935_vm10 = vsmask.f32 5376 }
  0x88   : > { %v3687_v63 = vpop.permute.xlu2 %2346  ;;  %v427_v0 = vpop.permute.xlu0 %426 }
  0x89   : > { %vm457_vm12 = vcmp.eq.s32.totalorder %v427_v0, 1  ;;  %v415_v3 = vpop.permute.xlu1 %414 }
  0x8a   : > { %v471_v6 = vsel %vm457_vm12, %v359_v54, 0.0  ;;  %vm453_vm13 = vcmp.eq.s32.totalorder %v415_v3, 1 }
  0x8b   : > { %v3305_v10 = vpack.c.bf16 %v471_v6, %v470_v5  ;;  %v467_v11 = vsel %vm453_vm13, %v355_v57, 0.0  ;;  %v477_v57 = vsel %vm463_vm1, %v365_v45, 0.0  ;;  %vm2359_vm13 = vcmp.eq.s32.totalorder %v3687_v63, 1 }
  0x8c   : > { %v3295_v14 = vpack.c.bf16 %v467_v11, %v466_v2  ;;  %v3196_v2 = vld [vmem:[%s4006_s1 + $0xc8] sm:$0xff] }
  0x8d   : > { %3353 = vst [vmem:[#allocation2 + $0x10] sm:$0xff] %v3305_v10   ;;  %1225 = vmatpush.bf16.msrb.mxu3 %v3196_v2  ;;  %v3225_v2 = vld [vmem:[%s4006_s1 + $0x160] sm:$0xff] }
  0x8e   : > { %3296 = vst [vmem:[#allocation2] sm:$0xff] %v3295_v14  }
  0x90   : > { %v3708_v25 = vpop.permute.xlu2 %2337  ;;  %v418_v26 = vpop.permute.xlu0 %417 }
  0x91   : > { %vm454_vm14 = vcmp.eq.s32.totalorder %v418_v26, 1  ;;  %v421_v28 = vpop.permute.xlu1 %420  ;;  %1226 = vmatpush.bf16.msrb.mxu3 %v3195_v17  ;;  %v3236_v17 = vld [vmem:[%s4006_s1 + $0x190] sm:$0xff]  ;;  %vm2356_vm12 = vcmp.eq.s32.totalorder %v3708_v25, 1 }
  0x92   : > { %v468_v30 = vsel %vm454_vm14, %v356_v19, 0.0  ;;  %vm455_vm15 = vcmp.eq.s32.totalorder %v421_v28, 1 }
  0x93   : > { %v469_v33 = vsel %vm455_vm15, %v357_v21, 0.0 }
  0x94   : > { %v3300_v37 = vpack.c.bf16 %v469_v33, %v468_v30  ;;  %v3153_v38 = vld [vmem:[#allocation2 + $0x10] sm:$0xff] }
  0x95   : > { %v3151_v41 = vld [vmem:[#allocation2] sm:$0xff]  ;;  %650 = vmatmul.bf16.vlgmr.msra.gmra.mxu3 %v3153_v38  ;;  %v3166_v22 = vld [vmem:[#allocation2 + $0x10] sm:$0xff] }
  0x96   : > { %3352 = vst [vmem:[#allocation2 + $0x8] sm:$0xff] %v3300_v37   ;;  %v3164_v44 = vld [vmem:[#allocation2] sm:$0xff]  ;;  %640 = vmatmul.bf16.vlgmr.msra.gmra.mxu0 %v3151_v41  ;;  %v3179_v29 = vld [vmem:[#allocation2 + $0x10] sm:$0xff]  ;;  %v769_v31 = vshll.u32 %v3166_v22, 16 }
  0x97   : > { %v2679_v50 = vld [vmem:[#allocation2] sm:$0xe]  ;;  %v3177_v51 = vld [vmem:[#allocation2] sm:$0xf0]  ;;  %v756_v52 = vshll.u32 %v3164_v44, 16  ;;  %v754_v3 = vshrl.u32 %v3164_v44, 16 }
  0x98   : > { %v3726_v48 = vpop.permute.xlu2 %2328  ;;  %v439_v49 = vpop.permute.xlu0 %438  ;;  %v2680_v60 = vor.u32 %v3177_v51, %v2679_v50  ;;  %v2815_v19 = vld [vmem:[#allocation2 + $0x4] sm:$0xe]  ;;  %v974_v36 = vrot.slane %v3179_v29, 1  ;;  %v771_v39 = vrot.slane %v769_v31, 1  ;;  %v3240_v50 = vld [vmem:[%s4006_s1 + $0x1b0] sm:$0xff] }
  0x99   : > { %vm461_vm2 = vcmp.eq.s32.totalorder %v439_v49, 1  ;;  %v442_v55 = vpop.permute.xlu1 %441  ;;  %v758_v0 = vrot.slane %v756_v52, 1  ;;  %v3751_v49 = vld [vmem:[#allocation2 + $0x18] sm:$0xff]  ;;  %v3227_v51 = vld [vmem:[%s4006_s1 + $0x170] sm:$0xff]  ;;  %1816 = vmatpush.bf16.msrb.mxu2 %v3240_v50  ;;  %v3234_v31 = vld [vmem:[%s4006_s1 + $0x180] sm:$0xff]  ;;  %vm2353_vm11 = vcmp.eq.s32.totalorder %v3726_v48, 1 }
  0x9a   : > { %v475_v54 = vsel %vm461_vm2, %v363_v42, 0.0  ;;  %vm462_vm3 = vcmp.eq.s32.totalorder %v442_v55, 1  ;;  %v971_v4 = vrot.slane %v2680_v60, 1  ;;  %v3205_v52 = vld [vmem:[#allocation2 + $0x14] sm:$0xff]  ;;  %v3239_v55 = vld [vmem:[%s4006_s1 + $0x1a8] sm:$0xff]  ;;  %v777_v40 = vshll.u32 %v3751_v49, 16 }
  0x9b   : > { %v3315_v58 = vpack.c.bf16 %v475_v54, %v474_v53  ;;  %v476_v59 = vsel %vm462_vm3, %v364_v46, 0.0  ;;  %v759_v9 = vor.u32 %v758_v0, %v754_v3  ;;  %v3228_v46 = vld [vmem:[%s4006_s1 + $0x178] sm:$0xff] }
  0x9c   : > { %v3320_v61 = vpack.c.bf16 %v477_v57, %v476_v59  ;;  %1631 = vmatpush.bf16.msrb.mxu1 %v3228_v46  ;;  %v3759_v53 = vld [vmem:[#allocation2 + $0x18] sm:$0xff]  ;;  %v2747_v57 = vld [vmem:[#allocation2 + $0x4] sm:$0xe]  ;;  %v1361_v59 = vshll.u32 %v3205_v52, 16  ;;  %v779_v3 = vrot.slane %v777_v40, 1  ;;  %v3253_v40 = vld [vmem:[%s4006_s1 + $0x1f0] sm:$0xff] }
  0x9d   : > { %3355 = vst [vmem:[#allocation2 + $0x20] sm:$0xff] %v3315_v58   ;;  %v3178_v24 = vld [vmem:[#allocation2 + $0x8] sm:$0xff]  ;;  %v1358_v58 = vshrl.u32 %v3205_v52, 16  ;;  %v976_v60 = vrot.slane %v3759_v53, 1  ;;  %1817 = vmatpush.bf16.msrb.mxu2 %v3239_v55  ;;  %v3254_v55 = vld [vmem:[%s4006_s1 + $0x1f8] sm:$0xff] }
  0x9e   : > { %v3165_v1 = vld [vmem:[#allocation2 + $0x8] sm:$0xff]  ;;  %3356 = vst [vmem:[#allocation2 + $0x28] sm:$0xff] %v3320_v61   ;;  %v972_v5 = vrot.slane %v3178_v24, 1  ;;  %v773_v61 = vshrl.u32 %v3166_v22, 16  ;;  %v3266_v22 = vld [vmem:[%s4006_s1 + $0x230] sm:$0xff]  ;;  %3369 = vmatpush.bf16.msra.mxu3 %v3254_v55 }
  0x9f   : > { %v761_v6 = vshll.u32 %v3165_v1, 16  ;;  %v3203_v15 = vld [vmem:[#allocation2 + $0x4] sm:$0xf0]  ;;  %v3204_v20 = vld [vmem:[#allocation2 + $0xc] sm:$0xff]  ;;  %v765_v30 = vshrl.u32 %v3165_v1, 16  ;;  %v3238_v1 = vld [vmem:[%s4006_s1 + $0x1a0] sm:$0xff] }
  0xa0   : > { %v451_v7 = vpop.permute.xlu2 %450  ;;  %v448_v8 = vpop.permute.xlu0 %447  ;;  %v973_v10 = vsel %vm970_vm4, %v971_v4, %v972_v5  ;;  %v3152_v18 = vld [vmem:[#allocation2 + $0x8] sm:$0xff]  ;;  %v2816_v21 = vor.u32 %v3203_v15, %v2815_v19  ;;  %v1349_v27 = vshrl.u32 %v3204_v20, 16  ;;  %v1352_v28 = vshll.u32 %v3204_v20, 16  ;;  %1632 = vmatpush.bf16.msrb.mxu1 %v3227_v51  ;;  %v3223_v19 = vld [vmem:[%s4006_s1 + $0x150] sm:$0xff] }
  0xa1   : > { %vm464_vm5 = vcmp.eq.s32.totalorder %v448_v8, 1  ;;  %v763_v11 = vrot.slane %v761_v6, 1  ;;  %1043 = vmatmul.bf16.vlgmr.msra.gmra.mxu2 %v973_v10  ;;  %v975_v38 = vsel %vm970_vm4, %v972_v5, %v974_v36  ;;  %v3190_v54 = vld [vmem:[#allocation2 + $0x4] sm:$0xf0]  ;;  %v3769_v0 = vld [vmem:[#allocation2 + $0xc] sm:$0xff]  ;;  %v1360_v4 = vrot.slane %v1358_v58, 1 }
  0xa2   : > { %v478_v12 = vsel %vm464_vm5, %v366_v62, 0.0  ;;  %v1341_v23 = vshrl.u32 %v2816_v21, 16  ;;  %v1344_v26 = vshll.u32 %v2816_v21, 16  ;;  %v1351_v34 = vrot.slane %v1349_v27, 1  ;;  %1818 = vmatpush.bf16.msrb.mxu2 %v3238_v1  ;;  %v3235_v21 = vld [vmem:[%s4006_s1 + $0x188] sm:$0xff]  ;;  %3370 = vmatpush.bf16.msra.mxu3 %v3253_v40 }
  0xa3   : > { %v492_v13 = vpack.c.bf16 %v478_v12, %v478_v12  ;;  %v764_v14 = vsel %vm752_vm6, %v759_v9, %v763_v11  ;;  %v1354_v35 = vrot.slane %v1352_v28, 2  ;;  %v767_v37 = vor.u32 %v765_v30, %v763_v11  ;;  %v3237_v9 = vld [vmem:[%s4006_s1 + $0x198] sm:$0xff]  ;;  %v3222_v27 = vld [vmem:[%s4006_s1 + $0x148] sm:$0xff] }
  0xa4   : > { %858 = vmatmul.bf16.vlgmr.msra.gmra.mxu1 %v764_v14  ;;  %v1343_v32 = vrot.slane %v1341_v23, 1  ;;  %v1346_v33 = vrot.slane %v1344_v26, 2  ;;  %v3155_v45 = vld [vmem:[#allocation2 + $0x20] sm:$0xff]  ;;  %v2748_v24 = vor.u32 %v3190_v54, %v2747_v57  ;;  %v775_v62 = vor.u32 %v773_v61, %v771_v39  ;;  %v3224_v12 = vld [vmem:[%s4006_s1 + $0x158] sm:$0xff]  ;;  %v3252_v1 = vld [vmem:[%s4006_s1 + $0x1e8] sm:$0xff] }
  0xa5   : > { %506 = vst [vmem:[#allocation2 + $0x30] sm:$0xf] %v492_v13  ;;  %655 = vmatmul.bf16.gmra.mxu3 %v3154_v16  ;;  %v1355_v42 = vor.u32 %v1354_v35, %v1351_v34  ;;  %v772_v44 = vsel %vm752_vm6, %v767_v37, %v771_v39  ;;  %1633 = vmatpush.bf16.msrb.mxu1 %v3226_v56  ;;  %v1363_v5 = vrot.slane %v1361_v59, 2  ;;  %v1156_v8 = vrot.slane %v3769_v0, 1  ;;  %v3788_v15 = vld [vmem:[#allocation2 + $0x20] sm:$0xff]  ;;  %v3192_v37 = vld [vmem:[#allocation2 + $0x14] sm:$0xff] }
  0xa6   : > { %645 = vmatmul.bf16.gmra.mxu0 %v3152_v18  ;;  %v1347_v41 = vor.u32 %v1346_v33, %v1343_v32  ;;  %v977_v6 = vsel %vm970_vm4, %v974_v36, %v976_v60  ;;  %v1155_v7 = vrot.slane %v2748_v24, 1  ;;  %v780_v10 = vsel %vm752_vm6, %v775_v62, %v779_v3  ;;  %1819 = vmatpush.bf16.msrb.mxu2 %v3237_v9  ;;  %v3206_v16 = vld [vmem:[#allocation2 + $0x1c] sm:$0xff]  ;;  %v3265_v32 = vld [vmem:[%s4006_s1 + $0x228] sm:$0xff]  ;;  %v3262_v59 = vld [vmem:[%s4006_s1 + $0x210] sm:$0xff] }
  0xa7   : > { %v1364_v11 = vor.u32 %v1363_v5, %v1360_v4  ;;  %v3267_v18 = vld [vmem:[%s4006_s1 + $0x238] sm:$0xff]  ;;  %v3799_v20 = vld [vmem:[#allocation2 + $0x20] sm:$0xff]  ;;  %v1367_v23 = vshrl.u32 %v3206_v16, 16  ;;  %v1370_v26 = vshll.u32 %v3206_v16, 16  ;;  %v785_v28 = vshll.u32 %v3788_v15, 16  ;;  %3371 = vmatpush.bf16.msra.mxu3 %v3252_v1 }
  0xa8   : > { %v1356_v47 = vsel %vm1339_vm7, %v1347_v41, %v1355_v42  ;;  %v1157_v13 = vsel %vm970_vm4, %v1155_v7, %v1156_v8  ;;  %2227 = vmatpush.bf16.msra.mxu0 %v3267_v18  ;;  %v978_v29 = vrot.slane %v3799_v20, 1  ;;  %v781_v30 = vshrl.u32 %v3751_v49, 16  ;;  %v3221_v35 = vld [vmem:[%s4006_s1 + $0x140] sm:$0xff]  ;;  %v924_v43 = vld [vmem:[#allocation2 + $0x28] sm:$0x1]  ;;  %v3263_v54 = vld [vmem:[%s4006_s1 + $0x218] sm:$0xff] }
  0xa9   : > { %1634 = vmatpush.bf16.msrb.mxu1 %v3225_v2  ;;  %v1365_v14 = vsel %vm1339_vm7, %v1355_v42, %v1364_v11  ;;  %v1369_v33 = vrot.slane %v1367_v23, 1  ;;  %v1372_v34 = vrot.slane %v1370_v26, 2  ;;  %v787_v36 = vrot.slane %v785_v28, 1  ;;  %v3207_v52 = vld [vmem:[#allocation2 + $0x24] sm:$0xff]  ;;  %v3842_v24 = vld [vmem:[#allocation2 + $0x1c] sm:$0xff]  ;;  %v3217_v28 = vld [vmem:[#allocation2 + $0xc] sm:$0xff] }
  0xaa   : > { %1820 = vmatpush.bf16.msrb.mxu2 %v3236_v17  ;;  %v979_v39 = vsel %vm970_vm4, %v976_v60, %v978_v29  ;;  %v783_v41 = vor.u32 %v781_v30, %v779_v3  ;;  %v963_v50 = vunpack.c.l.b16 %v924_v43  ;;  %v1376_v57 = vshrl.u32 %v3207_v52, 16  ;;  %v3261_v3 = vld [vmem:[%s4006_s1 + $0x208] sm:$0xff]  ;;  %v3249_v30 = vld [vmem:[%s4006_s1 + $0x1d0] sm:$0xff] }
  0xab   : > { %v1373_v42 = vor.u32 %v1372_v34, %v1369_v33  ;;  %v1379_v58 = vshll.u32 %v3207_v52, 16  ;;  %v789_v0 = vshrl.u32 %v3788_v15, 16  ;;  %v2951_v16 = vld [vmem:[#allocation2 + $0x8] sm:$0xc]  ;;  %v3229_v17 = vld [vmem:[#allocation2 + $0x8] sm:$0xf0] }
  0xac   : > { %2228 = vmatpush.bf16.msra.mxu0 %v3266_v22  ;;  %v969_v56 = vpack.c.b16 %v963_v50, %v963_v50  ;;  %v1378_v2 = vrot.slane %v1376_v57, 1  ;;  %v3216_v20 = vld [vmem:[#allocation2 + $0x4] sm:$0xf0]  ;;  %v2883_v22 = vld [vmem:[#allocation2 + $0x4] sm:$0xc]  ;;  %vm2371_vm5 = vcmask 654336  }
  0xad   : > { %1635 = vmatpush.bf16.msrb.mxu1 %v3224_v12  ;;  %v1374_v51 = vsel %vm1339_vm7, %v1364_v11, %v1373_v42  ;;  %v1381_v62 = vrot.slane %v1379_v58, 2  ;;  %v791_v4 = vor.u32 %v789_v0, %v787_v36  ;;  %v3251_v12 = vld [vmem:[%s4006_s1 + $0x1e0] sm:$0xff]  ;;  %v3255_v52 = vld [vmem:[#allocation2 + $0x8] sm:$0xf0] }
  0xae   : > { %1821 = vmatpush.bf16.msrb.mxu2 %v3235_v21  ;;  %v980_v61 = vrot.slane %v969_v56, 1  ;;  %3372 = vmatpush.bf16.msra.mxu3 %v3251_v12  ;;  %v2952_v21 = vor.u32 %v3229_v17, %v2951_v16 }
  0xaf   : > { %v1382_v9 = vor.u32 %v1381_v62, %v1378_v2  ;;  %v3244_v2 = vld [vmem:[#allocation2 + $0x18] sm:$0xff] }
  0xb0   : > { %2229 = vmatpush.bf16.msra.mxu0 %v3265_v32  ;;  %v981_v7 = vsel %vm970_vm4, %v978_v29, %v980_v61  ;;  %v2884_v29 = vor.u32 %v3216_v20, %v2883_v22  ;;  %v3194_v32 = vld [vmem:[#allocation2 + $0x24] sm:$0xff] }
  0xb1   : > { %1048 = vmatmul.bf16.gmra.mxu2 %v975_v38  ;;  %1636 = vmatpush.bf16.msrb.mxu1 %v3223_v19  ;;  %v706_v38 = vld [vmem:[#allocation2 + $0x28] sm:$0x1]  ;;  %v1383_v15 = vsel %vm1339_vm7, %v1373_v42, %v1382_v9  ;;  %v3250_v19 = vld [vmem:[%s4006_s1 + $0x1d8] sm:$0xff] }
  0xb2   : > { %1822 = vmatpush.bf16.msrb.mxu2 %v3234_v31  ;;  %v745_v46 = vunpack.c.l.b16 %v706_v38  ;;  %3373 = vmatpush.bf16.msra.mxu3 %v3250_v19  ;;  %v1751_v31 = vrot.slane %v2952_v21, 2  ;;  %v3248_v38 = vld [vmem:[%s4006_s1 + $0x1c8] sm:$0xff] }
  0xb4   : > { %863 = vmatmul.bf16.gmra.mxu1 %v772_v44  ;;  %v788_v44 = vsel %vm752_vm6, %v783_v41, %v787_v36  ;;  %v751_v53 = vpack.c.b16 %v745_v46, %v745_v46  ;;  %v1567_v36 = vrot.slane %v2884_v29, 2  ;;  %v1162_v41 = vrot.slane %v3194_v32, 1 }
  0xb5   : > { %660 = vmatmul.bf16.gmra.mxu3 %v3155_v45  ;;  %1637 = vmatpush.bf16.msrb.mxu1 %v3222_v27  ;;  %v1158_v45 = vrot.slane %v3192_v37, 1  ;;  %v3230_v27 = vld [vmem:[#allocation2 + $0x10] sm:$0xff]  ;;  %v1568_v37 = vrot.slane %v3217_v28, 2  ;;  %v3233_v28 = vld [vmem:[#allocation2 + $0x28] sm:$0xff] }
  0xb6   : > { %1454 = vmatmul.bf16.vlgmr.msrb.gmra.mxu0 %v1356_v47  ;;  %v3264_v47 = vld [vmem:[%s4006_s1 + $0x220] sm:$0xff]  ;;  %v793_v60 = vshll.u32 %v751_v53, 16  ;;  %3374 = vmatpush.bf16.msra.mxu3 %v3249_v30 }
  0xb7   : > { %v1159_v49 = vsel %vm970_vm4, %v1156_v8, %v1158_v45  ;;  %2230 = vmatpush.bf16.msra.mxu0 %v3264_v47  ;;  %v1160_v8 = vrot.slane %v3842_v24, 1  ;;  %v1569_v43 = vsel %vm1566_vm8, %v1567_v36, %v1568_v37  ;;  %v1109_v47 = vld [vmem:[#allocation2 + $0x2c] sm:$0x1]  ;;  %v3258_v36 = vld [vmem:[#allocation2 + $0x20] sm:$0xff] }
  0xb8   : > { %v795_v5 = vrot.slane %v793_v60, 1  ;;  %v1148_v50 = vunpack.c.l.b16 %v1109_v47 }
  0xb9   : > { %1638 = vmatpush.bf16.msrb.mxu1 %v3221_v35  ;;  %v1752_v35 = vrot.slane %v3230_v27, 2 }
  0xba   : > { %v796_v11 = vsel %vm752_vm6, %v791_v4, %v795_v5  ;;  %3375 = vmatpush.bf16.msra.mxu3 %v3248_v38 }
  0xbb   : > { %2231 = vmatpush.bf16.msra.mxu0 %v3263_v54  ;;  %v1154_v54 = vpack.c.b16 %v1148_v50, %v1148_v50 }
  0xbd   : > { %2042 = vmatpush.bf16.msra.mxu1 %v3254_v55  ;;  %v3218_v55 = vld [vmem:[#allocation2 + $0x14] sm:$0xff] }
  0xbe   : > { %v1570_v58 = vrot.slane %v3218_v55, 2 }
  0xbf   : > { %2232 = vmatpush.bf16.msra.mxu0 %v3262_v59  ;;  %v1164_v59 = vrot.slane %v1154_v54, 1 }
  0xc0   : > { %v1571_v61 = vsel %vm1566_vm8, %v1568_v37, %v1570_v58 }
  0xc1   : > { %1053 = vmatmul.bf16.gmra.mxu2 %v977_v6  ;;  %2043 = vmatpush.bf16.msra.mxu1 %v3253_v40  ;;  %v1293_v6 = vld [vmem:[#allocation2 + $0x2c] sm:$0x3]  ;;  %v3256_v40 = vld [vmem:[#allocation2 + $0x10] sm:$0xff]  ;;  %v1165_v24 = vsel %vm970_vm4, %v1162_v41, %v1164_v59 }
  0xc2   : > { %v2164_v0 = vrot.slane %v3256_v40, 3 }
  0xc3   : > { %2233 = vmatpush.bf16.msra.mxu0 %v3261_v3  ;;  %v3232_v3 = vld [vmem:[#allocation2 + $0x20] sm:$0xff] }
  0xc4   : > { %868 = vmatmul.bf16.gmra.mxu1 %v780_v10  ;;  %v1332_v10 = vunpack.c.l.b16 %v1293_v6  ;;  %v1954_v6 = vshrl.u32 %v3244_v2, 16 }
  0xc5   : > { %1227 = vmatmul.bf16.vlgmr.msrb.gmra.mxu3 %v1157_v13  ;;  %2044 = vmatpush.bf16.msra.mxu1 %v3252_v1  ;;  %v3260_v13 = vld [vmem:[%s4006_s1 + $0x200] sm:$0xff]  ;;  %v3243_v1 = vld [vmem:[#allocation2 + $0x10] sm:$0xff] }
  0xc6   : > { %1459 = vmatmul.bf16.gmra.mxu0 %v1365_v14  ;;  %v1161_v14 = vsel %vm970_vm4, %v1158_v45, %v1160_v8  ;;  %v1338_v18 = vpack.c.b16 %v1332_v10, %v1332_v10  ;;  %v1163_v45 = vsel %vm970_vm4, %v1160_v8, %v1162_v41  ;;  %v1945_v4 = vshrl.u32 %v3243_v1, 16  ;;  %v3219_v8 = vld [vmem:[#allocation2 + $0x1c] sm:$0xff] }
  0xc7   : > { %2234 = vmatpush.bf16.msra.mxu0 %v3260_v13  ;;  %v1948_v5 = vshll.u32 %v3243_v1, 16 }
  0xc8   : > { %v1385_v23 = vshrl.u32 %v1338_v18, 16  ;;  %v1388_v26 = vshll.u32 %v1338_v18, 16  ;;  %v1947_v10 = vrot.slane %v1945_v4, 2 }
  0xc9   : > { %2045 = vmatpush.bf16.msra.mxu1 %v3251_v12  ;;  %v1956_v12 = vrot.slane %v1954_v6, 2  ;;  %v1889_v6 = vld [vmem:[#allocation2 + $0x30] sm:$0x7] }
  0xca   : > { %v1387_v33 = vrot.slane %v1385_v23, 1  ;;  %v1390_v34 = vrot.slane %v1388_v26, 2  ;;  %v3245_v23 = vld [vmem:[#allocation2 + $0x20] sm:$0xff] }
  0xcb   : > { %v1963_v29 = vshrl.u32 %v3245_v23, 16 }
  0xcc   : > { %v1391_v42 = vor.u32 %v1390_v34, %v1387_v33  ;;  %v1758_v33 = vrot.slane %v3233_v28, 2 }
  0xcd   : > { %2046 = vmatpush.bf16.msra.mxu1 %v3250_v19  ;;  %v1965_v34 = vrot.slane %v1963_v29, 2 }
  0xce   : > { %v1392_v46 = vsel %vm1339_vm7, %v1382_v9, %v1391_v42  ;;  %v1756_v9 = vrot.slane %v3232_v3, 2 }
  0xd0   : > { %v1759_v41 = vsel %vm1566_vm8, %v1756_v9, %v1758_v33 }
  0xd1   : > { %1058 = vmatmul.bf16.gmra.mxu2 %v979_v39  ;;  %2047 = vmatpush.bf16.msra.mxu1 %v3249_v30  ;;  %v1753_v39 = vsel %vm1566_vm8, %v1751_v31, %v1752_v35  ;;  %v1966_v30 = vshll.u32 %v3245_v23, 16  ;;  %v3220_v31 = vld [vmem:[#allocation2 + $0x24] sm:$0xff] }
  0xd2   : > { %v1574_v37 = vrot.slane %v3220_v31, 2  ;;  %v2116_v31 = vld [vmem:[#allocation2 + $0x30] sm:$0x7] }
  0xd4   : > { %873 = vmatmul.bf16.gmra.mxu1 %v788_v44  ;;  %v3247_v44 = vld [vmem:[%s4006_s1 + $0x1c0] sm:$0xff] }
  0xd5   : > { %1232 = vmatmul.bf16.gmra.mxu3 %v1159_v49  ;;  %2048 = vmatpush.bf16.msra.mxu1 %v3248_v38  ;;  %v3231_v49 = vld [vmem:[#allocation2 + $0x18] sm:$0xff] }
  0xd6   : > { %1464 = vmatmul.bf16.gmra.mxu0 %v1374_v51  ;;  %3376 = vmatpush.bf16.msra.mxu3 %v3247_v44  ;;  %v3087_v51 = vld [vmem:[#allocation2 + $0x8] sm:$0x8]  ;;  %v1754_v53 = vrot.slane %v3231_v49, 2  ;;  %v1520_v49 = vld [vmem:[#allocation2 + $0x2c] sm:$0x3] }
  0xd7   : > { %v3088_v56 = vor.u32 %v3255_v52, %v3087_v51 }
  0xd8   : > { %v1755_v57 = vsel %vm1566_vm8, %v1752_v35, %v1754_v53  ;;  %v1757_v16 = vsel %vm1566_vm8, %v1754_v53, %v1756_v9  ;;  %v1968_v35 = vrot.slane %v1966_v30, 3  ;;  %v3246_v53 = vld [vmem:[#allocation2 + $0x28] sm:$0xff] }
  0xd9   : > { %2049 = vmatpush.bf16.msra.mxu1 %v3247_v44  ;;  %v2163_v60 = vrot.slane %v3088_v56, 3  ;;  %v2168_v44 = vrot.slane %v3258_v36, 3  ;;  %v1559_v56 = vunpack.c.l.b16 %v1520_v49  ;;  %v1972_v59 = vshrl.u32 %v3246_v53, 16  ;;  %v3242_v9 = vld [vmem:[#allocation2 + $0x8] sm:$0xf0] }
  0xda   : > { %v1969_v42 = vor.u32 %v1968_v35, %v1965_v34 }
  0xdb   : > { %v2165_v62 = vsel %vm2162_vm9, %v2163_v60, %v2164_v0  ;;  %v1975_v60 = vshll.u32 %v3246_v53, 16 }
  0xdd   : > { %v1977_v3 = vrot.slane %v1975_v60, 3 }
  0xe1   : > { %1063 = vmatmul.bf16.gmra.mxu2 %v981_v7  ;;  %v1957_v7 = vshll.u32 %v3244_v2, 16 }
  0xe3   : > { %v1959_v13 = vrot.slane %v1957_v7, 3 }
  0xe4   : > { %878 = vmatmul.bf16.gmra.mxu1 %v796_v11  ;;  %v1950_v11 = vrot.slane %v1948_v5, 3  ;;  %v3259_v5 = vld [vmem:[#allocation2 + $0x28] sm:$0xff] }
  0xe5   : > { %1237 = vmatmul.bf16.gmra.mxu3 %v1161_v14  ;;  %v3257_v14 = vld [vmem:[#allocation2 + $0x18] sm:$0xff]  ;;  %v1960_v18 = vor.u32 %v1959_v13, %v1956_v12 }
  0xe6   : > { %1469 = vmatmul.bf16.gmra.mxu0 %v1383_v15  ;;  %v1572_v15 = vrot.slane %v3219_v8, 2  ;;  %v3882_v17 = vor.u32 %v1950_v11, %v1947_v10  ;;  %v2166_v19 = vrot.slane %v3257_v14, 3  ;;  %v3019_v8 = vld [vmem:[#allocation2 + $0x8] sm:$0xc]  ;;  %v1928_v14 = vunpack.c.l.b16 %v1889_v6 }
  0xe7   : > { %v1970_v51 = vsel %vm1935_vm10, %v1960_v18, %v1969_v42 }
  0xe8   : > { %v1573_v20 = vsel %vm1566_vm8, %v1570_v58, %v1572_v15  ;;  %v1961_v22 = vsel %vm1935_vm10, %v3882_v17, %v1960_v18  ;;  %v2167_v26 = vsel %vm2162_vm9, %v2164_v0, %v2166_v19  ;;  %v2169_v54 = vsel %vm2162_vm9, %v2166_v19, %v2168_v44 }
  0xe9   : > { %v1565_v0 = vpack.c.b16 %v1559_v56, %v1559_v56  ;;  %v3020_v19 = vor.u32 %v3242_v9, %v3019_v8  ;;  %v1934_v23 = vpack.c.b16 %v1928_v14, %v1928_v14 }
  0xeb   : > { %v1576_v7 = vrot.slane %v1565_v0, 2  ;;  %v1937_v29 = vshrl.u32 %v3020_v19, 16  ;;  %v1940_v30 = vshll.u32 %v3020_v19, 16  ;;  %v1981_v34 = vshrl.u32 %v1934_v23, 16 }
  0xec   : > { %v1984_v35 = vshll.u32 %v1934_v23, 16 }
  0xed   : > { %v1577_v18 = vsel %vm1566_vm8, %v1574_v37, %v1576_v7 }
  0xf1   : > { %1823 = vmatmul.bf16.vlgmr.msrb.gmra.mxu2 %v1753_v39 }
  0xf4   : > { %1639 = vmatmul.bf16.vlgmr.msrb.gmra.mxu1 %v1569_v43 }
  0xf5   : > { %1242 = vmatmul.bf16.gmra.mxu3 %v1163_v45  ;;  %v1705_v45 = vld [vmem:[#allocation2 + $0x30] sm:$0x3] }
  0xf6   : > { %1474 = vmatmul.bf16.gmra.mxu0 %v1392_v46  ;;  %v1575_v46 = vsel %vm1566_vm8, %v1572_v15, %v1574_v37  ;;  %v1744_v52 = vunpack.c.l.b16 %v1705_v45  ;;  %v2155_v37 = vunpack.c.l.b16 %v2116_v31 }
  0xf8   : > { %v1750_v58 = vpack.c.b16 %v1744_v52, %v1744_v52  ;;  %v2161_v49 = vpack.c.b16 %v2155_v37, %v2155_v37 }
  0xfa   : > { %v1760_v2 = vrot.slane %v1750_v58, 2 }
  0xfc   : > { %v1761_v12 = vsel %vm1566_vm8, %v1758_v33, %v1760_v2 }
 0x101   : > { %1828 = vmatmul.bf16.gmra.mxu2 %v1755_v57 }
 0x104   : > { %1644 = vmatmul.bf16.gmra.mxu1 %v1571_v61 }
 0x105   : > { %1247 = vmatmul.bf16.gmra.mxu3 %v1165_v24 }
 0x106   : > { %2235 = vmatmul.bf16.vlgmr.msra.gmra.mxu0 %v2165_v62  ;;  %v1974_v62 = vrot.slane %v1972_v59, 2 }
 0x108   : > { %v1978_v13 = vor.u32 %v1977_v3, %v1974_v62 }
 0x111   : > { %1833 = vmatmul.bf16.gmra.mxu2 %v1757_v16  ;;  %v2170_v16 = vrot.slane %v3259_v5, 3 }
 0x113   : > { %v641_v21 = vpop.f32.mrf.mxu0  ;;  %v2171_v28 = vsel %vm2162_vm9, %v2168_v44, %v2170_v16 }
 0x114   : > { %1649 = vmatmul.bf16.gmra.mxu1 %v1573_v20 }
 0x115   : > { %2055 = vmatmul.bf16.vlgmr.msra.gmra.mxu3 %v1961_v22  ;;  %v1979_v22 = vsel %vm1935_vm10, %v1969_v42, %v1978_v13  ;;  %v1983_v42 = vrot.slane %v1981_v34, 2 }
 0x116   : > { %2240 = vmatmul.bf16.gmra.mxu0 %v2167_v26 }
 0x118   : > { %v3888_v27 = vpop.f32.mrf.mxu3 }
 0x11b   : > { %v643_v32 = vpop.f32.mrf.mxu0 }
 0x120   : > { %v3890_v39 = vpop.f32.mrf.mxu3 }
 0x121   : > { %v859_v38 = vpop.f32.mrf.mxu1  ;;  %1838 = vmatmul.bf16.gmra.mxu2 %v1759_v41  ;;  %v1942_v41 = vrot.slane %v1940_v30, 3 }
 0x122   : > { %v884_v43 = vadd.f32 %v859_v38, %v641_v21  ;;  %v1939_v38 = vrot.slane %v1937_v29, 2 }
 0x123   : > { %v646_v47 = vpop.f32.mrf.mxu0 }
 0x124   : > { %1654 = vmatmul.bf16.gmra.mxu1 %v1575_v46  ;;  %v1044_v50 = vpop.f32.mrf.mxu2  ;;  %v1986_v46 = vrot.slane %v1984_v35, 3 }
 0x125   : > { %v3895_v55 = vadd.f32 %v1044_v50, %v884_v43  ;;  %2060 = vmatmul.bf16.gmra.mxu3 %v1970_v51  ;;  %v1943_v50 = vor.u32 %v1942_v41, %v1939_v38 }
 0x126   : > { %2245 = vmatmul.bf16.gmra.mxu0 %v2169_v54  ;;  %v1987_v52 = vor.u32 %v1986_v46, %v1983_v42  ;;  %v2172_v54 = vrot.slane %v2161_v49, 3 }
 0x127   : > { %v1952_v56 = vsel %vm1935_vm10, %v1943_v50, %v3882_v17 }
 0x128   : > { %v3898_v57 = vpop.f32.mrf.mxu3  ;;  %v1988_v59 = vsel %vm1935_vm10, %v1978_v13, %v1987_v52 }
 0x129   : > { %v861_v40 = vpop.f32.mrf.mxu1 }
 0x12a   : > { %v885_v61 = vadd.f32 %v861_v40, %v643_v32 }
 0x12b   : > { %v648_v24 = vpop.f32.mrf.mxu0 }
 0x12c   : > { %v1046_v1 = vpop.f32.mrf.mxu2 }
 0x12d   : > { %v3900_v4 = vadd.f32 %v1046_v1, %v885_v61  ;;  %v2173_v61 = vsel %vm2162_vm9, %v2170_v16, %v2172_v54 }
 0x130   : > { %v3902_v11 = vpop.f32.mrf.mxu3 }
 0x131   : > { %v864_v10 = vpop.f32.mrf.mxu1  ;;  %1843 = vmatmul.bf16.gmra.mxu2 %v1761_v12 }
 0x132   : > { %v886_v15 = vadd.f32 %v864_v10, %v646_v47 }
 0x133   : > { %v1455_v20 = vpop.f32.mrf.mxu0 }
 0x134   : > { %1659 = vmatmul.bf16.gmra.mxu1 %v1577_v18  ;;  %v1049_v21 = vpop.f32.mrf.mxu2 }
 0x135   : > { %v1071_v26 = vadd.f32 %v1049_v21, %v886_v15  ;;  %2065 = vmatmul.bf16.gmra.mxu3 %v1979_v22 }
 0x136   : > { %2250 = vmatmul.bf16.gmra.mxu0 %v2171_v28 }
 0x138   : > { %v661_v33 = vpop.f32.mrf.mxu3 }
 0x139   : > { %v866_v32 = vpop.f32.mrf.mxu1 }
 0x13a   : > { %v887_v36 = vadd.f32 %v866_v32, %v648_v24 }
 0x13b   : > { %v1457_v43 = vpop.f32.mrf.mxu0 }
 0x13c   : > { %v1051_v45 = vpop.f32.mrf.mxu2 }
 0x13d   : > { %v1072_v47 = vadd.f32 %v1051_v45, %v887_v36 }
 0x140   : > { %v663_v51 = vpop.f32.mrf.mxu3 }
 0x141   : > { %v869_v44 = vpop.f32.mrf.mxu1 }
 0x142   : > { %v888_v53 = vadd.f32 %v869_v44, %v3888_v27 }
 0x143   : > { %v1460_v40 = vpop.f32.mrf.mxu0 }
 0x144   : > { %2050 = vmatmul.bf16.vlgmr.msra.gmra.mxu1 %v1952_v56  ;;  %v1054_v58 = vpop.f32.mrf.mxu2 }
 0x145   : > { %v1073_v60 = vadd.f32 %v1054_v58, %v888_v53  ;;  %2070 = vmatmul.bf16.gmra.mxu3 %v1988_v59 }
 0x146   : > { %2255 = vmatmul.bf16.gmra.mxu0 %v2173_v61 }
 0x148   : > { %v1228_v24 = vpop.f32.mrf.mxu3 }
 0x149   : > { %v871_v0 = vpop.f32.mrf.mxu1  ;;  %v1253_v27 = vadd.f32 %v1228_v24, %v3895_v55 }
 0x14a   : > { %v889_v1 = vadd.f32 %v871_v0, %v3890_v39 }
 0x14b   : > { %v1462_v2 = vpop.f32.mrf.mxu0  ;;  %v1480_v17 = vadd.f32 %v1455_v20, %v1253_v27 }
 0x14c   : > { %v1056_v62 = vpop.f32.mrf.mxu2 }
 0x14d   : > { %v1074_v3 = vadd.f32 %v1056_v62, %v889_v1 }
 0x150   : > { %v1230_v6 = vpop.f32.mrf.mxu3 }
 0x151   : > { %v874_v5 = vpop.f32.mrf.mxu1  ;;  %v1254_v8 = vadd.f32 %v1230_v6, %v3900_v4 }
 0x152   : > { %v890_v7 = vadd.f32 %v874_v5, %v3898_v57 }
 0x153   : > { %v1465_v9 = vpop.f32.mrf.mxu0  ;;  %v1481_v13 = vadd.f32 %v1457_v43, %v1254_v8 }
 0x154   : > { %v1059_v10 = vpop.f32.mrf.mxu2 }
 0x155   : > { %v1075_v12 = vadd.f32 %v1059_v10, %v890_v7 }
 0x158   : > { %v1233_v15 = vpop.f32.mrf.mxu3 }
 0x159   : > { %v876_v14 = vpop.f32.mrf.mxu1  ;;  %v1255_v16 = vadd.f32 %v1233_v15, %v1071_v26 }
 0x15a   : > { %v891_v39 = vadd.f32 %v876_v14, %v3902_v11 }
 0x15b   : > { %v1467_v55 = vpop.f32.mrf.mxu0  ;;  %v1482_v21 = vadd.f32 %v1460_v40, %v1255_v16 }
 0x15c   : > { %v1061_v18 = vpop.f32.mrf.mxu2 }
 0x15d   : > { %v1076_v19 = vadd.f32 %v1061_v18, %v891_v39 }
 0x160   : > { %v1235_v22 = vpop.f32.mrf.mxu3 }
 0x161   : > { %v879_v20 = vpop.f32.mrf.mxu1  ;;  %v1256_v28 = vadd.f32 %v1235_v22, %v1072_v47 }
 0x162   : > { %v892_v23 = vadd.f32 %v879_v20, %v661_v33 }
 0x163   : > { %v1470_v57 = vpop.f32.mrf.mxu0  ;;  %v1483_v30 = vadd.f32 %v1462_v2, %v1256_v28 }
 0x164   : > { %v1064_v29 = vpop.f32.mrf.mxu2 }
 0x165   : > { %v1077_v4 = vadd.f32 %v1064_v29, %v892_v23 }
 0x168   : > { %v1238_v32 = vpop.f32.mrf.mxu3 }
 0x169   : > { %v881_v31 = vpop.f32.mrf.mxu1  ;;  %v1257_v35 = vadd.f32 %v1238_v32, %v1073_v60 }
 0x16a   : > { %v893_v34 = vadd.f32 %v881_v31, %v663_v51 }
 0x16b   : > { %v1472_v36 = vpop.f32.mrf.mxu0  ;;  %v1484_v26 = vadd.f32 %v1465_v9, %v1257_v35 }
 0x16c   : > { %v1066_v37 = vpop.f32.mrf.mxu2 }
 0x16d   : > { %v1078_v11 = vadd.f32 %v1066_v37, %v893_v34 }
 0x170   : > { %v1240_v41 = vpop.f32.mrf.mxu3 }
 0x171   : > { %v1640_v38 = vpop.f32.mrf.mxu1  ;;  %v1258_v45 = vadd.f32 %v1240_v41, %v1074_v3 }
 0x172   : > { %v1665_v43 = vadd.f32 %v1640_v38, %v1480_v17 }
 0x173   : > { %v1475_v42 = vpop.f32.mrf.mxu0  ;;  %v1485_v47 = vadd.f32 %v1467_v55, %v1258_v45 }
 0x174   : > { %v1824_v46 = vpop.f32.mrf.mxu2 }
 0x175   : > { %v3918_v33 = vadd.f32 %v1824_v46, %v1665_v43 }
 0x178   : > { %v1243_v50 = vpop.f32.mrf.mxu3 }
 0x179   : > { %v1642_v49 = vpop.f32.mrf.mxu1  ;;  %v1259_v52 = vadd.f32 %v1243_v50, %v1075_v12 }
 0x17a   : > { %v3920_v44 = vadd.f32 %v1642_v49, %v1481_v13 }
 0x17b   : > { %v1477_v51 = vpop.f32.mrf.mxu0  ;;  %v1486_v54 = vadd.f32 %v1470_v57, %v1259_v52 }
 0x17c   : > { %v3922_v53 = vpop.f32.mrf.mxu2 }
 0x180   : > { %v1245_v40 = vpop.f32.mrf.mxu3 }
 0x181   : > { %v1645_v56 = vpop.f32.mrf.mxu1  ;;  %v1260_v58 = vadd.f32 %v1245_v40, %v1076_v19 }
 0x182   : > { %v1667_v7 = vadd.f32 %v1645_v56, %v1482_v21 }
 0x183   : > { %v3924_v59 = vpop.f32.mrf.mxu0  ;;  %v1487_v61 = vadd.f32 %v1472_v36, %v1260_v58 }
 0x184   : > { %v1829_v60 = vpop.f32.mrf.mxu2 }
 0x185   : > { %v1851_v8 = vadd.f32 %v1829_v60, %v1667_v7 }
 0x188   : > { %v1248_v24 = vpop.f32.mrf.mxu3 }
 0x189   : > { %v1647_v0 = vpop.f32.mrf.mxu1  ;;  %v1261_v1 = vadd.f32 %v1248_v24, %v1077_v4 }
 0x18a   : > { %v1668_v39 = vadd.f32 %v1647_v0, %v1483_v30 }
 0x18b   : > { %v3926_v27 = vpop.f32.mrf.mxu0  ;;  %v3928_v2 = vadd.f32 %v1475_v42, %v1261_v1 }
 0x18c   : > { %v1831_v62 = vpop.f32.mrf.mxu2 }
 0x18d   : > { %v1852_v55 = vadd.f32 %v1831_v62, %v1668_v39  ;;  %v2344_v39 = vpop.permute.xlu0 %2343 }
 0x18e   : > { %vm2358_vm15 = vcmp.eq.s32.totalorder %v2344_v39, 1 }
 0x190   : > { %v1250_v17 = vpop.f32.mrf.mxu3 }
 0x191   : > { %v1650_v3 = vpop.f32.mrf.mxu1  ;;  %v1262_v5 = vadd.f32 %v1250_v17, %v1078_v11  ;;  %v2350_v17 = vpop.permute.xlu1 %2349 }
 0x192   : > { %v1669_v30 = vadd.f32 %v1650_v3, %v1484_v26  ;;  %vm2360_vm14 = vcmp.eq.s32.totalorder %v2350_v17, 1 }
 0x193   : > { %v2241_v6 = vpop.f32.mrf.mxu0  ;;  %v3930_v9 = vadd.f32 %v1477_v51, %v1262_v5 }
 0x194   : > { %v1834_v13 = vpop.f32.mrf.mxu2 }
 0x195   : > { %v1853_v32 = vadd.f32 %v1834_v13, %v1669_v30 }
 0x198   : > { %v2056_v12 = vpop.f32.mrf.mxu3 }
 0x199   : > { %v1652_v10 = vpop.f32.mrf.mxu1  ;;  %v2078_v14 = vadd.f32 %v2056_v12, %v1851_v8 }
 0x19a   : > { %v1670_v34 = vadd.f32 %v1652_v10, %v1485_v47 }
 0x19b   : > { %v2243_v15 = vpop.f32.mrf.mxu0  ;;  %v3932_v16 = vadd.f32 %v2241_v6, %v2078_v14 }
 0x19c   : > { %v1836_v22 = vpop.f32.mrf.mxu2 }
 0x19d   : > { %v3939_v21 = vsel %vm2353_vm11, %v3932_v16, 0.0  ;;  %v1854_v36 = vadd.f32 %v1836_v22, %v1670_v34 }
 0x1a0   : > { %v2058_v19 = vpop.f32.mrf.mxu3 }
 0x1a1   : > { %v1655_v18 = vpop.f32.mrf.mxu1  ;;  %v2079_v20 = vadd.f32 %v2058_v19, %v1852_v55 }
 0x1a2   : > { %v1671_v52 = vadd.f32 %v1655_v18, %v1486_v54 }
 0x1a3   : > { %v3941_v23 = vadd.f32 %v2243_v15, %v2079_v20  ;;  %v2246_v28 = vpop.f32.mrf.mxu0 }
 0x1a4   : > { %v1839_v35 = vpop.f32.mrf.mxu2 }
 0x1a5   : > { %v3330_v57 = vpack.c.bf16 %v3941_v23, %v3932_v16  ;;  %v1855_v51 = vadd.f32 %v1839_v35, %v1671_v52 }
 0x1a7   : > { %3357 = vst [vmem:[%s3946_s20 + $0x8] sm:$0xff] %v3330_v57  }
 0x1a8   : > { %v2061_v4 = vpop.f32.mrf.mxu3 }
 0x1a9   : > { %v1657_v29 = vpop.f32.mrf.mxu1  ;;  %v2080_v37 = vadd.f32 %v2061_v4, %v1853_v32 }
 0x1aa   : > { %v1672_v56 = vadd.f32 %v1657_v29, %v1487_v61  ;;  %v1850_v61 = vadd.f32 %v3922_v53, %v3920_v44 }
 0x1ab   : > { %v2248_v31 = vpop.f32.mrf.mxu0  ;;  %v3951_v43 = vadd.f32 %v2246_v28, %v2080_v37 }
 0x1ac   : > { %v1841_v49 = vpop.f32.mrf.mxu2 }
 0x1ad   : > { %v1856_v58 = vadd.f32 %v1841_v49, %v1672_v56 }
 0x1b0   : > { %v2063_v38 = vpop.f32.mrf.mxu3 }
 0x1b1   : > { %v1660_v11 = vpop.f32.mrf.mxu1  ;;  %v2081_v41 = vadd.f32 %v2063_v38, %v1854_v36 }
 0x1b2   : > { %v1673_v54 = vadd.f32 %v1660_v11, %v3928_v2  ;;  %v2341_v2 = vpop.permute.xlu1 %2340 }
 0x1b3   : > { %v3953_v45 = vadd.f32 %v2248_v31, %v2081_v41  ;;  %v2251_v42 = vpop.f32.mrf.mxu0  ;;  %vm2357_vm0 = vcmp.eq.s32.totalorder %v2341_v2, 1 }
 0x1b4   : > { %v1844_v3 = vpop.f32.mrf.mxu2 }
 0x1b5   : > { %v3335_v46 = vpack.c.bf16 %v3953_v45, %v3951_v43  ;;  %v3962_v50 = vsel %vm2356_vm12, %v3953_v45, 0.0  ;;  %v1857_v10 = vadd.f32 %v1844_v3, %v1673_v54 }
 0x1b6   : > { %v2401_v63 = vmul.f32 %v3962_v50, %v3962_v50 }
 0x1b7   : > { %3358 = vst [vmem:[%s3946_s20 + $0x10] sm:$0xff] %v3335_v46  }
 0x1b8   : > { %v2066_v47 = vpop.f32.mrf.mxu3 }
 0x1b9   : > { %v1662_v26 = vpop.f32.mrf.mxu1  ;;  %v2082_v60 = vadd.f32 %v2066_v47, %v1855_v51  ;;  %v3403_v47 = vmov 1.0  }
 0x1ba   : > { %v1674_v19 = vadd.f32 %v1662_v26, %v3930_v9  ;;  %v2332_v9 = vpop.permute.xlu1 %2331 }
 0x1bb   : > { %v2253_v40 = vpop.f32.mrf.mxu0  ;;  %v2267_v5 = vadd.f32 %v2251_v42, %v2082_v60  ;;  %vm2354_vm2 = vcmp.eq.s32.totalorder %v2332_v9, 1 }
 0x1bc   : > { %v1846_v18 = vpop.f32.mrf.mxu2  ;;  %v2364_v41 = vsel %vm2354_vm2, %v3941_v23, 0.0 }
 0x1bd   : > { %v1858_v20 = vadd.f32 %v1846_v18, %v1674_v19  ;;  %v2367_v35 = vsel %vm2357_vm0, %v2267_v5, 0.0  ;;  %v2399_v25 = vmul.f32 %v2364_v41, %v2364_v41 }
 0x1be   : > { %v2402_v37 = vmul.f32 %v2367_v35, %v2367_v35 }
 0x1c0   : > { %v2068_v24 = vpop.f32.mrf.mxu3 }
 0x1c1   : > { %v2051_v0 = vpop.f32.mrf.mxu1  ;;  %v2083_v62 = vadd.f32 %v2068_v24, %v1856_v58 }
 0x1c2   : > { %v2076_v1 = vadd.f32 %v2051_v0, %v3918_v33  ;;  %v2323_v46 = vpop.permute.xlu1 %2322 }
 0x1c3   : > { %v2268_v7 = vadd.f32 %v2253_v40, %v2083_v62  ;;  %v2256_v12 = vpop.f32.mrf.mxu0  ;;  %vm2351_vm4 = vcmp.eq.s32.totalorder %v2323_v46, 1 }
 0x1c4   : > { %v3966_v6 = vadd.f32 %v3924_v59, %v2076_v1 }
 0x1c5   : > { %v3340_v8 = vpack.c.bf16 %v2268_v7, %v2267_v5  ;;  %v2368_v32 = vsel %vm2358_vm15, %v2268_v7, 0.0 }
 0x1c6   : > { %v2403_v36 = vmul.f32 %v2368_v32, %v2368_v32  ;;  %v2361_v49 = vsel %vm2351_vm4, %v3966_v6, 0.0 }
 0x1c7   : > { %3359 = vst [vmem:[%s3946_s20 + $0x18] sm:$0xff] %v3340_v8  }
 0x1c8   : > { %v2071_v33 = vpop.f32.mrf.mxu3 }
 0x1c9   : > { %v2053_v13 = vpop.f32.mrf.mxu1  ;;  %v2084_v15 = vadd.f32 %v2071_v33, %v1857_v10 }
 0x1ca   : > { %v2077_v14 = vadd.f32 %v2053_v13, %v1850_v61 }
 0x1cb   : > { %v2269_v59 = vadd.f32 %v2256_v12, %v2084_v15  ;;  %v2258_v57 = vpop.f32.mrf.mxu0 }
 0x1cc   : > { %v2262_v55 = vadd.f32 %v3926_v27, %v2077_v14  ;;  %v2335_v27 = vpop.permute.xlu0 %2334 }
 0x1cd   : > { %v2369_v53 = vsel %vm2359_vm13, %v2269_v59, 0.0  ;;  %vm2355_vm1 = vcmp.eq.s32.totalorder %v2335_v27, 1 }
 0x1ce   : > { %v3325_v44 = vpack.c.bf16 %v2262_v55, %v3966_v6  ;;  %v2404_v34 = vmul.f32 %v2369_v53, %v2369_v53  ;;  %v2365_v11 = vsel %vm2355_vm1, %v3951_v43, 0.0 }
 0x1cf   : > { %v2400_v42 = vmul.f32 %v2365_v11, %v2365_v11 }
 0x1d0   : > { %3326 = vst [vmem:[%s3946_s20] sm:$0xff] %v3325_v44   ;;  %v2073_v22 = vpop.f32.mrf.mxu3 }
 0x1d1   : > { %v2085_v28 = vadd.f32 %v2073_v22, %v1858_v20 }
 0x1d3   : > { %v2270_v29 = vadd.f32 %v2258_v57, %v2085_v28 }
 0x1d4   : > { %v2326_v38 = vpop.permute.xlu0 %2325 }
 0x1d5   : > { %v2370_v4 = vsel %vm2360_vm14, %v2270_v29, 0.0  ;;  %v3345_v30 = vpack.c.bf16 %v2270_v29, %v2269_v59  ;;  %3137 = vmatpush.msk.msrb.mxu1 %vm2360_vm14, %v2270_v29  ;;  %vm2352_vm3 = vcmp.eq.s32.totalorder %v2326_v38, 1 }
 0x1d6   : > { %v2405_v31 = vmul.f32 %v2370_v4, %v2370_v4 }
 0x1d7   : > { %3360 = vst [vmem:[%s3946_s20 + $0x20] sm:$0xff] %v3345_v30   ;;  %3138 = vmatpush.msk.msrb.mxu1 %vm2359_vm13, %v2269_v59 }
 0x1d8   : > { %2412 = vmatpush.msra.mxu2 %v2405_v31 }
 0x1d9   : > { %3139 = vmatpush.msk.msrb.mxu1 %vm2358_vm15, %v2268_v7 }
 0x1da   : > { %2413 = vmatpush.msra.mxu2 %v2404_v34 }
 0x1db   : > { %3140 = vmatpush.msk.msrb.mxu1 %vm2357_vm0, %v2267_v5 }
 0x1dc   : > { %2414 = vmatpush.msra.mxu2 %v2403_v36 }
 0x1dd   : > { %3141 = vmatpush.msk.msrb.mxu1 %vm2356_vm12, %v3953_v45  ;;  %v2362_v45 = vsel %vm2352_vm3, %v2262_v55, 0.0 }
 0x1de   : > { %2415 = vmatpush.msra.mxu2 %v2402_v37  ;;  %v2397_v26 = vmul.f32 %v2362_v45, %v2362_v45 }
 0x1df   : > { %3142 = vmatpush.msk.msrb.mxu1 %vm2355_vm1, %v3951_v43  ;;  %v2398_v43 = vmul.f32 %v3939_v21, %v3939_v21 }
 0x1e0   : > { %2416 = vmatpush.msra.mxu2 %v2401_v63 }
 0x1e1   : > { %3143 = vmatpush.msk.msrb.mxu1 %vm2354_vm2, %v3941_v23  ;;  %v2396_v23 = vmul.f32 %v2361_v49, %v2361_v49 }
 0x1e2   : > { %2417 = vmatpush.msra.mxu2 %v2400_v42 }
 0x1e3   : > { %3144 = vmatpush.msk.msrb.mxu1 %vm2353_vm11, %v3932_v16 }
 0x1e4   : > { %2418 = vmatpush.msra.mxu2 %v2399_v25 }
 0x1e5   : > { %3145 = vmatpush.msk.msrb.mxu1 %vm2352_vm3, %v2262_v55 }
 0x1e6   : > { %2419 = vmatpush.msra.mxu2 %v2398_v43 }
 0x1e7   : > { %3146 = vmatpush.msk.msrb.mxu1 %vm2351_vm4, %v3966_v6 }
 0x1e8   : > { %2420 = vmatpush.msra.mxu2 %v2397_v26  ;;  %3147 = vmatmul.msk.f32.vlgmr.msrb.gmra.mxu1 %vm2371_vm5, %v3403_v47 }
 0x1ea   : > { %2421 = vmatpush.msra.mxu2 %v2396_v23 }
 0x1eb   : > { %3148 = vmatmul.msk.f32.vlgmr.msra.gmra.mxu2 %vm2371_vm5, %v3403_v47 }
 0x265   : > { %v2392_v48 = vpop.f32.mrf.mxu1 }
 0x266   : > { %2395 = vst [vmem:[%s289_s26] sm:$0x1] %v2392_v48 }
 0x26e   : > { %v2423_v16 = vpop.f32.mrf.mxu2 }
 0x26f   : > { %2426 = vst [vmem:[%s289_s26 + $0x1] sm:$0x1] %v2423_v16 }
 0x270 PF: > { %s18_s24 = sadd.s32 1, %s3400_s24  }
 0x271   : > { %p15_p4 = scmp.ge.s32.totalorder %s18_s24, 4  }
 0x273   :  { %17 = sbr.rel (!%p15_p4) target bundleno = 1 (0x1), region = 94 }

</bundles_post_ra>
